<compile_context>
chip_gen: v5e
topology: v5e:2x2
jax: 0.10.0
libtpu: 0.0.40
codegen_flags: <defaults>
</compile_context>

<pallas_src>
import functools

import jax
import jax.numpy as jnp
from jax import lax
from jax.experimental import pallas as pl
from jax.experimental.pallas import tpu as pltpu

EPS = 1e-5
LANE = 128


def _round_up(x, m):
    return ((x + m - 1) // m) * m


# ---------------------------------------------------------------------------
# Kernel 1: fused [optional BN+ReLU of previous layer] + zero-pad + 3x3 conv
#           + bias + per-image batch-stat partial sums.
# ---------------------------------------------------------------------------
def _make_conv_kernel(H, W, cin_p, cout_p, apply_act):
    def conv_body(a, w_ref, b_ref, out_ref, sum_ref, ssq_ref):
        # a: (H, W, cin_p) f32 activation (already BN+ReLU'd if apply_act)
        a = a.astype(jnp.bfloat16)                       # MXU operand dtype
        # Zero spatial padding in-register (no extra HBM pass for jnp.pad).
        zc = jnp.zeros((H, 1, cin_p), jnp.bfloat16)
        zr = jnp.zeros((1, W + 2, cin_p), jnp.bfloat16)
        xp = jnp.concatenate(
            [zr, jnp.concatenate([zc, a, zc], axis=1), zr], axis=0)  # (H+2,W+2,C)

        # Build the 3 column(kx)-shifted views ONCE and fold them into the
        # contraction (K) dimension: K = 3*cin_p.  Reused across all 3 ky taps.
        cat = jnp.concatenate([xp[:, kx:kx + W, :] for kx in range(3)],
                              axis=-1)                    # (H+2, W, 3*cin_p)

        acc = jnp.zeros((H * W, cout_p), jnp.float32)
        for ky in range(3):                               # 3 fat matmuls
            patch = cat[ky:ky + H].reshape(H * W, 3 * cin_p)
            acc = acc + jnp.dot(patch, w_ref[ky],
                                preferred_element_type=jnp.float32)
        acc = acc + b_ref[0, :]

        out_ref[0] = acc.reshape(H, W, cout_p)
        # Per-program partial sums (reduced outside) -> grid can be "parallel".
        sum_ref[0, 0, :] = acc.sum(axis=0)
        ssq_ref[0, 0, :] = (acc * acc).sum(axis=0)

    if apply_act:
        def kernel(y_ref, scale_ref, shift_ref, w_ref, b_ref,
                   out_ref, sum_ref, ssq_ref):
            # Fused BN (precomputed affine) + ReLU of the previous layer.
            a = jnp.maximum(y_ref[0] * scale_ref[0, :] + shift_ref[0, :], 0.0)
            conv_body(a, w_ref, b_ref, out_ref, sum_ref, ssq_ref)
    else:
        def kernel(y_ref, w_ref, b_ref, out_ref, sum_ref, ssq_ref):
            conv_body(y_ref[0], w_ref, b_ref, out_ref, sum_ref, ssq_ref)
    return kernel


def conv3x3_stats(x, w_k, bias, scale=None, shift=None, *, apply_act=False):
    """x: (N,H,W,cin_p) f32; w_k: (3, 3*cin_p, cout_p) bf16; bias: (1,cout_p).

    Returns conv output (N,H,W,cout_p) f32 and per-channel sum / sum-of-squares.
    """
    N, H, W, cin_p = x.shape
    cout_p = w_k.shape[-1]
    kernel = _make_conv_kernel(H, W, cin_p, cout_p, apply_act)

    in_specs = [pl.BlockSpec((1, H, W, cin_p), lambda n: (n, 0, 0, 0))]
    args = [x]
    if apply_act:
        in_specs += [pl.BlockSpec((1, cin_p), lambda n: (0, 0)),
                     pl.BlockSpec((1, cin_p), lambda n: (0, 0))]
        args += [scale.reshape(1, cin_p), shift.reshape(1, cin_p)]
    in_specs += [pl.BlockSpec((3, 3 * cin_p, cout_p), lambda n: (0, 0, 0)),
                 pl.BlockSpec((1, cout_p), lambda n: (0, 0))]
    args += [w_k, bias]

    cost = pl.CostEstimate(
        flops=2 * N * H * W * 9 * cin_p * cout_p,
        transcendentals=0,
        bytes_accessed=N * H * W * (cin_p + cout_p) * 4 + w_k.size * 2)

    y, s, q = pl.pallas_call(
        kernel,
        out_shape=(jax.ShapeDtypeStruct((N, H, W, cout_p), jnp.float32),
                   jax.ShapeDtypeStruct((N, 1, cout_p), jnp.float32),
                   jax.ShapeDtypeStruct((N, 1, cout_p), jnp.float32)),
        grid=(N,),
        in_specs=in_specs,
        out_specs=(pl.BlockSpec((1, H, W, cout_p), lambda n: (n, 0, 0, 0)),
                   pl.BlockSpec((1, 1, cout_p), lambda n: (n, 0, 0)),
                   pl.BlockSpec((1, 1, cout_p), lambda n: (n, 0, 0))),
        compiler_params=pltpu.CompilerParams(
            dimension_semantics=("parallel",)),
        cost_estimate=cost,
    )(*args)
    return y, s.sum(axis=(0, 1)), q.sum(axis=(0, 1))


# ---------------------------------------------------------------------------
# Kernel 2: final BN (precomputed affine) + ReLU, row-tiled, lane-dense.
# ---------------------------------------------------------------------------
def _bn_relu_kernel(y_ref, scale_ref, shift_ref, o_ref):
    o_ref[...] = jnp.maximum(
        y_ref[...] * scale_ref[0, :] + shift_ref[0, :], 0.0)


def bn_relu(y, scale, shift):
    N, H, W, C = y.shape
    th = 8 if H % 8 == 0 else H
    cost = pl.CostEstimate(flops=2 * N * H * W * C, transcendentals=0,
                           bytes_accessed=2 * N * H * W * C * 4)
    return pl.pallas_call(
        _bn_relu_kernel,
        out_shape=jax.ShapeDtypeStruct((N, H, W, C), jnp.float32),
        grid=(N, H // th),
        in_specs=[pl.BlockSpec((1, th, W, C), lambda n, h: (n, h, 0, 0)),
                  pl.BlockSpec((1, C), lambda n, h: (0, 0)),
                  pl.BlockSpec((1, C), lambda n, h: (0, 0))],
        out_specs=pl.BlockSpec((1, th, W, C), lambda n, h: (n, h, 0, 0)),
        compiler_params=pltpu.CompilerParams(
            dimension_semantics=("parallel", "parallel")),
        cost_estimate=cost,
    )(y, scale.reshape(1, C), shift.reshape(1, C))


# ---------------------------------------------------------------------------
# VGGBlock forward (Pallas)
# ---------------------------------------------------------------------------
def _bn_scale_shift(s, q, count, gamma, beta):
    mean = s / count
    var = jnp.maximum(q / count - mean * mean, 0.0)   # clamp cancellation
    scale = gamma * lax.rsqrt(var + EPS)
    shift = beta - mean * scale
    return scale, shift


@functools.partial(jax.jit, static_argnames=("n_out",))
def vgg_block_forward(x_nchw, params, *, n_out):
    x = jnp.transpose(x_nchw, (0, 2, 3, 1)).astype(jnp.float32)   # NCHW -> NHWC
    N, H, W, cin = x.shape
    cin_p = params["w1"].shape[1] // 3
    x = jnp.pad(x, ((0, 0), (0, 0), (0, 0), (0, cin_p - cin)))    # lane-dense C
    count = jnp.float32(N * H * W)

    # Layer 1: conv1 + batch stats (BN1+ReLU deferred into the layer-2 kernel).
    y1, s1, q1 = conv3x3_stats(x, params["w1"], params["b1"])
    sc1, sh1 = _bn_scale_shift(s1, q1, count, params["gamma1"], params["beta1"])

    # Layer 2: fused BN1+ReLU (input path) + zero-pad + conv2 + batch stats.
    y2, s2, q2 = conv3x3_stats(y1, params["w2"], params["b2"],
                               scale=sc1, shift=sh1, apply_act=True)
    sc2, sh2 = _bn_scale_shift(s2, q2, count, params["gamma2"], params["beta2"])

    out = bn_relu(y2, sc2, sh2)                                   # (N,H,W,Cp)
    out = out[..., :n_out]
    return jnp.transpose(out, (0, 3, 1, 2))                       # NHWC -> NCHW


# ---------------------------------------------------------------------------
# Parameter packing helpers (PyTorch layouts -> kernel layouts)
# ---------------------------------------------------------------------------
def _prep_conv_weight(w_oihw, cin_p, cout_p):
    # (Cout, Cin, 3, 3) -> (3, 3*cin_p, cout_p) bf16, kx folded into K.
    cout, cin, _, _ = w_oihw.shape
    w_t = jnp.transpose(w_oihw, (2, 3, 1, 0))                     # (ky,kx,ci,co)
    w_t = jnp.pad(w_t, ((0, 0), (0, 0), (0, cin_p - cin), (0, cout_p - cout)))
    return w_t.reshape(3, 3 * cin_p, cout_p).astype(jnp.bfloat16)


def _pad_row(v, cp):   # (c,) -> (1, cp) f32
    return jnp.pad(v, (0, cp - v.shape[0])).astype(jnp.float32)[None, :]


def _pad_vec(v, cp):   # (c,) -> (cp,) f32
    return jnp.pad(v, (0, cp - v.shape[0])).astype(jnp.float32)


# ---------------------------------------------------------------------------
# Pure-JAX f32 reference (mirrors the PyTorch forward in training mode)
# ---------------------------------------------------------------------------
def vgg_block_reference(x, w1, b1, g1, be1, w2, b2, g2, be2):
    def conv(x_, w_, b_):
        y = lax.conv_general_dilated(
            x_, w_, window_strides=(1, 1), padding=((1, 1), (1, 1)),
            dimension_numbers=("NCHW", "OIHW", "NCHW"))
        return y + b_[None, :, None, None]

    def bn_relu_ref(y, g, be):
        mean = y.mean(axis=(0, 2, 3), keepdims=True)
        var = y.var(axis=(0, 2, 3), keepdims=True)        # biased (train mode)
        yn = (y - mean) / jnp.sqrt(var + EPS)
        return jnp.maximum(yn * g[None, :, None, None] + be[None, :, None, None],
                           0.0)

    out = bn_relu_ref(conv(x, w1, b1), g1, be1)
    out = bn_relu_ref(conv(out, w2, b2), g2, be2)
    return out


if __name__ == "__main__":
    # Small, module-consistent shapes.
    N, Cin, Cmid, Cout, H, W = 2, 4, 8, 4, 16, 16
    cin_p, cmid_p, cout_p = (_round_up(c, LANE) for c in (Cin, Cmid, Cout))

    key = jax.random.PRNGKey(0)
    ks = jax.random.split(key, 5)
    x = jax.random.normal(ks[0], (N, Cin, H, W), jnp.float32)

    # Deterministic parameter init (shapes from VGGBlock.__init__).
    w1 = 0.1 * jax.random.normal(ks[1], (Cmid, Cin, 3, 3), jnp.float32)
    b1 = 0.1 * jax.random.normal(ks[2], (Cmid,), jnp.float32)
    w2 = 0.1 * jax.random.normal(ks[3], (Cout, Cmid, 3, 3), jnp.float32)
    b2 = 0.1 * jax.random.normal(ks[4], (Cout,), jnp.float32)
    g1, be1 = jnp.ones((Cmid,), jnp.float32), jnp.zeros((Cmid,), jnp.float32)
    g2, be2 = jnp.ones((Cout,), jnp.float32), jnp.zeros((Cout,), jnp.float32)

    # TODO(synk): BatchNorm running_mean / running_var buffer updates (training
    # side effect of the PyTorch module) are not materialized here.
    params = {
        "w1": _prep_conv_weight(w1, cin_p, cmid_p),
        "b1": _pad_row(b1, cmid_p),
        "gamma1": _pad_vec(g1, cmid_p), "beta1": _pad_vec(be1, cmid_p),
        "w2": _prep_conv_weight(w2, cmid_p, cout_p),
        "b2": _pad_row(b2, cout_p),
        "gamma2": _pad_vec(g2, cout_p), "beta2": _pad_vec(be2, cout_p),
    }

    out = vgg_block_forward(x, params, n_out=Cout)
    out = jax.block_until_ready(out)

    ref = vgg_block_reference(x, w1, b1, g1, be1, w2, b2, g2, be2)
    max_err = float(jnp.max(jnp.abs(out - ref)))
    assert out.shape == (N, Cout, H, W), out.shape
    assert max_err < 5e-2, f"max abs err {max_err}"

    print("KERNEL_OK")
</pallas_src>

<mosaic_0001>
module attributes {stable_mosaic.version = 11 : i64} {
  func.func @kernel(%arg0: i32, %arg1: memref<1x16x16x128xf32, #tpu.memory_space<vmem>>, %arg2: memref<3x384x128xbf16, #tpu.memory_space<vmem>>, %arg3: memref<1x128xf32, #tpu.memory_space<vmem>>, %arg4: memref<1x16x16x128xf32, #tpu.memory_space<vmem>>, %arg5: memref<1x1x128xf32, #tpu.memory_space<vmem>>, %arg6: memref<1x1x128xf32, #tpu.memory_space<vmem>>) attributes {dimension_semantics = [#tpu.dimension_semantics<parallel>], iteration_bounds = array<i64: 2>, scalar_prefetch = 0 : i64, scratch_operands = 0 : i64, tpu.core_type = #tpu.core_type<tc>, window_params = [{transform_indices = @transform_0, window_bounds = array<i64: 1, 16, 16, 128>}, {pipeline_mode = #tpu.pipeline_mode<synchronous>, transform_indices = @transform_1, window_bounds = array<i64: 3, 384, 128>}, {pipeline_mode = #tpu.pipeline_mode<synchronous>, transform_indices = @transform_2, window_bounds = array<i64: 1, 128>}, {transform_indices = @transform_3, window_bounds = array<i64: 1, 16, 16, 128>}, {transform_indices = @transform_4, window_bounds = array<i64: 1, 1, 128>}, {transform_indices = @transform_5, window_bounds = array<i64: 1, 1, 128>}]} {
    %c0 = arith.constant 0 : index
    %c0_0 = arith.constant 0 : index
    %c0_1 = arith.constant 0 : index
    %c0_2 = arith.constant 0 : index
    %0 = vector.load %arg1[%c0, %c0_0, %c0_1, %c0_2] : memref<1x16x16x128xf32, #tpu.memory_space<vmem>>, vector<1x16x16x128xf32>
    %1 = vector.shape_cast %0 : vector<1x16x16x128xf32> to vector<16x16x128xf32>
    %2 = arith.truncf %1 : vector<16x16x128xf32> to vector<16x16x128xbf16>
    %cst = arith.constant 0.000000e+00 : bf16
    %3 = vector.broadcast %cst : bf16 to vector<16x1x128xbf16>
    %cst_3 = arith.constant 0.000000e+00 : bf16
    %4 = vector.broadcast %cst_3 : bf16 to vector<1x18x128xbf16>
    %5 = tpu.concatenate %3, %2, %3 in 1 : vector<16x1x128xbf16>, vector<16x16x128xbf16>, vector<16x1x128xbf16> -> vector<16x18x128xbf16>
    %6 = tpu.concatenate %4, %5, %4 in 0 : vector<1x18x128xbf16>, vector<16x18x128xbf16>, vector<1x18x128xbf16> -> vector<18x18x128xbf16>
    %7 = vector.extract_strided_slice %6 {offsets = [0, 0, 0], sizes = [18, 16, 128], strides = [1, 1, 1]} : vector<18x18x128xbf16> to vector<18x16x128xbf16>
    %8 = vector.extract_strided_slice %6 {offsets = [0, 1, 0], sizes = [18, 16, 128], strides = [1, 1, 1]} : vector<18x18x128xbf16> to vector<18x16x128xbf16>
    %9 = vector.extract_strided_slice %6 {offsets = [0, 2, 0], sizes = [18, 16, 128], strides = [1, 1, 1]} : vector<18x18x128xbf16> to vector<18x16x128xbf16>
    %10 = tpu.concatenate %7, %8, %9 in 2 : vector<18x16x128xbf16>, vector<18x16x128xbf16>, vector<18x16x128xbf16> -> vector<18x16x384xbf16>
    %cst_4 = arith.constant 0.000000e+00 : f32
    %11 = vector.broadcast %cst_4 : f32 to vector<256x128xf32>
    %12 = vector.extract_strided_slice %10 {offsets = [0, 0, 0], sizes = [16, 16, 384], strides = [1, 1, 1]} : vector<18x16x384xbf16> to vector<16x16x384xbf16>
    %13 = vector.shape_cast %12 : vector<16x16x384xbf16> to vector<256x384xbf16>
    %c0_5 = arith.constant 0 : index
    %c0_6 = arith.constant 0 : index
    %c0_7 = arith.constant 0 : index
    %14 = vector.load %arg2[%c0_5, %c0_6, %c0_7] : memref<3x384x128xbf16, #tpu.memory_space<vmem>>, vector<1x384x128xbf16>
    %15 = vector.shape_cast %14 : vector<1x384x128xbf16> to vector<384x128xbf16>
    %cst_8 = arith.constant dense<0.000000e+00> : vector<256x128xf32>
    %16 = tpu.matmul %13, %15, %cst_8 {dimension_numbers = #tpu.dot_dimension_numbers<[1], [0], [0], [1], [0, 0, 1, 1], [], []>} : vector<256x384xbf16>, vector<384x128xbf16>, vector<256x128xf32> -> vector<256x128xf32>
    %17 = arith.addf %11, %16 : vector<256x128xf32>
    %18 = vector.extract_strided_slice %10 {offsets = [1, 0, 0], sizes = [16, 16, 384], strides = [1, 1, 1]} : vector<18x16x384xbf16> to vector<16x16x384xbf16>
    %19 = vector.shape_cast %18 : vector<16x16x384xbf16> to vector<256x384xbf16>
    %c1 = arith.constant 1 : index
    %c0_9 = arith.constant 0 : index
    %c0_10 = arith.constant 0 : index
    %20 = vector.load %arg2[%c1, %c0_9, %c0_10] : memref<3x384x128xbf16, #tpu.memory_space<vmem>>, vector<1x384x128xbf16>
    %21 = vector.shape_cast %20 : vector<1x384x128xbf16> to vector<384x128xbf16>
    %cst_11 = arith.constant dense<0.000000e+00> : vector<256x128xf32>
    %22 = tpu.matmul %19, %21, %cst_11 {dimension_numbers = #tpu.dot_dimension_numbers<[1], [0], [0], [1], [0, 0, 1, 1], [], []>} : vector<256x384xbf16>, vector<384x128xbf16>, vector<256x128xf32> -> vector<256x128xf32>
    %23 = arith.addf %17, %22 : vector<256x128xf32>
    %24 = vector.extract_strided_slice %10 {offsets = [2, 0, 0], sizes = [16, 16, 384], strides = [1, 1, 1]} : vector<18x16x384xbf16> to vector<16x16x384xbf16>
    %25 = vector.shape_cast %24 : vector<16x16x384xbf16> to vector<256x384xbf16>
    %c2 = arith.constant 2 : index
    %c0_12 = arith.constant 0 : index
    %c0_13 = arith.constant 0 : index
    %26 = vector.load %arg2[%c2, %c0_12, %c0_13] : memref<3x384x128xbf16, #tpu.memory_space<vmem>>, vector<1x384x128xbf16>
    %27 = vector.shape_cast %26 : vector<1x384x128xbf16> to vector<384x128xbf16>
    %cst_14 = arith.constant dense<0.000000e+00> : vector<256x128xf32>
    %28 = tpu.matmul %25, %27, %cst_14 {dimension_numbers = #tpu.dot_dimension_numbers<[1], [0], [0], [1], [0, 0, 1, 1], [], []>} : vector<256x384xbf16>, vector<384x128xbf16>, vector<256x128xf32> -> vector<256x128xf32>
    %29 = arith.addf %23, %28 : vector<256x128xf32>
    %c0_15 = arith.constant 0 : index
    %c0_16 = arith.constant 0 : index
    %30 = vector.load %arg3[%c0_15, %c0_16] : memref<1x128xf32, #tpu.memory_space<vmem>>, vector<1x128xf32>
    %31 = vector.shape_cast %30 : vector<1x128xf32> to vector<128xf32>
    %32 = vector.shape_cast %31 : vector<128xf32> to vector<1x128xf32>
    %33 = vector.broadcast %32 : vector<1x128xf32> to vector<256x128xf32>
    %34 = arith.addf %29, %33 : vector<256x128xf32>
    %35 = vector.shape_cast %34 : vector<256x128xf32> to vector<16x16x128xf32>
    %c0_17 = arith.constant 0 : index
    %c0_18 = arith.constant 0 : index
    %c0_19 = arith.constant 0 : index
    %c0_20 = arith.constant 0 : index
    %36 = vector.load %arg4[%c0_17, %c0_18, %c0_19, %c0_20] : memref<1x16x16x128xf32, #tpu.memory_space<vmem>>, vector<1x16x16x128xf32>
    %37 = vector.shape_cast %36 : vector<1x16x16x128xf32> to vector<16x16x128xf32>
    %38 = vector.shape_cast %35 : vector<16x16x128xf32> to vector<1x16x16x128xf32>
    tpu.vector_store %arg4[%c0_17, %c0_18, %c0_19, %c0_20], %38 {strides = array<i32>} : memref<1x16x16x128xf32, #tpu.memory_space<vmem>>, vector<1x16x16x128xf32>,
    %cst_21 = arith.constant dense<0.000000e+00> : vector<128xf32>
    %39 = vector.multi_reduction <add>, %34, %cst_21 [0] : vector<256x128xf32> to vector<128xf32>
    %c0_22 = arith.constant 0 : index
    %c0_23 = arith.constant 0 : index
    %c0_24 = arith.constant 0 : index
    %40 = vector.load %arg5[%c0_22, %c0_23, %c0_24] : memref<1x1x128xf32, #tpu.memory_space<vmem>>, vector<1x1x128xf32>
    %41 = vector.shape_cast %40 : vector<1x1x128xf32> to vector<128xf32>
    %42 = vector.shape_cast %39 : vector<128xf32> to vector<1x1x128xf32>
    tpu.vector_store %arg5[%c0_22, %c0_23, %c0_24], %42 {strides = array<i32>} : memref<1x1x128xf32, #tpu.memory_space<vmem>>, vector<1x1x128xf32>,
    %43 = arith.mulf %34, %34 : vector<256x128xf32>
    %cst_25 = arith.constant dense<0.000000e+00> : vector<128xf32>
    %44 = vector.multi_reduction <add>, %43, %cst_25 [0] : vector<256x128xf32> to vector<128xf32>
    %c0_26 = arith.constant 0 : index
    %c0_27 = arith.constant 0 : index
    %c0_28 = arith.constant 0 : index
    %45 = vector.load %arg6[%c0_26, %c0_27, %c0_28] : memref<1x1x128xf32, #tpu.memory_space<vmem>>, vector<1x1x128xf32>
    %46 = vector.shape_cast %45 : vector<1x1x128xf32> to vector<128xf32>
    %47 = vector.shape_cast %44 : vector<128xf32> to vector<1x1x128xf32>
    tpu.vector_store %arg6[%c0_26, %c0_27, %c0_28], %47 {strides = array<i32>} : memref<1x1x128xf32, #tpu.memory_space<vmem>>, vector<1x1x128xf32>,
    return
  }
  func.func @transform_0(%arg0: i32) -> (i32, i32, i32, i32) {
    %c0_i32 = arith.constant 0 : i32
    %c0_i32_0 = arith.constant 0 : i32
    %c0_i32_1 = arith.constant 0 : i32
    %c0_i32_2 = arith.constant 0 : i32
    return %arg0, %c0_i32, %c0_i32_0, %c0_i32_1 : i32, i32, i32, i32
  }
  func.func @transform_1(%arg0: i32) -> (i32, i32, i32) {
    %c0_i32 = arith.constant 0 : i32
    %c0_i32_0 = arith.constant 0 : i32
    %c0_i32_1 = arith.constant 0 : i32
    %c0_i32_2 = arith.constant 0 : i32
    return %c0_i32, %c0_i32_0, %c0_i32_1 : i32, i32, i32
  }
  func.func @transform_2(%arg0: i32) -> (i32, i32) {
    %c0_i32 = arith.constant 0 : i32
    %c0_i32_0 = arith.constant 0 : i32
    %c0_i32_1 = arith.constant 0 : i32
    return %c0_i32, %c0_i32_0 : i32, i32
  }
  func.func @transform_3(%arg0: i32) -> (i32, i32, i32, i32) {
    %c0_i32 = arith.constant 0 : i32
    %c0_i32_0 = arith.constant 0 : i32
    %c0_i32_1 = arith.constant 0 : i32
    %c0_i32_2 = arith.constant 0 : i32
    return %arg0, %c0_i32, %c0_i32_0, %c0_i32_1 : i32, i32, i32, i32
  }
  func.func @transform_4(%arg0: i32) -> (i32, i32, i32) {
    %c0_i32 = arith.constant 0 : i32
    %c0_i32_0 = arith.constant 0 : i32
    %c0_i32_1 = arith.constant 0 : i32
    return %arg0, %c0_i32, %c0_i32_0 : i32, i32, i32
  }
  func.func @transform_5(%arg0: i32) -> (i32, i32, i32) {
    %c0_i32 = arith.constant 0 : i32
    %c0_i32_0 = arith.constant 0 : i32
    %c0_i32_1 = arith.constant 0 : i32
    return %arg0, %c0_i32, %c0_i32_0 : i32, i32, i32
  }
}

module attributes {stable_mosaic.version = 11 : i64} {
  func.func @kernel(%arg0: i32, %arg1: memref<1x16x16x128xf32, #tpu.memory_space<vmem>>, %arg2: memref<1x128xf32, #tpu.memory_space<vmem>>, %arg3: memref<1x128xf32, #tpu.memory_space<vmem>>, %arg4: memref<3x384x128xbf16, #tpu.memory_space<vmem>>, %arg5: memref<1x128xf32, #tpu.memory_space<vmem>>, %arg6: memref<1x16x16x128xf32, #tpu.memory_space<vmem>>, %arg7: memref<1x1x128xf32, #tpu.memory_space<vmem>>, %arg8: memref<1x1x128xf32, #tpu.memory_space<vmem>>) attributes {dimension_semantics = [#tpu.dimension_semantics<parallel>], iteration_bounds = array<i64: 2>, scalar_prefetch = 0 : i64, scratch_operands = 0 : i64, tpu.core_type = #tpu.core_type<tc>, window_params = [{transform_indices = @transform_0, window_bounds = array<i64: 1, 16, 16, 128>}, {pipeline_mode = #tpu.pipeline_mode<synchronous>, transform_indices = @transform_1, window_bounds = array<i64: 1, 128>}, {pipeline_mode = #tpu.pipeline_mode<synchronous>, transform_indices = @transform_2, window_bounds = array<i64: 1, 128>}, {pipeline_mode = #tpu.pipeline_mode<synchronous>, transform_indices = @transform_3, window_bounds = array<i64: 3, 384, 128>}, {pipeline_mode = #tpu.pipeline_mode<synchronous>, transform_indices = @transform_4, window_bounds = array<i64: 1, 128>}, {transform_indices = @transform_5, window_bounds = array<i64: 1, 16, 16, 128>}, {transform_indices = @transform_6, window_bounds = array<i64: 1, 1, 128>}, {transform_indices = @transform_7, window_bounds = array<i64: 1, 1, 128>}]} {
    %c0 = arith.constant 0 : index
    %c0_0 = arith.constant 0 : index
    %c0_1 = arith.constant 0 : index
    %c0_2 = arith.constant 0 : index
    %0 = vector.load %arg1[%c0, %c0_0, %c0_1, %c0_2] : memref<1x16x16x128xf32, #tpu.memory_space<vmem>>, vector<1x16x16x128xf32>
    %1 = vector.shape_cast %0 : vector<1x16x16x128xf32> to vector<16x16x128xf32>
    %c0_3 = arith.constant 0 : index
    %c0_4 = arith.constant 0 : index
    %2 = vector.load %arg2[%c0_3, %c0_4] : memref<1x128xf32, #tpu.memory_space<vmem>>, vector<1x128xf32>
    %3 = vector.shape_cast %2 : vector<1x128xf32> to vector<128xf32>
    %4 = vector.shape_cast %3 : vector<128xf32> to vector<1x1x128xf32>
    %5 = vector.broadcast %4 : vector<1x1x128xf32> to vector<16x16x128xf32>
    %6 = arith.mulf %1, %5 : vector<16x16x128xf32>
    %c0_5 = arith.constant 0 : index
    %c0_6 = arith.constant 0 : index
    %7 = vector.load %arg3[%c0_5, %c0_6] : memref<1x128xf32, #tpu.memory_space<vmem>>, vector<1x128xf32>
    %8 = vector.shape_cast %7 : vector<1x128xf32> to vector<128xf32>
    %9 = vector.shape_cast %8 : vector<128xf32> to vector<1x1x128xf32>
    %10 = vector.broadcast %9 : vector<1x1x128xf32> to vector<16x16x128xf32>
    %11 = arith.addf %6, %10 : vector<16x16x128xf32>
    %cst = arith.constant 0.000000e+00 : f32
    %12 = vector.broadcast %cst : f32 to vector<16x16x128xf32>
    %13 = arith.maximumf %11, %12 : vector<16x16x128xf32>
    %14 = arith.truncf %13 : vector<16x16x128xf32> to vector<16x16x128xbf16>
    %cst_7 = arith.constant 0.000000e+00 : bf16
    %15 = vector.broadcast %cst_7 : bf16 to vector<16x1x128xbf16>
    %cst_8 = arith.constant 0.000000e+00 : bf16
    %16 = vector.broadcast %cst_8 : bf16 to vector<1x18x128xbf16>
    %17 = tpu.concatenate %15, %14, %15 in 1 : vector<16x1x128xbf16>, vector<16x16x128xbf16>, vector<16x1x128xbf16> -> vector<16x18x128xbf16>
    %18 = tpu.concatenate %16, %17, %16 in 0 : vector<1x18x128xbf16>, vector<16x18x128xbf16>, vector<1x18x128xbf16> -> vector<18x18x128xbf16>
    %19 = vector.extract_strided_slice %18 {offsets = [0, 0, 0], sizes = [18, 16, 128], strides = [1, 1, 1]} : vector<18x18x128xbf16> to vector<18x16x128xbf16>
    %20 = vector.extract_strided_slice %18 {offsets = [0, 1, 0], sizes = [18, 16, 128], strides = [1, 1, 1]} : vector<18x18x128xbf16> to vector<18x16x128xbf16>
    %21 = vector.extract_strided_slice %18 {offsets = [0, 2, 0], sizes = [18, 16, 128], strides = [1, 1, 1]} : vector<18x18x128xbf16> to vector<18x16x128xbf16>
    %22 = tpu.concatenate %19, %20, %21 in 2 : vector<18x16x128xbf16>, vector<18x16x128xbf16>, vector<18x16x128xbf16> -> vector<18x16x384xbf16>
    %cst_9 = arith.constant 0.000000e+00 : f32
    %23 = vector.broadcast %cst_9 : f32 to vector<256x128xf32>
    %24 = vector.extract_strided_slice %22 {offsets = [0, 0, 0], sizes = [16, 16, 384], strides = [1, 1, 1]} : vector<18x16x384xbf16> to vector<16x16x384xbf16>
    %25 = vector.shape_cast %24 : vector<16x16x384xbf16> to vector<256x384xbf16>
    %c0_10 = arith.constant 0 : index
    %c0_11 = arith.constant 0 : index
    %c0_12 = arith.constant 0 : index
    %26 = vector.load %arg4[%c0_10, %c0_11, %c0_12] : memref<3x384x128xbf16, #tpu.memory_space<vmem>>, vector<1x384x128xbf16>
    %27 = vector.shape_cast %26 : vector<1x384x128xbf16> to vector<384x128xbf16>
    %cst_13 = arith.constant dense<0.000000e+00> : vector<256x128xf32>
    %28 = tpu.matmul %25, %27, %cst_13 {dimension_numbers = #tpu.dot_dimension_numbers<[1], [0], [0], [1], [0, 0, 1, 1], [], []>} : vector<256x384xbf16>, vector<384x128xbf16>, vector<256x128xf32> -> vector<256x128xf32>
    %29 = arith.addf %23, %28 : vector<256x128xf32>
    %30 = vector.extract_strided_slice %22 {offsets = [1, 0, 0], sizes = [16, 16, 384], strides = [1, 1, 1]} : vector<18x16x384xbf16> to vector<16x16x384xbf16>
    %31 = vector.shape_cast %30 : vector<16x16x384xbf16> to vector<256x384xbf16>
    %c1 = arith.constant 1 : index
    %c0_14 = arith.constant 0 : index
    %c0_15 = arith.constant 0 : index
    %32 = vector.load %arg4[%c1, %c0_14, %c0_15] : memref<3x384x128xbf16, #tpu.memory_space<vmem>>, vector<1x384x128xbf16>
    %33 = vector.shape_cast %32 : vector<1x384x128xbf16> to vector<384x128xbf16>
    %cst_16 = arith.constant dense<0.000000e+00> : vector<256x128xf32>
    %34 = tpu.matmul %31, %33, %cst_16 {dimension_numbers = #tpu.dot_dimension_numbers<[1], [0], [0], [1], [0, 0, 1, 1], [], []>} : vector<256x384xbf16>, vector<384x128xbf16>, vector<256x128xf32> -> vector<256x128xf32>
    %35 = arith.addf %29, %34 : vector<256x128xf32>
    %36 = vector.extract_strided_slice %22 {offsets = [2, 0, 0], sizes = [16, 16, 384], strides = [1, 1, 1]} : vector<18x16x384xbf16> to vector<16x16x384xbf16>
    %37 = vector.shape_cast %36 : vector<16x16x384xbf16> to vector<256x384xbf16>
    %c2 = arith.constant 2 : index
    %c0_17 = arith.constant 0 : index
    %c0_18 = arith.constant 0 : index
    %38 = vector.load %arg4[%c2, %c0_17, %c0_18] : memref<3x384x128xbf16, #tpu.memory_space<vmem>>, vector<1x384x128xbf16>
    %39 = vector.shape_cast %38 : vector<1x384x128xbf16> to vector<384x128xbf16>
    %cst_19 = arith.constant dense<0.000000e+00> : vector<256x128xf32>
    %40 = tpu.matmul %37, %39, %cst_19 {dimension_numbers = #tpu.dot_dimension_numbers<[1], [0], [0], [1], [0, 0, 1, 1], [], []>} : vector<256x384xbf16>, vector<384x128xbf16>, vector<256x128xf32> -> vector<256x128xf32>
    %41 = arith.addf %35, %40 : vector<256x128xf32>
    %c0_20 = arith.constant 0 : index
    %c0_21 = arith.constant 0 : index
    %42 = vector.load %arg5[%c0_20, %c0_21] : memref<1x128xf32, #tpu.memory_space<vmem>>, vector<1x128xf32>
    %43 = vector.shape_cast %42 : vector<1x128xf32> to vector<128xf32>
    %44 = vector.shape_cast %43 : vector<128xf32> to vector<1x128xf32>
    %45 = vector.broadcast %44 : vector<1x128xf32> to vector<256x128xf32>
    %46 = arith.addf %41, %45 : vector<256x128xf32>
    %47 = vector.shape_cast %46 : vector<256x128xf32> to vector<16x16x128xf32>
    %c0_22 = arith.constant 0 : index
    %c0_23 = arith.constant 0 : index
    %c0_24 = arith.constant 0 : index
    %c0_25 = arith.constant 0 : index
    %48 = vector.load %arg6[%c0_22, %c0_23, %c0_24, %c0_25] : memref<1x16x16x128xf32, #tpu.memory_space<vmem>>, vector<1x16x16x128xf32>
    %49 = vector.shape_cast %48 : vector<1x16x16x128xf32> to vector<16x16x128xf32>
    %50 = vector.shape_cast %47 : vector<16x16x128xf32> to vector<1x16x16x128xf32>
    tpu.vector_store %arg6[%c0_22, %c0_23, %c0_24, %c0_25], %50 {strides = array<i32>} : memref<1x16x16x128xf32, #tpu.memory_space<vmem>>, vector<1x16x16x128xf32>,
    %cst_26 = arith.constant dense<0.000000e+00> : vector<128xf32>
    %51 = vector.multi_reduction <add>, %46, %cst_26 [0] : vector<256x128xf32> to vector<128xf32>
    %c0_27 = arith.constant 0 : index
    %c0_28 = arith.constant 0 : index
    %c0_29 = arith.constant 0 : index
    %52 = vector.load %arg7[%c0_27, %c0_28, %c0_29] : memref<1x1x128xf32, #tpu.memory_space<vmem>>, vector<1x1x128xf32>
    %53 = vector.shape_cast %52 : vector<1x1x128xf32> to vector<128xf32>
    %54 = vector.shape_cast %51 : vector<128xf32> to vector<1x1x128xf32>
    tpu.vector_store %arg7[%c0_27, %c0_28, %c0_29], %54 {strides = array<i32>} : memref<1x1x128xf32, #tpu.memory_space<vmem>>, vector<1x1x128xf32>,
    %55 = arith.mulf %46, %46 : vector<256x128xf32>
    %cst_30 = arith.constant dense<0.000000e+00> : vector<128xf32>
    %56 = vector.multi_reduction <add>, %55, %cst_30 [0] : vector<256x128xf32> to vector<128xf32>
    %c0_31 = arith.constant 0 : index
    %c0_32 = arith.constant 0 : index
    %c0_33 = arith.constant 0 : index
    %57 = vector.load %arg8[%c0_31, %c0_32, %c0_33] : memref<1x1x128xf32, #tpu.memory_space<vmem>>, vector<1x1x128xf32>
    %58 = vector.shape_cast %57 : vector<1x1x128xf32> to vector<128xf32>
    %59 = vector.shape_cast %56 : vector<128xf32> to vector<1x1x128xf32>
    tpu.vector_store %arg8[%c0_31, %c0_32, %c0_33], %59 {strides = array<i32>} : memref<1x1x128xf32, #tpu.memory_space<vmem>>, vector<1x1x128xf32>,
    return
  }
  func.func @transform_0(%arg0: i32) -> (i32, i32, i32, i32) {
    %c0_i32 = arith.constant 0 : i32
    %c0_i32_0 = arith.constant 0 : i32
    %c0_i32_1 = arith.constant 0 : i32
    %c0_i32_2 = arith.constant 0 : i32
    return %arg0, %c0_i32, %c0_i32_0, %c0_i32_1 : i32, i32, i32, i32
  }
  func.func @transform_1(%arg0: i32) -> (i32, i32) {
    %c0_i32 = arith.constant 0 : i32
    %c0_i32_0 = arith.constant 0 : i32
    %c0_i32_1 = arith.constant 0 : i32
    return %c0_i32, %c0_i32_0 : i32, i32
  }
  func.func @transform_2(%arg0: i32) -> (i32, i32) {
    %c0_i32 = arith.constant 0 : i32
    %c0_i32_0 = arith.constant 0 : i32
    %c0_i32_1 = arith.constant 0 : i32
    return %c0_i32, %c0_i32_0 : i32, i32
  }
  func.func @transform_3(%arg0: i32) -> (i32, i32, i32) {
    %c0_i32 = arith.constant 0 : i32
    %c0_i32_0 = arith.constant 0 : i32
    %c0_i32_1 = arith.constant 0 : i32
    %c0_i32_2 = arith.constant 0 : i32
    return %c0_i32, %c0_i32_0, %c0_i32_1 : i32, i32, i32
  }
  func.func @transform_4(%arg0: i32) -> (i32, i32) {
    %c0_i32 = arith.constant 0 : i32
    %c0_i32_0 = arith.constant 0 : i32
    %c0_i32_1 = arith.constant 0 : i32
    return %c0_i32, %c0_i32_0 : i32, i32
  }
  func.func @transform_5(%arg0: i32) -> (i32, i32, i32, i32) {
    %c0_i32 = arith.constant 0 : i32
    %c0_i32_0 = arith.constant 0 : i32
    %c0_i32_1 = arith.constant 0 : i32
    %c0_i32_2 = arith.constant 0 : i32
    return %arg0, %c0_i32, %c0_i32_0, %c0_i32_1 : i32, i32, i32, i32
  }
  func.func @transform_6(%arg0: i32) -> (i32, i32, i32) {
    %c0_i32 = arith.constant 0 : i32
    %c0_i32_0 = arith.constant 0 : i32
    %c0_i32_1 = arith.constant 0 : i32
    return %arg0, %c0_i32, %c0_i32_0 : i32, i32, i32
  }
  func.func @transform_7(%arg0: i32) -> (i32, i32, i32) {
    %c0_i32 = arith.constant 0 : i32
    %c0_i32_0 = arith.constant 0 : i32
    %c0_i32_1 = arith.constant 0 : i32
    return %arg0, %c0_i32, %c0_i32_0 : i32, i32, i32
  }
}

module attributes {stable_mosaic.version = 11 : i64} {
  func.func @_bn_relu_kernel(%arg0: i32, %arg1: i32, %arg2: memref<1x8x16x128xf32, #tpu.memory_space<vmem>>, %arg3: memref<1x128xf32, #tpu.memory_space<vmem>>, %arg4: memref<1x128xf32, #tpu.memory_space<vmem>>, %arg5: memref<1x8x16x128xf32, #tpu.memory_space<vmem>>) attributes {dimension_semantics = [#tpu.dimension_semantics<parallel>, #tpu.dimension_semantics<parallel>], iteration_bounds = array<i64: 2, 2>, scalar_prefetch = 0 : i64, scratch_operands = 0 : i64, tpu.core_type = #tpu.core_type<tc>, window_params = [{transform_indices = @transform_0, window_bounds = array<i64: 1, 8, 16, 128>}, {pipeline_mode = #tpu.pipeline_mode<synchronous>, transform_indices = @transform_1, window_bounds = array<i64: 1, 128>}, {pipeline_mode = #tpu.pipeline_mode<synchronous>, transform_indices = @transform_2, window_bounds = array<i64: 1, 128>}, {transform_indices = @transform_3, window_bounds = array<i64: 1, 8, 16, 128>}]} {
    %c0 = arith.constant 0 : index
    %c0_0 = arith.constant 0 : index
    %c0_1 = arith.constant 0 : index
    %c0_2 = arith.constant 0 : index
    %0 = vector.load %arg2[%c0, %c0_0, %c0_1, %c0_2] : memref<1x8x16x128xf32, #tpu.memory_space<vmem>>, vector<1x8x16x128xf32>
    %c0_3 = arith.constant 0 : index
    %c0_4 = arith.constant 0 : index
    %1 = vector.load %arg3[%c0_3, %c0_4] : memref<1x128xf32, #tpu.memory_space<vmem>>, vector<1x128xf32>
    %2 = vector.shape_cast %1 : vector<1x128xf32> to vector<128xf32>
    %3 = vector.shape_cast %2 : vector<128xf32> to vector<1x1x1x128xf32>
    %4 = vector.broadcast %3 : vector<1x1x1x128xf32> to vector<1x8x16x128xf32>
    %5 = arith.mulf %0, %4 : vector<1x8x16x128xf32>
    %c0_5 = arith.constant 0 : index
    %c0_6 = arith.constant 0 : index
    %6 = vector.load %arg4[%c0_5, %c0_6] : memref<1x128xf32, #tpu.memory_space<vmem>>, vector<1x128xf32>
    %7 = vector.shape_cast %6 : vector<1x128xf32> to vector<128xf32>
    %8 = vector.shape_cast %7 : vector<128xf32> to vector<1x1x1x128xf32>
    %9 = vector.broadcast %8 : vector<1x1x1x128xf32> to vector<1x8x16x128xf32>
    %10 = arith.addf %5, %9 : vector<1x8x16x128xf32>
    %cst = arith.constant 0.000000e+00 : f32
    %11 = vector.broadcast %cst : f32 to vector<1x8x16x128xf32>
    %12 = arith.maximumf %10, %11 : vector<1x8x16x128xf32>
    %c0_7 = arith.constant 0 : index
    %c0_8 = arith.constant 0 : index
    %c0_9 = arith.constant 0 : index
    %c0_10 = arith.constant 0 : index
    %13 = vector.load %arg5[%c0_7, %c0_8, %c0_9, %c0_10] : memref<1x8x16x128xf32, #tpu.memory_space<vmem>>, vector<1x8x16x128xf32>
    tpu.vector_store %arg5[%c0_7, %c0_8, %c0_9, %c0_10], %12 {strides = array<i32>} : memref<1x8x16x128xf32, #tpu.memory_space<vmem>>, vector<1x8x16x128xf32>,
    return
  }
  func.func @transform_0(%arg0: i32, %arg1: i32) -> (i32, i32, i32, i32) {
    %c0_i32 = arith.constant 0 : i32
    %c0_i32_0 = arith.constant 0 : i32
    %c0_i32_1 = arith.constant 0 : i32
    return %arg0, %arg1, %c0_i32, %c0_i32_0 : i32, i32, i32, i32
  }
  func.func @transform_1(%arg0: i32, %arg1: i32) -> (i32, i32) {
    %c0_i32 = arith.constant 0 : i32
    %c0_i32_0 = arith.constant 0 : i32
    %c0_i32_1 = arith.constant 0 : i32
    return %c0_i32, %c0_i32_0 : i32, i32
  }
  func.func @transform_2(%arg0: i32, %arg1: i32) -> (i32, i32) {
    %c0_i32 = arith.constant 0 : i32
    %c0_i32_0 = arith.constant 0 : i32
    %c0_i32_1 = arith.constant 0 : i32
    return %c0_i32, %c0_i32_0 : i32, i32
  }
  func.func @transform_3(%arg0: i32, %arg1: i32) -> (i32, i32, i32, i32) {
    %c0_i32 = arith.constant 0 : i32
    %c0_i32_0 = arith.constant 0 : i32
    %c0_i32_1 = arith.constant 0 : i32
    return %arg0, %arg1, %c0_i32, %c0_i32_0 : i32, i32, i32, i32
  }
}

</mosaic_0001>

<bundles_post_ra>
// kernel: vgg_block_forward.5
= control target key start
LH: loop header
LB: loop body
LE: loop exit
PB: predicated region body
PF: predicated region fallthrough
CT: control target
= control target key end

     0   :  { %s519_s12 = smov 0   ;;  %s521_s13 = smov 0   ;;  %s630_s0 = inlined_call_operand.vmem [shape: f32[2,16,16,128], index: 0, kind: input, shape index: {}]   ;;  %s631_s1 = inlined_call_operand.vmem [shape: f32[1,128], index: 1, kind: input, shape index: {}]   ;;  %s632_s2 = inlined_call_operand.vmem [shape: f32[1,128], index: 2, kind: input, shape index: {}]   ;;  %s633_s3 = inlined_call_operand.vmem [shape: f32[2,16,16,128], index: 3, kind: output, shape index: {}]  }
   0x1   :  { %s523_s14 = smov 0   ;;  %s525_s15 = smov 0  }
   0x2   :  { %s527_s16 = smov 0  }
   0x3 LB: > { %s22_s17 = sadd.s32 1, %s489_s14  ;;  %s25_s18 = sadd.s32 1, %s493_s15  ;;  %s497_s16 = sphi %s527_s16, %s13_s16   ;;  %s493_s15 = sphi %s525_s15, %s637_s15   ;;  %s489_s14 = sphi %s523_s14, %s636_s14   ;;  %s485_s13 = sphi %s521_s13, %s635_s13   ;;  %s481_s12 = sphi %s519_s12, %s634_s12  }
   0x4   : > { %p23_p0 = scmp.ge.s32.totalorder %s22_s17, 2  ;;  %p406_p1 = scmp.ge.s32.totalorder %s497_s16, 1 }
   0x5   : > { %p159_p2 = scmp.lt.s32.totalorder %s497_s16, 5 }
   0x6   : > { %s639_s17 = smov (%p23_p0, %s22_s17), 0  ;;  %s641_s18 = smov (!%p23_p0, %s25_s18), %s493_s15 }
   0x7   : > { %p160_p3 = pnand %p406_p1, %p159_p2  ;;  %p27_p4 = scmp.ge.s32.totalorder %s641_s18, 2 }
   0x8   : > { %s407_s19 = sshll.u32 (!%p160_p3), %s481_s12, 3  ;;  %p194_p5 = scmp.lt.s32.totalorder (!%p160_p3), %s485_s13, 1 }
   0x9   : > { %s643_s18 = smov (%p27_p4, %s641_s18), 0  ;;  %163 = sbr.rel (%p160_p3) target bundleno = 42 (0x2a), region = 32 }
   0xa   : > { %p196_p6 = scmp.lt.s32.totalorder (!%p160_p3), %s407_s19, 15 }
   0xe   : > { %s645_s13 = smov (!%p194_p5, %s485_s13), 1  ;;  %s647_s19 = smov (!%p196_p6, %s407_s19), 15  ;;  %v457_v0 = vld [vmem:[%s631_s1] ss:$0 sm:$0xff] }
   0xf   : > { %s409_s20 = sshll.u32 %s645_s13, 5  ;;  %s408_s21 = sshll.u32 %s647_s19, 1  ;;  %v560_v1 = vld [vmem:[%s632_s2] ss:$0 sm:$0xff] }
  0x10   : > { %s200_s22 = sadd.s32 %s409_s20, %s408_s21 }
  0x11   : > { %s410_s25 = sshll.u32 %s200_s22, 3 }
  0x12   : > { %s555_s28 = scalar_lea.vmem %s630_s0, %s410_s25  ;;  %s576_s6 = scalar_lea.vmem %s633_s3, %s410_s25 }
  0x13   : > { %v215_v2 = vld [vmem:[%s555_s28] sm:$0xff]  ;;  %v216_v3 = vld [vmem:[%s555_s28 + $0x8] sm:$0xff]  ;;  %v217_v4 = vld [vmem:[%s555_s28 + $0x10] sm:$0xff] }
  0x14   : > { %v235_v5 = vmul.f32 %v457_v0, %v215_v2  ;;  %v236_v6 = vmul.f32 %v457_v0, %v216_v3  ;;  %v237_v7 = vmul.f32 %v457_v0, %v217_v4  ;;  %v218_v8 = vld [vmem:[%s555_s28 + $0x18] sm:$0xff]  ;;  %v219_v9 = vld [vmem:[%s555_s28 + $0x20] sm:$0xff]  ;;  %v220_v10 = vld [vmem:[%s555_s28 + $0x28] sm:$0xff] }
  0x15   : > { %v238_v11 = vmul.f32 %v457_v0, %v218_v8  ;;  %v239_v12 = vmul.f32 %v457_v0, %v219_v9  ;;  %v240_v13 = vmul.f32 %v457_v0, %v220_v10  ;;  %v221_v14 = vld [vmem:[%s555_s28 + $0x30] sm:$0xff]  ;;  %v222_v15 = vld [vmem:[%s555_s28 + $0x38] sm:$0xff]  ;;  %v223_v24 = vld [vmem:[%s555_s28 + $0x40] sm:$0xff] }
  0x16   : > { %v255_v16 = vadd.f32 %v560_v1, %v235_v5  ;;  %v256_v17 = vadd.f32 %v560_v1, %v236_v6  ;;  %v257_v18 = vadd.f32 %v560_v1, %v237_v7  ;;  %v241_v19 = vmul.f32 %v457_v0, %v221_v14  ;;  %v224_v25 = vld [vmem:[%s555_s28 + $0x48] sm:$0xff]  ;;  %v225_v26 = vld [vmem:[%s555_s28 + $0x50] sm:$0xff]  ;;  %v226_v31 = vld [vmem:[%s555_s28 + $0x58] sm:$0xff] }
  0x17   : > { %v258_v20 = vadd.f32 %v560_v1, %v238_v11  ;;  %v259_v21 = vadd.f32 %v560_v1, %v239_v12  ;;  %v260_v22 = vadd.f32 %v560_v1, %v240_v13  ;;  %v242_v23 = vmul.f32 %v457_v0, %v222_v15  ;;  %v227_v32 = vld [vmem:[%s555_s28 + $0x60] sm:$0xff]  ;;  %v228_v33 = vld [vmem:[%s555_s28 + $0x68] sm:$0xff]  ;;  %v229_v37 = vld [vmem:[%s555_s28 + $0x70] sm:$0xff] }
  0x18   : > { %v271_v27 = vmax.f32 %v255_v16, 0.0  ;;  %v272_v28 = vmax.f32 %v256_v17, 0.0  ;;  %v273_v29 = vmax.f32 %v257_v18, 0.0  ;;  %v261_v30 = vadd.f32 %v560_v1, %v241_v19  ;;  %v230_v42 = vld [vmem:[%s555_s28 + $0x78] sm:$0xff] }
  0x19   : > { %v274_v34 = vmax.f32 %v258_v20, 0.0  ;;  %v275_v35 = vmax.f32 %v259_v21, 0.0  ;;  %v262_v36 = vadd.f32 %v560_v1, %v242_v23  ;;  %v276_v38 = vmax.f32 %v260_v22, 0.0 }
  0x1a   : > { %287 = vst [vmem:[%s576_s6] sm:$0xff] %v271_v27  ;;  %v243_v39 = vmul.f32 %v457_v0, %v223_v24  ;;  %v244_v40 = vmul.f32 %v457_v0, %v224_v25  ;;  %v245_v41 = vmul.f32 %v457_v0, %v225_v26  ;;  %v277_v43 = vmax.f32 %v261_v30, 0.0 }
  0x1b   : > { %288 = vst [vmem:[%s576_s6 + $0x8] sm:$0xff] %v272_v28  ;;  %v246_v44 = vmul.f32 %v457_v0, %v226_v31  ;;  %v247_v45 = vmul.f32 %v457_v0, %v227_v32  ;;  %v248_v46 = vmul.f32 %v457_v0, %v228_v33  ;;  %v249_v50 = vmul.f32 %v457_v0, %v229_v37 }
  0x1c   : > { %289 = vst [vmem:[%s576_s6 + $0x10] sm:$0xff] %v273_v29  ;;  %v263_v47 = vadd.f32 %v560_v1, %v243_v39  ;;  %v264_v48 = vadd.f32 %v560_v1, %v244_v40  ;;  %v265_v49 = vadd.f32 %v560_v1, %v245_v41  ;;  %v278_v51 = vmax.f32 %v262_v36, 0.0 }
  0x1d   : > { %290 = vst [vmem:[%s576_s6 + $0x18] sm:$0xff] %v274_v34  ;;  %v266_v52 = vadd.f32 %v560_v1, %v246_v44  ;;  %v250_v53 = vmul.f32 %v457_v0, %v230_v42  ;;  %v267_v55 = vadd.f32 %v560_v1, %v247_v45  ;;  %v268_v57 = vadd.f32 %v560_v1, %v248_v46 }
  0x1e   : > { %291 = vst [vmem:[%s576_s6 + $0x20] sm:$0xff] %v275_v35  ;;  %v279_v54 = vmax.f32 %v263_v47, 0.0  ;;  %v280_v56 = vmax.f32 %v264_v48, 0.0  ;;  %v281_v58 = vmax.f32 %v265_v49, 0.0  ;;  %v269_v59 = vadd.f32 %v560_v1, %v249_v50 }
  0x1f   : > { %292 = vst [vmem:[%s576_s6 + $0x28] sm:$0xff] %v276_v38  ;;  %v282_v60 = vmax.f32 %v266_v52, 0.0  ;;  %v270_v61 = vadd.f32 %v560_v1, %v250_v53  ;;  %v283_v62 = vmax.f32 %v267_v55, 0.0  ;;  %v284_v63 = vmax.f32 %v268_v57, 0.0 }
  0x20   : > { %293 = vst [vmem:[%s576_s6 + $0x30] sm:$0xff] %v277_v43  ;;  %v285_v0 = vmax.f32 %v269_v59, 0.0 }
  0x21   : > { %294 = vst [vmem:[%s576_s6 + $0x38] sm:$0xff] %v278_v51  ;;  %v286_v2 = vmax.f32 %v270_v61, 0.0 }
  0x22   : > { %295 = vst [vmem:[%s576_s6 + $0x40] sm:$0xff] %v279_v54 }
  0x23   : > { %296 = vst [vmem:[%s576_s6 + $0x48] sm:$0xff] %v280_v56 }
  0x24   : > { %297 = vst [vmem:[%s576_s6 + $0x50] sm:$0xff] %v281_v58 }
  0x25   : > { %298 = vst [vmem:[%s576_s6 + $0x58] sm:$0xff] %v282_v60 }
  0x26   : > { %299 = vst [vmem:[%s576_s6 + $0x60] sm:$0xff] %v283_v62 }
  0x27   : > { %300 = vst [vmem:[%s576_s6 + $0x68] sm:$0xff] %v284_v63 }
  0x28   : > { %301 = vst [vmem:[%s576_s6 + $0x70] sm:$0xff] %v285_v0 }
  0x29   : > { %302 = vst [vmem:[%s576_s6 + $0x78] sm:$0xff] %v286_v2 }
  0x2a PF: > { %s13_s16 = sadd.s32 1, %s497_s16   ;;  %s634_s12 = smov %s489_s14 }
  0x2b   : > { %p10_p7 = scmp.ge.s32.totalorder %s13_s16, 6   ;;  %s635_s13 = smov %s493_s15 }
  0x2c   : > { %s636_s14 = smov %s639_s17  ;;  %s637_s15 = smov %s643_s18 }
  0x2d   :  { %12 = sbr.rel (!%p10_p7) target bundleno = 3 (0x3), region = 62 }

// kernel: vgg_block_forward.3
= control target key start
LH: loop header
LB: loop body
LE: loop exit
PB: predicated region body
PF: predicated region fallthrough
CT: control target
= control target key end

     0   :  { %s3119_s18 = smov 0   ;;  %s4148_s0 = inlined_call_operand.vmem [shape: f32[2,16,16,128], index: 0, kind: input, shape index: {}]   ;;  %s4149_s1 = inlined_call_operand.vmem [shape: bf16[3,384,128], index: 1, kind: input, shape index: {}]   ;;  %s4150_s2 = inlined_call_operand.vmem [shape: f32[1,128], index: 2, kind: input, shape index: {}]   ;;  %s4151_s3 = inlined_call_operand.vmem [shape: f32[2,16,16,128], index: 3, kind: output, shape index: {0}]   ;;  %s4152_s4 = inlined_call_operand.vmem [shape: f32[2,1,128], index: 4, kind: output, shape index: {1}]   ;;  %s4153_s5 = inlined_call_operand.vmem [shape: f32[2,1,128], index: 5, kind: output, shape index: {2}]  }
   0x1 LB: > { %s2577_s19 = sadd.s32 4294967295, %s3086_s18   ;;  %p2581_p0 = scmp.ge.s32.totalorder %s3086_s18, 1  ;;  %s3086_s18 = sphi %s3119_s18, %s16_s18  }
   0x2   : > { %p192_p1 = scmp.lt.s32.totalorder %s3086_s18, 3 }
   0x4   : > { %p193_p2 = pnand %p2581_p0, %p192_p1 }
   0x6   : > { %196 = sbr.rel (%p193_p2) target bundleno = 769 (0x301), region = 32 }
   0xb   : > { %v3005_v0 = vld [vmem:[%s4149_s1 + $0xf8] sm:$0xff]  ;;  %p226_p3 = scmp.lt.s32.totalorder %s2577_s19, 1  ;;  %v3004_v1 = vld [vmem:[%s4149_s1 + $0xf0] sm:$0xff]  ;;  %v3003_v2 = vld [vmem:[%s4149_s1 + $0xe8] sm:$0xff]  ;;  %vm531_vm0 = vcmask 1040384   ;;  %vm817_vm4 = vcmask 1046528  }
   0xc   : > { %1126 = vmatpush.bf16.msra.mxu0 %v3005_v0  ;;  %3046 = vmatpush.bf16.msra.mxu1 %v3005_v0  ;;  %v3002_v21 = vld [vmem:[%s4149_s1 + $0xe0] sm:$0xff]  ;;  %v3001_v29 = vld [vmem:[%s4149_s1 + $0xd8] sm:$0xff]  ;;  %v3000_v37 = vld [vmem:[%s4149_s1 + $0xd0] sm:$0xff]  ;;  %vm532_vm1 = vsmask.f32 256 }
   0xd   : > { %s4261_s19 = smov (!%p226_p3, %s2577_s19), 1  ;;  %3047 = vmatpush.bf16.msra.mxu2 %v3005_v0  ;;  %3048 = vmatpush.bf16.msra.mxu3 %v3005_v0  ;;  %v2999_v54 = vld [vmem:[%s4149_s1 + $0xc8] sm:$0xff]  ;;  %vm3188_vm2 = vmand %vm531_vm0, %vm532_vm1  ;;  %vm566_vm3 = vsmask.f32 7424 }
   0xe   : > { %s2972_s24 = sshll.u32 %s4261_s19, 8  ;;  %s238_s21 = scalar_lea.vmem %s4152_s4, %s4261_s19 }
   0xf   : > { %s3144_s29 = scalar_lea.vmem %s4148_s0, %s2972_s24  ;;  %s4012_s17 = scalar_lea.vmem %s4151_s3, %s2972_s24 }
  0x10   : > { %1127 = vmatpush.bf16.msra.mxu0 %v3004_v1  ;;  %3049 = vmatpush.bf16.msra.mxu1 %v3004_v1  ;;  %v243_v3 = vld [vmem:[%s3144_s29] sm:$0xff]  ;;  %v244_v4 = vld [vmem:[%s3144_s29 + $0x8] sm:$0xff]  ;;  %v245_v34 = vld [vmem:[%s3144_s29 + $0x10] sm:$0xff]  ;;  %s241_s25 = scalar_lea.vmem %s4153_s5, %s4261_s19 }
  0x11   : > { %v251_v5 = vld [vmem:[%s3144_s29 + $0x40] sm:$0xff]  ;;  %3050 = vmatpush.bf16.msra.mxu2 %v3004_v1  ;;  %3051 = vmatpush.bf16.msra.mxu3 %v3004_v1  ;;  %v275_v6 = vpack.c.bf16 %v243_v3, %v243_v3  ;;  %v276_v7 = vpack.c.bf16 %v244_v4, %v244_v4  ;;  %v252_v8 = vld [vmem:[%s3144_s29 + $0x48] sm:$0xff]  ;;  %v246_v35 = vld [vmem:[%s3144_s29 + $0x18] sm:$0xff]  ;;  %v277_v45 = vpack.c.bf16 %v245_v34, %v245_v34 }
  0x12   : > { %v283_v9 = vpack.c.bf16 %v251_v5, %v251_v5  ;;  %v259_v10 = vld [vmem:[%s3144_s29 + $0x80] sm:$0xff]  ;;  %v260_v11 = vld [vmem:[%s3144_s29 + $0x88] sm:$0xff]  ;;  %v284_v12 = vpack.c.bf16 %v252_v8, %v252_v8  ;;  %v253_v36 = vld [vmem:[%s3144_s29 + $0x50] sm:$0xff]  ;;  %v278_v46 = vpack.c.bf16 %v246_v35, %v246_v35 }
  0x13   : > { %v291_v13 = vpack.c.bf16 %v259_v10, %v259_v10  ;;  %v292_v14 = vpack.c.bf16 %v260_v11, %v260_v11  ;;  %v267_v15 = vld [vmem:[%s3144_s29 + $0xc0] sm:$0xff]  ;;  %v268_v16 = vld [vmem:[%s3144_s29 + $0xc8] sm:$0xff]  ;;  %v339_v17 = vunpack.c.l.b16 %v275_v6  ;;  %v340_v18 = vunpack.c.l.b16 %v276_v7  ;;  %v254_v40 = vld [vmem:[%s3144_s29 + $0x58] sm:$0xff] }
  0x14   : > { %v347_v19 = vunpack.c.l.b16 %v283_v9  ;;  %v299_v20 = vpack.c.bf16 %v267_v15, %v267_v15  ;;  %1128 = vmatpush.bf16.msra.mxu0 %v3003_v2  ;;  %3052 = vmatpush.bf16.msra.mxu1 %v3003_v2  ;;  %v348_v22 = vunpack.c.l.b16 %v284_v12  ;;  %v300_v25 = vpack.c.bf16 %v268_v16, %v268_v16  ;;  %v261_v42 = vld [vmem:[%s3144_s29 + $0x90] sm:$0xff]  ;;  %v262_v43 = vld [vmem:[%s3144_s29 + $0x98] sm:$0xff]  ;;  %v2998_v3 = vld [vmem:[%s4149_s1 + $0xc0] sm:$0xff] }
  0x15   : > { %v355_v23 = vunpack.c.l.b16 %v291_v13  ;;  %v356_v24 = vunpack.c.l.b16 %v292_v14  ;;  %3053 = vmatpush.bf16.msra.mxu2 %v3003_v2  ;;  %3054 = vmatpush.bf16.msra.mxu3 %v3003_v2  ;;  %v371_v28 = vpack.c.b16 %v340_v18, %v339_v17  ;;  %v285_v47 = vpack.c.bf16 %v253_v36, %v253_v36  ;;  %v269_v48 = vld [vmem:[%s3144_s29 + $0xd0] sm:$0xff]  ;;  %v270_v49 = vld [vmem:[%s3144_s29 + $0xd8] sm:$0xff]  ;;  %v263_v34 = vld [vmem:[%s3144_s29 + $0xa0] sm:$0xff] }
  0x16   : > { %v363_v26 = vunpack.c.l.b16 %v299_v20  ;;  %v364_v27 = vunpack.c.l.b16 %v300_v25  ;;  %v375_v30 = vpack.c.b16 %v348_v22, %v347_v19  ;;  %v286_v53 = vpack.c.bf16 %v254_v40, %v254_v40  ;;  %v3021_v13 = vld [vmem:[%s4149_s1 + $0x178] sm:$0xff]  ;;  %v3020_v25 = vld [vmem:[%s4149_s1 + $0x170] sm:$0xff]  ;;  %v264_v35 = vld [vmem:[%s3144_s29 + $0xa8] sm:$0xff] }
  0x17   : > { %v379_v31 = vpack.c.b16 %v356_v24, %v355_v23  ;;  %v388_v33 = vshrl.u32 %v371_v28, 16  ;;  %v391_v44 = vshll.u32 %v371_v28, 16  ;;  %v293_v57 = vpack.c.bf16 %v261_v42, %v261_v42  ;;  %v2981_v14 = vld [vmem:[%s4149_s1 + $0x38] sm:$0xff] }
  0x18   : > { %1129 = vmatpush.bf16.msra.mxu0 %v3002_v21  ;;  %3055 = vmatpush.bf16.msra.mxu1 %v3002_v21  ;;  %v383_v32 = vpack.c.b16 %v364_v27, %v363_v26  ;;  %v416_v38 = vshrl.u32 %v375_v30, 16  ;;  %v419_v51 = vshll.u32 %v375_v30, 16  ;;  %v294_v58 = vpack.c.bf16 %v262_v43, %v262_v43  ;;  %v3013_v22 = vld [vmem:[%s4149_s1 + $0x138] sm:$0xff]  ;;  %v2980_v26 = vld [vmem:[%s4149_s1 + $0x30] sm:$0xff]  ;;  %v247_v27 = vld [vmem:[%s3144_s29 + $0x20] sm:$0xff] }
  0x19   : > { %3056 = vmatpush.bf16.msra.mxu2 %v3002_v21  ;;  %3057 = vmatpush.bf16.msra.mxu3 %v3002_v21  ;;  %v444_v39 = vshrl.u32 %v379_v31, 16  ;;  %v3171_v50 = vrot.slane %v388_v33, 7  ;;  %v447_v52 = vshll.u32 %v379_v31, 16  ;;  %v301_v61 = vpack.c.bf16 %v269_v48, %v269_v48  ;;  %v2989_v23 = vld [vmem:[%s4149_s1 + $0x78] sm:$0xff]  ;;  %v255_v30 = vld [vmem:[%s3144_s29 + $0x60] sm:$0xff]  ;;  %v256_v31 = vld [vmem:[%s3144_s29 + $0x68] sm:$0xff] }
  0x1a   : > { %v472_v41 = vshrl.u32 %v383_v32, 16  ;;  %v3176_v55 = vrot.slane %v416_v38, 7  ;;  %v475_v60 = vshll.u32 %v383_v32, 16  ;;  %v302_v62 = vpack.c.bf16 %v270_v49, %v270_v49  ;;  %v3019_v38 = vld [vmem:[%s4149_s1 + $0x168] sm:$0xff] }
  0x1b   : > { %v3178_v56 = vrot.slane %v444_v39, 7  ;;  %v393_v63 = vor.u32 %v391_v44, %v3171_v50  ;;  %v341_v0 = vunpack.c.l.b16 %v277_v45  ;;  %v342_v1 = vunpack.c.l.b16 %v278_v46  ;;  %v2988_v39 = vld [vmem:[%s4149_s1 + $0x70] sm:$0xff]  ;;  %v271_v45 = vld [vmem:[%s3144_s29 + $0xe0] sm:$0xff]  ;;  %v272_v46 = vld [vmem:[%s3144_s29 + $0xe8] sm:$0xff] }
  0x1c   : > { %1130 = vmatpush.bf16.msra.mxu0 %v3001_v29  ;;  %3058 = vmatpush.bf16.msra.mxu1 %v3001_v29  ;;  %v3180_v59 = vrot.slane %v472_v41, 7  ;;  %v349_v2 = vunpack.c.l.b16 %v285_v47  ;;  %v421_v4 = vor.u32 %v419_v51, %v3176_v55  ;;  %v350_v5 = vunpack.c.l.b16 %v286_v53  ;;  %v2979_v41 = vld [vmem:[%s4149_s1 + $0x28] sm:$0xff] }
  0x1d   : > { %3059 = vmatpush.bf16.msra.mxu2 %v3001_v29  ;;  %3060 = vmatpush.bf16.msra.mxu3 %v3001_v29  ;;  %v357_v6 = vunpack.c.l.b16 %v293_v57  ;;  %v358_v7 = vunpack.c.l.b16 %v294_v58  ;;  %v449_v9 = vor.u32 %v447_v52, %v3178_v56  ;;  %v365_v11 = vunpack.c.l.b16 %v301_v61  ;;  %v248_v29 = vld [vmem:[%s3144_s29 + $0x28] sm:$0xff] }
  0x1e   : > { %v477_v10 = vor.u32 %v475_v60, %v3180_v59  ;;  %v366_v12 = vunpack.c.l.b16 %v302_v62  ;;  %v3200_v15 = vpack.c.b16 %v342_v1, %v341_v0  ;;  %v3204_v16 = vsel %vm3188_vm2, 0, %v393_v63  ;;  %v3011_v61 = vld [vmem:[%s4149_s1 + $0x128] sm:$0xff]  ;;  %v3018_v1 = vld [vmem:[%s4149_s1 + $0x160] sm:$0xff] }
  0x1f   : > { %v3208_v17 = vsel %vm3188_vm2, 0, %v421_v4  ;;  %v3210_v18 = vpack.c.b16 %v350_v5, %v349_v2  ;;  %v3212_v19 = vpack.c.b16 %v358_v7, %v357_v6  ;;  %v3216_v20 = vsel %vm3188_vm2, 0, %v449_v9  ;;  %v2987_v62 = vld [vmem:[%s4149_s1 + $0x68] sm:$0xff]  ;;  %v2978_v2 = vld [vmem:[%s4149_s1 + $0x20] sm:$0xff] }
  0x20   : > { %1131 = vmatpush.bf16.msra.mxu0 %v3000_v37  ;;  %3061 = vmatpush.bf16.msra.mxu1 %v3000_v37  ;;  %4181 = vst [vmem:[#allocation2_spill] sm:$0xff] %v3208_v17  ;;  %v3220_v21 = vsel %vm3188_vm2, 0, %v477_v10  ;;  %v3228_v24 = vpack.c.b16 %v366_v12, %v365_v11  ;;  %v395_v28 = vshrl.u32 %v3200_v15, 16  ;;  %v279_v40 = vpack.c.bf16 %v247_v27, %v247_v27 }
  0x21   : > { %3062 = vmatpush.bf16.msra.mxu2 %v3000_v37  ;;  %3063 = vmatpush.bf16.msra.mxu3 %v3000_v37  ;;  %v423_v32 = vshrl.u32 %v3210_v18, 16  ;;  %v451_v33 = vshrl.u32 %v3212_v19, 16  ;;  %v3012_v37 = vld [vmem:[%s4149_s1 + $0x130] sm:$0xff]  ;;  %v280_v42 = vpack.c.bf16 %v248_v29, %v248_v29  ;;  %v287_v43 = vpack.c.bf16 %v255_v30, %v255_v30 }
  0x22   : > { %v479_v36 = vshrl.u32 %v3228_v24, 16  ;;  %v288_v44 = vpack.c.bf16 %v256_v31, %v256_v31  ;;  %v3264_v47 = vrot.slane %v395_v28, 7  ;;  %v398_v48 = vshll.u32 %v3200_v15, 16 }
  0x23   : > { %v295_v49 = vpack.c.bf16 %v263_v34, %v263_v34  ;;  %v296_v51 = vpack.c.bf16 %v264_v35, %v264_v35  ;;  %v3267_v52 = vrot.slane %v423_v32, 7  ;;  %v426_v53 = vshll.u32 %v3210_v18, 16  ;;  %v3010_v18 = vld [vmem:[%s4149_s1 + $0x120] sm:$0xff]  ;;  %v3009_v32 = vld [vmem:[%s4149_s1 + $0x118] sm:$0xff] }
  0x24   : > { %1132 = vmatpush.bf16.msra.mxu0 %v2999_v54  ;;  %3064 = vmatpush.bf16.msra.mxu1 %v2999_v54  ;;  %v454_v57 = vshll.u32 %v3212_v19, 16  ;;  %v3273_v58 = vrot.slane %v479_v36, 7  ;;  %v482_v60 = vshll.u32 %v3228_v24, 16  ;;  %v303_v63 = vpack.c.bf16 %v271_v45, %v271_v45  ;;  %v2986_v19 = vld [vmem:[%s4149_s1 + $0x60] sm:$0xff]  ;;  %v3017_v24 = vld [vmem:[%s4149_s1 + $0x158] sm:$0xff]  ;;  %v3016_v36 = vld [vmem:[%s4149_s1 + $0x150] sm:$0xff] }
  0x25   : > { %3065 = vmatpush.bf16.msra.mxu2 %v2999_v54  ;;  %3066 = vmatpush.bf16.msra.mxu3 %v2999_v54  ;;  %v3270_v54 = vrot.slane %v451_v33, 7  ;;  %v304_v0 = vpack.c.bf16 %v272_v46, %v272_v46  ;;  %v344_v4 = vunpack.c.l.b16 %v280_v42  ;;  %v351_v5 = vunpack.c.l.b16 %v287_v43  ;;  %v2985_v33 = vld [vmem:[%s4149_s1 + $0x58] sm:$0xff]  ;;  %v265_v43 = vld [vmem:[%s3144_s29 + $0xb0] sm:$0xff] }
  0x26   : > { %v352_v6 = vunpack.c.l.b16 %v288_v44  ;;  %v359_v7 = vunpack.c.l.b16 %v295_v49  ;;  %v360_v9 = vunpack.c.l.b16 %v296_v51  ;;  %v400_v10 = vor.u32 %v398_v48, %v3264_v47  ;;  %v258_v42 = vld [vmem:[%s3144_s29 + $0x78] sm:$0xff]  ;;  %v273_v48 = vld [vmem:[%s3144_s29 + $0xf0] sm:$0xff] }
  0x27   : > { %v428_v11 = vor.u32 %v426_v53, %v3267_v52  ;;  %v456_v12 = vor.u32 %v454_v57, %v3270_v54  ;;  %v368_v15 = vunpack.c.l.b16 %v304_v0  ;;  %v266_v44 = vld [vmem:[%s3144_s29 + $0xb8] sm:$0xff]  ;;  %v3008_v49 = vld [vmem:[%s4149_s1 + $0x110] sm:$0xff] }
  0x28   : > { %1133 = vmatpush.bf16.msra.mxu0 %v2998_v3  ;;  %3067 = vmatpush.bf16.msra.mxu1 %v2998_v3  ;;  %v3312_v27 = vsel %vm3188_vm2, 0, %v400_v10  ;;  %v2984_v51 = vld [vmem:[%s4149_s1 + $0x50] sm:$0xff]  ;;  %v298_v10 = vpack.c.bf16 %v266_v44, %v266_v44 }
  0x29   : > { %3068 = vmatpush.bf16.msra.mxu2 %v2998_v3  ;;  %3069 = vmatpush.bf16.msra.mxu3 %v2998_v3  ;;  %v343_v3 = vunpack.c.l.b16 %v279_v40  ;;  %v3316_v28 = vsel %vm3188_vm2, 0, %v428_v11  ;;  %v3320_v29 = vsel %vm3188_vm2, 0, %v456_v12  ;;  %v250_v40 = vld [vmem:[%s3144_s29 + $0x38] sm:$0xff]  ;;  %v305_v11 = vpack.c.bf16 %v273_v48, %v273_v48 }
  0x2a   : > { %4182 = vst [vmem:[#allocation3_spill] sm:$0xff] %v3316_v28 }
  0x2b   : > { %1134 = vmatmul.bf16.vlgmr.msra.gmra.mxu0 %v3204_v16  ;;  %1154 = vmatmul.bf16.vlgmr.msra.gmra.mxu1 %v3208_v17 }
  0x2c   : > { %1174 = vmatmul.bf16.vlgmr.msra.gmra.mxu2 %v3216_v20  ;;  %1194 = vmatmul.bf16.vlgmr.msra.gmra.mxu3 %v3220_v21 }
  0x2d   : > { %1304 = vmatpush.bf16.msrb.mxu2 %v3021_v13  ;;  %1537 = vmatpush.bf16.msrb.mxu3 %v2981_v14  ;;  %v484_v13 = vor.u32 %v482_v60, %v3273_v58  ;;  %v367_v14 = vunpack.c.l.b16 %v303_v63  ;;  %v2975_v63 = vld [vmem:[%s4149_s1 + $0x8] sm:$0xff] }
  0x2e   : > { %1215 = vmatpush.bf16.msrb.mxu1 %v3013_v22  ;;  %1626 = vmatpush.bf16.msrb.mxu0 %v2989_v23  ;;  %v3298_v22 = vpack.c.b16 %v344_v4, %v343_v3  ;;  %v3300_v23 = vpack.c.b16 %v352_v6, %v351_v5  ;;  %v282_v4 = vpack.c.bf16 %v250_v40, %v250_v40 }
  0x2f   : > { %v3324_v30 = vsel %vm3188_vm2, 0, %v484_v13  ;;  %v3326_v31 = vpack.c.b16 %v368_v15, %v367_v14  ;;  %v290_v6 = vpack.c.bf16 %v258_v42, %v258_v42  ;;  %v3007_v13 = vld [vmem:[%s4149_s1 + $0x108] sm:$0xff]  ;;  %v3014_v15 = vld [vmem:[%s4149_s1 + $0x140] sm:$0xff] }
  0x30   : > { %v402_v34 = vshrl.u32 %v3298_v22, 16  ;;  %v430_v35 = vshrl.u32 %v3300_v23, 16  ;;  %v405_v45 = vshll.u32 %v3298_v22, 16  ;;  %v433_v60 = vshll.u32 %v3300_v23, 16  ;;  %v2983_v14 = vld [vmem:[%s4149_s1 + $0x48] sm:$0xff] }
  0x31   : > { %1305 = vmatpush.bf16.msrb.mxu2 %v3020_v25  ;;  %1538 = vmatpush.bf16.msrb.mxu3 %v2980_v26  ;;  %v2977_v25 = vld [vmem:[%s4149_s1 + $0x18] sm:$0xff]  ;;  %v3308_v26 = vpack.c.b16 %v360_v9, %v359_v7  ;;  %v486_v46 = vshrl.u32 %v3326_v31, 16  ;;  %v297_v7 = vpack.c.bf16 %v265_v43, %v265_v43 }
  0x32   : > { %1216 = vmatpush.bf16.msrb.mxu1 %v3012_v37  ;;  %1627 = vmatpush.bf16.msrb.mxu0 %v2988_v39  ;;  %v2976_v37 = vld [vmem:[%s4149_s1 + $0x10] sm:$0xff]  ;;  %v3362_v53 = vrot.slane %v402_v34, 7  ;;  %v3364_v57 = vrot.slane %v430_v35, 7  ;;  %v362_v34 = vunpack.c.l.b16 %v298_v10  ;;  %v369_v35 = vunpack.c.l.b16 %v305_v11 }
  0x33   : > { %v249_v39 = vld [vmem:[%s3144_s29 + $0x30] sm:$0xff]  ;;  %v3378_v9 = vrot.slane %v486_v46, 7 }
  0x34   : > { %v281_v3 = vpack.c.bf16 %v249_v39, %v249_v39  ;;  %v435_v22 = vor.u32 %v433_v60, %v3364_v57  ;;  %v3037_v60 = vld [vmem:[%s4149_s1 + $0x1f8] sm:$0xff] }
  0x35   : > { %1306 = vmatpush.bf16.msrb.mxu2 %v3019_v38  ;;  %1539 = vmatpush.bf16.msrb.mxu3 %v2979_v41  ;;  %v458_v38 = vshrl.u32 %v3308_v26, 16  ;;  %v257_v41 = vld [vmem:[%s3144_s29 + $0x70] sm:$0xff] }
  0x36   : > { %1217 = vmatpush.bf16.msrb.mxu1 %v3011_v61  ;;  %1628 = vmatpush.bf16.msrb.mxu0 %v2987_v62  ;;  %v274_v61 = vld [vmem:[%s3144_s29 + $0xf8] sm:$0xff]  ;;  %v3015_v62 = vld [vmem:[%s4149_s1 + $0x148] sm:$0xff]  ;;  %v289_v5 = vpack.c.bf16 %v257_v41, %v257_v41  ;;  %v3408_v40 = vsel %vm3188_vm2, 0, %v435_v22 }
  0x37   : > { %v3374_v0 = vrot.slane %v458_v38, 7  ;;  %v306_v12 = vpack.c.bf16 %v274_v61, %v274_v61  ;;  %v2982_v38 = vld [vmem:[%s4149_s1 + $0x40] sm:$0xff]  ;;  %4183 = vst [vmem:[#allocation4_spill] sm:$0xff] %v3408_v40  ;;  %v2997_v61 = vld [vmem:[%s4149_s1 + $0xb8] sm:$0xff] }
  0x39   : > { %1307 = vmatpush.bf16.msrb.mxu2 %v3018_v1  ;;  %1540 = vmatpush.bf16.msrb.mxu3 %v2978_v2  ;;  %v461_v1 = vshll.u32 %v3308_v26, 16  ;;  %v489_v2 = vshll.u32 %v3326_v31, 16  ;;  %v353_v26 = vunpack.c.l.b16 %v289_v5  ;;  %v354_v31 = vunpack.c.l.b16 %v290_v6 }
  0x3a   : > { %1218 = vmatpush.bf16.msrb.mxu1 %v3010_v18  ;;  %1629 = vmatpush.bf16.msrb.mxu0 %v2986_v19  ;;  %v2974_v18 = vld [vmem:[%s4149_s1] sm:$0xff]  ;;  %v407_v19 = vor.u32 %v405_v45, %v3362_v53 }
  0x3b   : > { %1139 = vmatmul.bf16.gmra.mxu0 %v3312_v27  ;;  %1159 = vmatmul.bf16.gmra.mxu1 %v3316_v28  ;;  %v463_v23 = vor.u32 %v461_v1, %v3374_v0  ;;  %v378_v42 = vpack.c.b16 %v354_v31, %v353_v26  ;;  %v3045_v1 = vld [vmem:[%s4149_s1 + $0x238] sm:$0xff]  ;;  %v576_v26 = vshrl.u32 %v3204_v16, 16 }
  0x3c   : > { %1179 = vmatmul.bf16.gmra.mxu2 %v3320_v29  ;;  %1199 = vmatmul.bf16.gmra.mxu3 %v3324_v30  ;;  %v3404_v39 = vsel %vm3188_vm2, 0, %v407_v19 }
  0x3d   : > { %1308 = vmatpush.bf16.msrb.mxu2 %v3017_v24  ;;  %1541 = vmatpush.bf16.msrb.mxu3 %v2977_v25  ;;  %v345_v24 = vunpack.c.l.b16 %v281_v3  ;;  %v346_v25 = vunpack.c.l.b16 %v282_v4  ;;  %v3412_v43 = vsel %vm3188_vm2, 0, %v463_v23  ;;  %v440_v5 = vshll.u32 %v378_v42, 16 }
  0x3e   : > { %1219 = vmatpush.bf16.msrb.mxu1 %v3009_v32  ;;  %1630 = vmatpush.bf16.msrb.mxu0 %v2985_v33  ;;  %v361_v32 = vunpack.c.l.b16 %v297_v7  ;;  %v491_v33 = vor.u32 %v489_v2, %v3378_v9 }
  0x3f   : > { %v374_v41 = vpack.c.b16 %v346_v25, %v345_v24  ;;  %v578_v24 = vshll.u32 %v3204_v16, 16  ;;  %v550_v25 = vsel %vm3188_vm2, %v3171_v50, 0  ;;  %v590_v50 = vshll.u32 %v3312_v27, 16 }
  0x40   : > { %v3416_v44 = vsel %vm3188_vm2, 0, %v491_v33  ;;  %v382_v45 = vpack.c.b16 %v362_v34, %v361_v32  ;;  %v583_v32 = vshll.u32 %v550_v25, 16 }
  0x41   : > { %1309 = vmatpush.bf16.msrb.mxu2 %v3016_v36  ;;  %1542 = vmatpush.bf16.msrb.mxu3 %v2976_v37  ;;  %v370_v36 = vunpack.c.l.b16 %v306_v12  ;;  %v3006_v37 = vld [vmem:[%s4149_s1 + $0x100] sm:$0xff]  ;;  %v409_v48 = vshrl.u32 %v374_v41, 16  ;;  %v412_v3 = vshll.u32 %v374_v41, 16  ;;  %v580_v31 = vrot.slane %v578_v24, 1 }
  0x42   : > { %1220 = vmatpush.bf16.msrb.mxu1 %v3008_v49  ;;  %1631 = vmatpush.bf16.msrb.mxu0 %v2984_v51  ;;  %v437_v49 = vshrl.u32 %v378_v42, 16  ;;  %v3029_v51 = vld [vmem:[%s4149_s1 + $0x1b8] sm:$0xff]  ;;  %v468_v7 = vshll.u32 %v382_v45, 16  ;;  %v585_v34 = vrot.slane %v583_v32, 1 }
  0x43   : > { %v386_v46 = vpack.c.b16 %v370_v36, %v369_v35  ;;  %v3434_v2 = vrot.slane %v409_v48, 7  ;;  %v581_v33 = vor.u32 %v580_v31, %v576_v26  ;;  %v820_v35 = vrot.slane %v3204_v16, 1  ;;  %v2996_v48 = vld [vmem:[%s4149_s1 + $0xb0] sm:$0xff] }
  0x44   : > { %v3436_v4 = vrot.slane %v437_v49, 7  ;;  %v821_v36 = vrot.slane %v550_v25, 1  ;;  %v551_v49 = vsel %vm3188_vm2, %v3264_v47, 0  ;;  %v826_v26 = vrot.slane %v3404_v39, 1 }
  0x45   : > { %1310 = vmatpush.bf16.msrb.mxu2 %v3015_v62  ;;  %1543 = vmatpush.bf16.msrb.mxu3 %v2975_v63  ;;  %v465_v62 = vshrl.u32 %v382_v45, 16  ;;  %v493_v63 = vshrl.u32 %v386_v46, 16  ;;  %v496_v11 = vshll.u32 %v386_v46, 16  ;;  %v414_v12 = vor.u32 %v412_v3, %v3434_v2  ;;  %v3028_v45 = vld [vmem:[%s4149_s1 + $0x1b0] sm:$0xff] }
  0x46   : > { %1221 = vmatpush.bf16.msrb.mxu1 %v3007_v13  ;;  %1632 = vmatpush.bf16.msrb.mxu0 %v2983_v14  ;;  %v442_v13 = vor.u32 %v440_v5, %v3436_v4  ;;  %v586_v41 = vsel %vm566_vm3, %v581_v33, %v585_v34  ;;  %v3477_v42 = vsel %vm817_vm4, %v820_v35, %v821_v36  ;;  %v3036_v46 = vld [vmem:[%s4149_s1 + $0x1f0] sm:$0xff]  ;;  %v823_v3 = vrot.slane %v3312_v27, 1  ;;  %v3027_v33 = vld [vmem:[%s4149_s1 + $0x1a8] sm:$0xff] }
  0x47   : > { %v3438_v6 = vrot.slane %v465_v62, 7  ;;  %v3440_v10 = vrot.slane %v493_v63, 7  ;;  %v595_v62 = vshll.u32 %v551_v49, 16  ;;  %v824_v5 = vrot.slane %v551_v49, 1  ;;  %v3035_v34 = vld [vmem:[%s4149_s1 + $0x1e8] sm:$0xff] }
  0x48   : > { %v3452_v19 = vsel %vm3188_vm2, 0, %v442_v13  ;;  %v600_v13 = vshrl.u32 %v3404_v39, 16  ;;  %v553_v35 = vsel %vm3188_vm2, %v3434_v2, 0 }
  0x49   : > { %1311 = vmatpush.bf16.msrb.mxu2 %v3014_v15  ;;  %1544 = vmatpush.bf16.msrb.mxu3 %v2974_v18  ;;  %v470_v14 = vor.u32 %v468_v7, %v3438_v6  ;;  %v498_v15 = vor.u32 %v496_v11, %v3440_v10  ;;  %v3448_v18 = vsel %vm3188_vm2, 0, %v414_v12  ;;  %4185 = vst [vmem:[#allocation6_spill] sm:$0xff] %v3452_v19  ;;  %v602_v11 = vshll.u32 %v3404_v39, 16 }
  0x4a   : > { %1222 = vmatpush.bf16.msrb.mxu1 %v3006_v37  ;;  %1633 = vmatpush.bf16.msrb.mxu0 %v2982_v38  ;;  %4184 = vst [vmem:[#allocation5_spill] sm:$0xff] %v3448_v18  ;;  %v4154_v37 = vmov 0   ;;  %v3504_v47 = vsel %vm817_vm4, %v823_v3, %v824_v5  ;;  %v552_v12 = vsel %vm3188_vm2, %v3362_v53, 0  ;;  %v614_v53 = vshll.u32 %v3448_v18, 16 }
  0x4b   : > { %1144 = vmatmul.bf16.gmra.mxu0 %v3404_v39  ;;  %1164 = vmatmul.bf16.gmra.mxu1 %v3408_v40  ;;  %v3456_v22 = vsel %vm3188_vm2, 0, %v470_v14  ;;  %v3460_v23 = vsel %vm3188_vm2, 0, %v498_v15  ;;  %v3473_v38 = vrot.slane %v4154_v37, 1  ;;  %v604_v14 = vrot.slane %v602_v11, 1 }
  0x4c   : > { %1184 = vmatmul.bf16.gmra.mxu2 %v3412_v43  ;;  %1204 = vmatmul.bf16.gmra.mxu3 %v3416_v44  ;;  %v607_v15 = vshll.u32 %v552_v12, 16  ;;  %v827_v31 = vrot.slane %v552_v12, 1  ;;  %v612_v36 = vshrl.u32 %v3448_v18, 16  ;;  %v829_v2 = vrot.slane %v3448_v18, 1 }
  0x4d   : > { %1997 = vmatpush.bf16.msra.mxu2 %v3029_v51  ;;  %2086 = vmatpush.bf16.msra.mxu3 %v3037_v60  ;;  %v3044_v51 = vld [vmem:[%s4149_s1 + $0x230] sm:$0xff]  ;;  %v588_v60 = vshrl.u32 %v3312_v27, 16  ;;  %v605_v24 = vor.u32 %v604_v14, %v600_v13  ;;  %v832_v13 = vrot.slane %v3208_v17, 1 }
  0x4e   : > { %1715 = vmatpush.bf16.msra.mxu1 %v2997_v61  ;;  %2175 = vmatpush.bf16.msra.mxu0 %v3045_v1  ;;  %v592_v61 = vrot.slane %v590_v50, 1  ;;  %v597_v1 = vrot.slane %v595_v62, 1  ;;  %v609_v25 = vrot.slane %v607_v15, 1  ;;  %v619_v50 = vshll.u32 %v553_v35, 16 }
  0x4f   : > { %v626_v62 = vshll.u32 %v3208_v17, 16 }
  0x50   : > { %v593_v63 = vor.u32 %v592_v61, %v588_v60  ;;  %v3516_v32 = vsel %vm566_vm3, %v605_v24, %v609_v25  ;;  %v621_v49 = vrot.slane %v619_v50, 1  ;;  %v636_v50 = vshrl.u32 %v3316_v28, 16 }
  0x51   : > { %1998 = vmatpush.bf16.msra.mxu2 %v3028_v45  ;;  %2087 = vmatpush.bf16.msra.mxu3 %v3036_v46  ;;  %v2995_v45 = vld [vmem:[%s4149_s1 + $0xa8] sm:$0xff]  ;;  %v628_v3 = vrot.slane %v626_v62, 1 }
  0x52   : > { %1716 = vmatpush.bf16.msra.mxu1 %v2996_v48  ;;  %2176 = vmatpush.bf16.msra.mxu0 %v3044_v51  ;;  %v3501_v7 = vsel %vm566_vm3, %v593_v63, %v597_v1  ;;  %v3043_v46 = vld [vmem:[%s4149_s1 + $0x228] sm:$0xff]  ;;  %v830_v51 = vrot.slane %v553_v35, 1  ;;  %v554_v63 = vsel %vm3188_vm2, %v3176_v55, 0  ;;  %v624_v1 = vshrl.u32 %v3208_v17, 16 }
  0x53   : > { %v631_v5 = vshll.u32 %v554_v63, 16  ;;  %v833_v14 = vrot.slane %v554_v63, 1  ;;  %v638_v55 = vshll.u32 %v3316_v28, 16 }
  0x54   : > { %v3547_v61 = vsel %vm817_vm4, %v829_v2, %v830_v51  ;;  %v629_v11 = vor.u32 %v628_v3, %v624_v1  ;;  %v835_v51 = vrot.slane %v3316_v28, 1 }
  0x55   : > { %1999 = vmatpush.bf16.msra.mxu2 %v3027_v33  ;;  %2088 = vmatpush.bf16.msra.mxu3 %v3035_v34  ;;  %4187 = vst [vmem:[#allocation8_spill] sm:$0xff] %v3547_v61  ;;  %v633_v12 = vrot.slane %v631_v5, 1  ;;  %v555_v33 = vsel %vm3188_vm2, %v3267_v52, 0  ;;  %v3042_v52 = vld [vmem:[%s4149_s1 + $0x220] sm:$0xff] }
  0x56   : > { %1717 = vmatpush.bf16.msra.mxu1 %v2995_v45  ;;  %2177 = vmatpush.bf16.msra.mxu0 %v3043_v46  ;;  %v640_v45 = vrot.slane %v638_v55, 1  ;;  %v643_v46 = vshll.u32 %v555_v33, 16  ;;  %v836_v62 = vrot.slane %v555_v33, 1 }
  0x57   : > { %v3564_v25 = vsel %vm566_vm3, %v629_v11, %v633_v12 }
  0x58   : > { %4188 = vst [vmem:[#allocation9_spill] sm:$0xff] %v3564_v25  ;;  %v645_v2 = vrot.slane %v643_v46, 1  ;;  %v3611_v12 = vsel %vm817_vm4, %v835_v51, %v836_v62 }
  0x59   : > { %4193 = vst [vmem:[#allocation14_spill] sm:$0xff] %v3611_v12 }
  0x5a   : > { %2178 = vmatpush.bf16.msra.mxu0 %v3042_v52 }
  0x5b   : > { %1149 = vmatmul.bf16.gmra.mxu0 %v3448_v18  ;;  %1169 = vmatmul.bf16.gmra.mxu1 %v3452_v19 }
  0x5c   : > { %1189 = vmatmul.bf16.gmra.mxu2 %v3456_v22  ;;  %1209 = vmatmul.bf16.gmra.mxu3 %v3460_v23 }
  0x6b   : > { %1223 = vmatmul.bf16.vlgmr.msrb.gmra.mxu1 %v586_v41  ;;  %1634 = vmatmul.bf16.vlgmr.msrb.gmra.mxu0 %v3473_v38 }
  0x6c   : > { %1312 = vmatmul.bf16.vlgmr.msrb.gmra.mxu2 %v3477_v42  ;;  %1545 = vmatmul.bf16.vlgmr.msrb.gmra.mxu3 %v4154_v37 }
  0x7b   : > { %1228 = vmatmul.bf16.gmra.mxu1 %v3501_v7  ;;  %1639 = vmatmul.bf16.gmra.mxu0 %v586_v41  ;;  %v616_v41 = vrot.slane %v614_v53, 1  ;;  %v3034_v53 = vld [vmem:[%s4149_s1 + $0x1e0] sm:$0xff] }
  0x7c   : > { %1317 = vmatmul.bf16.gmra.mxu2 %v3504_v47  ;;  %1550 = vmatmul.bf16.gmra.mxu3 %v3204_v16  ;;  %v3519_v16 = vsel %vm817_vm4, %v826_v26, %v827_v31  ;;  %v3567_v26 = vsel %vm817_vm4, %v832_v13, %v833_v14  ;;  %v3026_v31 = vld [vmem:[%s4149_s1 + $0x1a0] sm:$0xff]  ;;  %v650_v13 = vshll.u32 %v3408_v40, 16  ;;  %v556_v14 = vsel %vm3188_vm2, %v3364_v57, 0 }
  0x7d   : > { %v617_v48 = vor.u32 %v616_v41, %v612_v36  ;;  %4189 = vst [vmem:[#allocation10_spill] sm:$0xff] %v3567_v26  ;;  %2000 = vmatpush.bf16.msra.mxu2 %v3026_v31  ;;  %2089 = vmatpush.bf16.msra.mxu3 %v3034_v53  ;;  %v655_v46 = vshll.u32 %v556_v14, 16 }
  0x7f   : > { %v3544_v60 = vsel %vm566_vm3, %v617_v48, %v621_v49  ;;  %v2994_v48 = vld [vmem:[%s4149_s1 + $0xa0] sm:$0xff]  ;;  %v641_v49 = vor.u32 %v640_v45, %v636_v50  ;;  %v648_v50 = vshrl.u32 %v3408_v40, 16  ;;  %v652_v45 = vrot.slane %v650_v13, 1 }
  0x80   : > { %4186 = vst [vmem:[#allocation7_spill] sm:$0xff] %v3544_v60  ;;  %1718 = vmatpush.bf16.msra.mxu1 %v2994_v48  ;;  %v657_v52 = vrot.slane %v655_v46, 1  ;;  %v662_v13 = vshll.u32 %v3452_v19, 16 }
  0x81   : > { %v3608_v11 = vsel %vm566_vm3, %v641_v49, %v645_v2  ;;  %v653_v48 = vor.u32 %v652_v45, %v648_v50  ;;  %v838_v49 = vrot.slane %v3408_v40, 1  ;;  %v839_v2 = vrot.slane %v556_v14, 1  ;;  %v3025_v14 = vld [vmem:[%s4149_s1 + $0x198] sm:$0xff] }
  0x82   : > { %4192 = vst [vmem:[#allocation13_spill] sm:$0xff] %v3608_v11  ;;  %v3033_v50 = vld [vmem:[%s4149_s1 + $0x1d8] sm:$0xff]  ;;  %v557_v45 = vsel %vm3188_vm2, %v3436_v4, 0  ;;  %2001 = vmatpush.bf16.msra.mxu2 %v3025_v14 }
  0x83   : > { %2090 = vmatpush.bf16.msra.mxu3 %v3033_v50  ;;  %v3041_v4 = vld [vmem:[%s4149_s1 + $0x218] sm:$0xff] }
  0x84   : > { %2179 = vmatpush.bf16.msra.mxu0 %v3041_v4 }
  0x8b   : > { %1233 = vmatmul.bf16.gmra.mxu1 %v3516_v32  ;;  %1644 = vmatmul.bf16.gmra.mxu0 %v3501_v7 }
  0x8c   : > { %1322 = vmatmul.bf16.gmra.mxu2 %v3519_v16  ;;  %1555 = vmatmul.bf16.gmra.mxu3 %v3312_v27 }
  0x9b   : > { %1238 = vmatmul.bf16.gmra.mxu1 %v3544_v60  ;;  %1649 = vmatmul.bf16.gmra.mxu0 %v3516_v32 }
  0x9c   : > { %1327 = vmatmul.bf16.gmra.mxu2 %v3547_v61  ;;  %1560 = vmatmul.bf16.gmra.mxu3 %v3404_v39 }
  0xa8   : > { %v3559_v15 = vpop.f32.mrf.mxu0  ;;  %v3561_v24 = vpop.f32.mrf.mxu1 }
  0xab   : > { %1243 = vmatmul.bf16.gmra.mxu1 %v3564_v25  ;;  %1654 = vmatmul.bf16.gmra.mxu0 %v3544_v60 }
  0xac   : > { %1332 = vmatmul.bf16.gmra.mxu2 %v3567_v26  ;;  %1565 = vmatmul.bf16.gmra.mxu3 %v3448_v18 }
  0xaf   : > { %v3583_v34 = vpop.f32.mrf.mxu2  ;;  %v3585_v35 = vpop.f32.mrf.mxu3 }
  0xb0   : > { %4190 = vst [vmem:[#allocation11_spill] sm:$0xff] %v3585_v35  ;;  %v3587_v36 = vpop.f32.mrf.mxu0  ;;  %v3589_v41 = vpop.f32.mrf.mxu1  ;;  %v2993_v35 = vld [vmem:[%s4149_s1 + $0x98] sm:$0xff] }
  0xb1   : > { %1719 = vmatpush.bf16.msra.mxu1 %v2993_v35  ;;  %v674_v35 = vshll.u32 %v3216_v20, 16 }
  0xb3   : > { %v676_v4 = vrot.slane %v674_v35, 1  ;;  %v686_v35 = vshll.u32 %v3320_v29, 16 }
  0xb7   : > { %v3599_v63 = vpop.f32.mrf.mxu2  ;;  %v3601_v1 = vpop.f32.mrf.mxu3 }
  0xb8   : > { %4191 = vst [vmem:[#allocation12_spill] sm:$0xff] %v3601_v1  ;;  %v3603_v3 = vpop.f32.mrf.mxu0  ;;  %v3605_v5 = vpop.f32.mrf.mxu1  ;;  %v3643_v1 = vsel %vm817_vm4, %v838_v49, %v839_v2  ;;  %v660_v2 = vshrl.u32 %v3452_v19, 16 }
  0xb9   : > { %4197 = vst [vmem:[#allocation18_spill] sm:$0xff] %v3643_v1 }
  0xbb   : > { %1248 = vmatmul.bf16.gmra.mxu1 %v3608_v11  ;;  %1659 = vmatmul.bf16.gmra.mxu0 %v3564_v25 }
  0xbc   : > { %1337 = vmatmul.bf16.gmra.mxu2 %v3611_v12  ;;  %1570 = vmatmul.bf16.gmra.mxu3 %v3208_v17 }
  0xbf   : > { %v3621_v55 = vpop.f32.mrf.mxu2  ;;  %v3623_v31 = vpop.f32.mrf.mxu3 }
  0xc0   : > { %4194 = vst [vmem:[#allocation15_spill] sm:$0xff] %v3623_v31  ;;  %v3625_v53 = vpop.f32.mrf.mxu0  ;;  %v3627_v33 = vpop.f32.mrf.mxu1  ;;  %v3640_v31 = vsel %vm566_vm3, %v653_v48, %v657_v52 }
  0xc1   : > { %4196 = vst [vmem:[#allocation17_spill] sm:$0xff] %v3640_v31 }
  0xc7   : > { %v3631_v51 = vpop.f32.mrf.mxu2  ;;  %v3633_v57 = vpop.f32.mrf.mxu3 }
  0xc8   : > { %4195 = vst [vmem:[#allocation16_spill] sm:$0xff] %v3633_v57  ;;  %v3635_v62 = vpop.f32.mrf.mxu0  ;;  %v3637_v37 = vpop.f32.mrf.mxu1  ;;  %v664_v57 = vrot.slane %v662_v13, 1 }
  0xca   : > { %v665_v14 = vor.u32 %v664_v57, %v660_v2  ;;  %v672_v2 = vshrl.u32 %v3216_v20, 16 }
  0xcb   : > { %1253 = vmatmul.bf16.gmra.mxu1 %v3640_v31  ;;  %1664 = vmatmul.bf16.gmra.mxu0 %v3608_v11  ;;  %v842_v11 = vrot.slane %v557_v45, 1 }
  0xcc   : > { %1342 = vmatmul.bf16.gmra.mxu2 %v3643_v1  ;;  %1575 = vmatmul.bf16.gmra.mxu3 %v3316_v28  ;;  %v667_v1 = vshll.u32 %v557_v45, 16 }
  0xce   : > { %v669_v50 = vrot.slane %v667_v1, 1  ;;  %v558_v1 = vsel %vm3188_vm2, %v3178_v56, 0 }
  0xcf   : > { %v3659_v46 = vpop.f32.mrf.mxu2  ;;  %v3661_v48 = vpop.f32.mrf.mxu3 }
  0xd0   : > { %4198 = vst [vmem:[#allocation19_spill] sm:$0xff] %v3659_v46  ;;  %v3663_v52 = vpop.f32.mrf.mxu0  ;;  %v3665_v49 = vpop.f32.mrf.mxu1  ;;  %v3684_v17 = vsel %vm566_vm3, %v665_v14, %v669_v50  ;;  %v679_v14 = vshll.u32 %v558_v1, 16  ;;  %v677_v50 = vor.u32 %v676_v4, %v672_v2 }
  0xd1   : > { %4199 = vst [vmem:[#allocation20_spill] sm:$0xff] %v3661_v48  ;;  %v841_v48 = vrot.slane %v3452_v19, 1 }
  0xd2   : > { %4202 = vst [vmem:[#allocation23_spill] sm:$0xff] %v3684_v17 }
  0xd3   : > { %v3687_v26 = vsel %vm817_vm4, %v841_v48, %v842_v11 }
  0xd4   : > { %4203 = vst [vmem:[#allocation24_spill] sm:$0xff] %v3687_v26 }
  0xd7   : > { %v3675_v28 = vpop.f32.mrf.mxu2  ;;  %v3677_v12 = vpop.f32.mrf.mxu3 }
  0xd8   : > { %4200 = vst [vmem:[#allocation21_spill] sm:$0xff] %v3675_v28  ;;  %v3679_v13 = vpop.f32.mrf.mxu0  ;;  %v3681_v25 = vpop.f32.mrf.mxu1 }
  0xd9   : > { %4201 = vst [vmem:[#allocation22_spill] sm:$0xff] %v3677_v12  ;;  %v681_v12 = vrot.slane %v679_v14, 1  ;;  %v684_v14 = vshrl.u32 %v3320_v29, 16 }
  0xdb   : > { %1258 = vmatmul.bf16.gmra.mxu1 %v3684_v17  ;;  %1669 = vmatmul.bf16.gmra.mxu0 %v3640_v31  ;;  %v845_v31 = vrot.slane %v558_v1, 1 }
  0xdc   : > { %1347 = vmatmul.bf16.gmra.mxu2 %v3687_v26  ;;  %1580 = vmatmul.bf16.gmra.mxu3 %v3408_v40  ;;  %v844_v26 = vrot.slane %v3216_v20, 1 }
  0xde   : > { %v3716_v60 = vsel %vm817_vm4, %v844_v26, %v845_v31  ;;  %v559_v26 = vsel %vm3188_vm2, %v3270_v54, 0  ;;  %v3040_v54 = vld [vmem:[%s4149_s1 + $0x210] sm:$0xff] }
  0xdf   : > { %v3697_v57 = vpop.f32.mrf.mxu2  ;;  %v3699_v45 = vpop.f32.mrf.mxu3  ;;  %4208 = vst [vmem:[#allocation29_spill] sm:$0xff] %v3716_v60  ;;  %2180 = vmatpush.bf16.msra.mxu0 %v3040_v54  ;;  %v696_v54 = vshrl.u32 %v3412_v43, 16 }
  0xe0   : > { %4204 = vst [vmem:[#allocation25_spill] sm:$0xff] %v3697_v57  ;;  %v3701_v11 = vpop.f32.mrf.mxu0  ;;  %v3703_v48 = vpop.f32.mrf.mxu1 }
  0xe1   : > { %4205 = vst [vmem:[#allocation26_spill] sm:$0xff] %v3699_v45  ;;  %v3712_v45 = vsel %vm566_vm3, %v677_v50, %v681_v12  ;;  %v3024_v12 = vld [vmem:[%s4149_s1 + $0x190] sm:$0xff]  ;;  %v688_v50 = vrot.slane %v686_v35, 1  ;;  %v847_v35 = vrot.slane %v3320_v29, 1 }
  0xe2   : > { %2002 = vmatpush.bf16.msra.mxu2 %v3024_v12 }
  0xe3   : > { %v689_v12 = vor.u32 %v688_v50, %v684_v14 }
  0xe7   : > { %v3707_v40 = vpop.f32.mrf.mxu2  ;;  %v3709_v56 = vpop.f32.mrf.mxu3 }
  0xe8   : > { %4206 = vst [vmem:[#allocation27_spill] sm:$0xff] %v3707_v40  ;;  %v1224_v57 = vpop.f32.mrf.mxu1  ;;  %v1635_v28 = vpop.f32.mrf.mxu0 }
  0xe9   : > { %4207 = vst [vmem:[#allocation28_spill] sm:$0xff] %v3709_v56  ;;  %v1225_v46 = vadd.f32 %v1224_v57, %v3559_v15  ;;  %v3032_v15 = vld [vmem:[%s4149_s1 + $0x1d0] sm:$0xff]  ;;  %v691_v56 = vshll.u32 %v559_v26, 16 }
  0xea   : > { %2091 = vmatpush.bf16.msra.mxu3 %v3032_v15 }
  0xeb   : > { %1263 = vmatmul.bf16.gmra.mxu1 %v3712_v45  ;;  %1674 = vmatmul.bf16.gmra.mxu0 %v3684_v17  ;;  %v693_v15 = vrot.slane %v691_v56, 1 }
  0xec   : > { %1352 = vmatmul.bf16.gmra.mxu2 %v3716_v60  ;;  %1585 = vmatmul.bf16.gmra.mxu3 %v3452_v19  ;;  %v2992_v19 = vld [vmem:[%s4149_s1 + $0x90] sm:$0xff] }
  0xed   : > { %1720 = vmatpush.bf16.msra.mxu1 %v2992_v19  ;;  %v3744_v18 = vsel %vm566_vm3, %v689_v12, %v693_v15 }
  0xef   : > { %v1313_v31 = vpop.f32.mrf.mxu2  ;;  %v1546_v1 = vpop.f32.mrf.mxu3 }
  0xf0   : > { %v1314_v57 = vadd.f32 %v1313_v31, %v1225_v46  ;;  %v1226_v2 = vpop.f32.mrf.mxu1  ;;  %v1637_v4 = vpop.f32.mrf.mxu0  ;;  %v848_v31 = vrot.slane %v559_v26, 1 }
  0xf1   : > { %v1227_v60 = vadd.f32 %v1226_v2, %v3587_v36 }
  0xf2   : > { %v1547_v17 = vadd.f32 %v1546_v1, %v1314_v57  ;;  %v3748_v14 = vsel %vm817_vm4, %v847_v35, %v848_v31 }
  0xf3   : > { %4210 = vst [vmem:[#allocation31_spill] sm:$0xff] %v3748_v14 }
  0xf4   : > { %v3740_v46 = vadd.f32 %v1635_v28, %v1547_v17  ;;  %v698_v17 = vshll.u32 %v3412_v43, 16 }
  0xf6   : > { %4209 = vst [vmem:[#allocation30_spill] sm:$0xff] %v3740_v46  ;;  %v700_v12 = vrot.slane %v698_v17, 1 }
  0xf7   : > { %v1315_v40 = vpop.f32.mrf.mxu2  ;;  %v1548_v36 = vpop.f32.mrf.mxu3 }
  0xf8   : > { %v1316_v1 = vadd.f32 %v1315_v40, %v1227_v60  ;;  %v1229_v57 = vpop.f32.mrf.mxu1  ;;  %v1640_v2 = vpop.f32.mrf.mxu0  ;;  %v560_v40 = vsel %vm3188_vm2, %v3374_v0, 0 }
  0xf9   : > { %v1230_v61 = vadd.f32 %v1229_v57, %v3603_v3  ;;  %v703_v15 = vshll.u32 %v560_v40, 16  ;;  %v850_v57 = vrot.slane %v3412_v43, 1 }
  0xfa   : > { %v1549_v19 = vadd.f32 %v1548_v36, %v1316_v1  ;;  %v701_v36 = vor.u32 %v700_v12, %v696_v54 }
  0xfb   : > { %1268 = vmatmul.bf16.gmra.mxu1 %v3744_v18  ;;  %1679 = vmatmul.bf16.gmra.mxu0 %v3712_v45  ;;  %v705_v1 = vrot.slane %v703_v15, 1 }
  0xfc   : > { %1357 = vmatmul.bf16.gmra.mxu2 %v3748_v14  ;;  %1590 = vmatmul.bf16.gmra.mxu3 %v3216_v20  ;;  %v3755_v28 = vadd.f32 %v1637_v4, %v1549_v19  ;;  %v851_v19 = vrot.slane %v560_v40, 1  ;;  %v3023_v40 = vld [vmem:[%s4149_s1 + $0x188] sm:$0xff] }
  0xfd   : > { %v3766_v14 = vsel %vm566_vm3, %v701_v36, %v705_v1  ;;  %2003 = vmatpush.bf16.msra.mxu2 %v3023_v40 }
  0xfe   : > { %4211 = vst [vmem:[#allocation32_spill] sm:$0xff] %v3755_v28 }
  0xff   : > { %v1318_v60 = vpop.f32.mrf.mxu2  ;;  %v1551_v3 = vpop.f32.mrf.mxu3 }
 0x100   : > { %v1319_v56 = vadd.f32 %v1318_v60, %v1230_v61  ;;  %v1231_v26 = vpop.f32.mrf.mxu1  ;;  %v1642_v50 = vpop.f32.mrf.mxu0 }
 0x101   : > { %v1232_v35 = vadd.f32 %v1231_v26, %v3625_v53  ;;  %v3770_v53 = vsel %vm817_vm4, %v850_v57, %v851_v19 }
 0x102   : > { %v1552_v31 = vadd.f32 %v1551_v3, %v1319_v56 }
 0x104   : > { %v3762_v4 = vadd.f32 %v1640_v2, %v1552_v31  ;;  %v710_v2 = vshll.u32 %v3456_v22, 16 }
 0x106   : > { %v712_v31 = vrot.slane %v710_v2, 1 }
 0x107   : > { %v1320_v0 = vpop.f32.mrf.mxu2  ;;  %v1553_v28 = vpop.f32.mrf.mxu3 }
 0x108   : > { %v1321_v46 = vadd.f32 %v1320_v0, %v1232_v35  ;;  %v1234_v61 = vpop.f32.mrf.mxu1  ;;  %v1645_v60 = vpop.f32.mrf.mxu0  ;;  %v708_v35 = vshrl.u32 %v3456_v22, 16 }
 0x109   : > { %v1235_v17 = vadd.f32 %v1234_v61, %v3635_v62  ;;  %v3031_v62 = vld [vmem:[%s4149_s1 + $0x1c8] sm:$0xff] }
 0x10a   : > { %v1554_v3 = vadd.f32 %v1553_v28, %v1321_v46  ;;  %v561_v46 = vsel %vm3188_vm2, %v3438_v6, 0  ;;  %2092 = vmatpush.bf16.msra.mxu3 %v3031_v62  ;;  %v3039_v6 = vld [vmem:[%s4149_s1 + $0x208] sm:$0xff]  ;;  %v713_v19 = vor.u32 %v712_v31, %v708_v35 }
 0x10b   : > { %1273 = vmatmul.bf16.gmra.mxu1 %v3766_v14  ;;  %1684 = vmatmul.bf16.gmra.mxu0 %v3744_v18  ;;  %v715_v36 = vshll.u32 %v561_v46, 16 }
 0x10c   : > { %1362 = vmatmul.bf16.gmra.mxu2 %v3770_v53  ;;  %1595 = vmatmul.bf16.gmra.mxu3 %v3320_v29  ;;  %v3783_v56 = vadd.f32 %v1642_v50, %v1554_v3  ;;  %v2991_v50 = vld [vmem:[%s4149_s1 + $0x88] sm:$0xff]  ;;  %v854_v3 = vrot.slane %v561_v46, 1 }
 0x10d   : > { %v717_v0 = vrot.slane %v715_v36, 1  ;;  %1721 = vmatpush.bf16.msra.mxu1 %v2991_v50  ;;  %2181 = vmatpush.bf16.msra.mxu0 %v3039_v6  ;;  %v720_v6 = vshrl.u32 %v3220_v21, 16 }
 0x10f   : > { %v1323_v28 = vpop.f32.mrf.mxu2  ;;  %v1556_v26 = vpop.f32.mrf.mxu3 }
 0x110   : > { %v1324_v54 = vadd.f32 %v1323_v28, %v1235_v17  ;;  %v1236_v12 = vpop.f32.mrf.mxu1  ;;  %v1647_v15 = vpop.f32.mrf.mxu0  ;;  %v853_v17 = vrot.slane %v3456_v22, 1 }
 0x111   : > { %v1237_v1 = vadd.f32 %v1236_v12, %v3663_v52 }
 0x112   : > { %v1557_v57 = vadd.f32 %v1556_v26, %v1324_v54  ;;  %v3800_v26 = vsel %vm566_vm3, %v713_v19, %v717_v0  ;;  %v3804_v12 = vsel %vm817_vm4, %v853_v17, %v854_v3 }
 0x114   : > { %v3796_v61 = vadd.f32 %v1645_v60, %v1557_v57  ;;  %v722_v60 = vshll.u32 %v3220_v21, 16 }
 0x116   : > { %4212 = vst [vmem:[#allocation33_spill] sm:$0xff] %v3796_v61  ;;  %v724_v19 = vrot.slane %v722_v60, 1 }
 0x117   : > { %v1325_v2 = vpop.f32.mrf.mxu2  ;;  %v1558_v52 = vpop.f32.mrf.mxu3 }
 0x118   : > { %v1326_v40 = vadd.f32 %v1325_v2, %v1237_v1  ;;  %v1239_v62 = vpop.f32.mrf.mxu1  ;;  %v1650_v28 = vpop.f32.mrf.mxu0  ;;  %v725_v2 = vor.u32 %v724_v19, %v720_v6 }
 0x119   : > { %v1240_v54 = vadd.f32 %v1239_v62, %v3679_v13  ;;  %v562_v13 = vsel %vm3188_vm2, %v3180_v59, 0 }
 0x11a   : > { %v1559_v35 = vadd.f32 %v1558_v52, %v1326_v40  ;;  %v727_v0 = vshll.u32 %v562_v13, 16  ;;  %v856_v40 = vrot.slane %v3220_v21, 1  ;;  %v857_v62 = vrot.slane %v562_v13, 1  ;;  %v3022_v13 = vld [vmem:[%s4149_s1 + $0x180] sm:$0xff] }
 0x11b   : > { %1278 = vmatmul.bf16.gmra.mxu1 %v3800_v26  ;;  %1689 = vmatmul.bf16.gmra.mxu0 %v3766_v14 }
 0x11c   : > { %1367 = vmatmul.bf16.gmra.mxu2 %v3804_v12  ;;  %1600 = vmatmul.bf16.gmra.mxu3 %v3412_v43  ;;  %v3811_v46 = vadd.f32 %v1647_v15, %v1559_v35  ;;  %v729_v52 = vrot.slane %v727_v0, 1  ;;  %v3825_v60 = vsel %vm817_vm4, %v856_v40, %v857_v62 }
 0x11d   : > { %2004 = vmatpush.bf16.msra.mxu2 %v3022_v13 }
 0x11e   : > { %4213 = vst [vmem:[#allocation34_spill] sm:$0xff] %v3811_v46  ;;  %v3822_v61 = vsel %vm566_vm3, %v725_v2, %v729_v52  ;;  %v732_v2 = vshrl.u32 %v3324_v30, 16 }
 0x11f   : > { %v1328_v31 = vpop.f32.mrf.mxu2  ;;  %v1561_v36 = vpop.f32.mrf.mxu3 }
 0x120   : > { %v1329_v1 = vadd.f32 %v1328_v31, %v1240_v54  ;;  %v1241_v57 = vpop.f32.mrf.mxu1  ;;  %v1652_v50 = vpop.f32.mrf.mxu0 }
 0x121   : > { %v1242_v17 = vadd.f32 %v1241_v57, %v3701_v11 }
 0x122   : > { %v1562_v3 = vadd.f32 %v1561_v36, %v1329_v1  ;;  %v3030_v36 = vld [vmem:[%s4149_s1 + $0x1c0] sm:$0xff] }
 0x123   : > { %2093 = vmatpush.bf16.msra.mxu3 %v3030_v36 }
 0x124   : > { %v3818_v15 = vadd.f32 %v1650_v28, %v1562_v3  ;;  %v734_v28 = vshll.u32 %v3324_v30, 16 }
 0x126   : > { %v736_v52 = vrot.slane %v734_v28, 1 }
 0x127   : > { %v1330_v59 = vpop.f32.mrf.mxu2  ;;  %v1563_v35 = vpop.f32.mrf.mxu3 }
 0x128   : > { %v1331_v46 = vadd.f32 %v1330_v59, %v1242_v17  ;;  %v1244_v54 = vpop.f32.mrf.mxu1  ;;  %v1655_v31 = vpop.f32.mrf.mxu0 }
 0x129   : > { %v1245_v57 = vadd.f32 %v1244_v54, %v3561_v24  ;;  %v737_v24 = vor.u32 %v736_v52, %v732_v2  ;;  %v859_v54 = vrot.slane %v3324_v30, 1 }
 0x12a   : > { %v1564_v11 = vadd.f32 %v1563_v35, %v1331_v46  ;;  %v563_v46 = vsel %vm3188_vm2, %v3273_v58, 0  ;;  %v3038_v58 = vld [vmem:[%s4149_s1 + $0x200] sm:$0xff] }
 0x12b   : > { %1283 = vmatmul.bf16.gmra.mxu1 %v3822_v61  ;;  %1694 = vmatmul.bf16.gmra.mxu0 %v3800_v26  ;;  %v739_v40 = vshll.u32 %v563_v46, 16 }
 0x12c   : > { %1372 = vmatmul.bf16.gmra.mxu2 %v3825_v60  ;;  %1605 = vmatmul.bf16.gmra.mxu3 %v3456_v22  ;;  %v3838_v1 = vadd.f32 %v1652_v50, %v1564_v11  ;;  %v2990_v50 = vld [vmem:[%s4149_s1 + $0x80] sm:$0xff]  ;;  %v860_v11 = vrot.slane %v563_v46, 1  ;;  %v564_v46 = vsel %vm3188_vm2, %v3378_v9, 0 }
 0x12d   : > { %v741_v59 = vrot.slane %v739_v40, 1  ;;  %1722 = vmatpush.bf16.msra.mxu1 %v2990_v50  ;;  %2182 = vmatpush.bf16.msra.mxu0 %v3038_v58 }
 0x12e   : > { %v3859_v2 = vsel %vm817_vm4, %v859_v54, %v860_v11  ;;  %v751_v11 = vshll.u32 %v564_v46, 16 }
 0x12f   : > { %v1333_v6 = vpop.f32.mrf.mxu2  ;;  %v1566_v19 = vpop.f32.mrf.mxu3 }
 0x130   : > { %v1334_v0 = vadd.f32 %v1333_v6, %v1245_v57  ;;  %v1246_v17 = vpop.f32.mrf.mxu1  ;;  %v1657_v3 = vpop.f32.mrf.mxu0 }
 0x131   : > { %v1247_v28 = vadd.f32 %v1246_v17, %v3589_v41  ;;  %v746_v41 = vshll.u32 %v3416_v44, 16 }
 0x132   : > { %v1567_v62 = vadd.f32 %v1566_v19, %v1334_v0  ;;  %v3856_v0 = vsel %vm566_vm3, %v737_v24, %v741_v59  ;;  %v744_v59 = vshrl.u32 %v3416_v44, 16 }
 0x133   : > { %v748_v54 = vrot.slane %v746_v41, 1 }
 0x134   : > { %v3851_v35 = vadd.f32 %v1655_v31, %v1567_v62 }
 0x136   : > { %4214 = vst [vmem:[#allocation35_spill] sm:$0xff] %v3851_v35 }
 0x137   : > { %v1335_v13 = vpop.f32.mrf.mxu2  ;;  %v1568_v36 = vpop.f32.mrf.mxu3 }
 0x138   : > { %v1336_v57 = vadd.f32 %v1335_v13, %v1247_v28  ;;  %v1249_v6 = vpop.f32.mrf.mxu1  ;;  %v1660_v19 = vpop.f32.mrf.mxu0  ;;  %v749_v13 = vor.u32 %v748_v54, %v744_v59 }
 0x139   : > { %v1250_v17 = vadd.f32 %v1249_v6, %v3605_v5 }
 0x13a   : > { %v1569_v52 = vadd.f32 %v1568_v36, %v1336_v57  ;;  %v753_v36 = vrot.slane %v751_v11, 1  ;;  %v862_v57 = vrot.slane %v3416_v44, 1 }
 0x13b   : > { %1288 = vmatmul.bf16.gmra.mxu1 %v3856_v0  ;;  %1699 = vmatmul.bf16.gmra.mxu0 %v3822_v61 }
 0x13c   : > { %1377 = vmatmul.bf16.gmra.mxu2 %v3859_v2  ;;  %1610 = vmatmul.bf16.gmra.mxu3 %v3220_v21  ;;  %v3866_v31 = vadd.f32 %v1657_v3, %v1569_v52  ;;  %v863_v52 = vrot.slane %v564_v46, 1  ;;  %v3878_v35 = vsel %vm566_vm3, %v749_v13, %v753_v36  ;;  %v565_v46 = vsel %vm3188_vm2, %v3440_v10, 0 }
 0x13d   : > { %v763_v36 = vshll.u32 %v565_v46, 16  ;;  %v866_v8 = vrot.slane %v565_v46, 1 }
 0x13e   : > { %4215 = vst [vmem:[#allocation36_spill] sm:$0xff] %v3866_v31  ;;  %v3881_v41 = vsel %vm817_vm4, %v862_v57, %v863_v52 }
 0x13f   : > { %v1338_v40 = vpop.f32.mrf.mxu2  ;;  %v1571_v62 = vpop.f32.mrf.mxu3 }
 0x140   : > { %v1339_v50 = vadd.f32 %v1338_v40, %v1250_v17  ;;  %v1251_v58 = vpop.f32.mrf.mxu1  ;;  %v1662_v24 = vpop.f32.mrf.mxu0 }
 0x141   : > { %v1252_v9 = vadd.f32 %v1251_v58, %v3627_v33  ;;  %v758_v33 = vshll.u32 %v3460_v23, 16 }
 0x142   : > { %v1572_v28 = vadd.f32 %v1571_v62, %v1339_v50 }
 0x143   : > { %v760_v13 = vrot.slane %v758_v33, 1 }
 0x144   : > { %v3873_v3 = vadd.f32 %v1660_v19, %v1572_v28  ;;  %v756_v28 = vshrl.u32 %v3460_v23, 16 }
 0x146   : > { %v761_v52 = vor.u32 %v760_v13, %v756_v28 }
 0x147   : > { %v1340_v5 = vpop.f32.mrf.mxu2  ;;  %v1573_v6 = vpop.f32.mrf.mxu3 }
 0x148   : > { %v1341_v31 = vadd.f32 %v1340_v5, %v1252_v9  ;;  %v1254_v17 = vpop.f32.mrf.mxu1  ;;  %v1665_v40 = vpop.f32.mrf.mxu0  ;;  %v765_v9 = vrot.slane %v763_v36, 1  ;;  %v865_v5 = vrot.slane %v3460_v23, 1 }
 0x149   : > { %v1255_v50 = vadd.f32 %v1254_v17, %v3637_v37 }
 0x14a   : > { %v1574_v62 = vadd.f32 %v1573_v6, %v1341_v31  ;;  %v3903_v33 = vsel %vm817_vm4, %v865_v5, %v866_v8 }
 0x14b   : > { %1293 = vmatmul.bf16.gmra.mxu1 %v3878_v35  ;;  %1704 = vmatmul.bf16.gmra.mxu0 %v3856_v0 }
 0x14c   : > { %1382 = vmatmul.bf16.gmra.mxu2 %v3881_v41  ;;  %1615 = vmatmul.bf16.gmra.mxu3 %v3324_v30  ;;  %v3888_v19 = vadd.f32 %v1662_v24, %v1574_v62 }
 0x14f   : > { %v1343_v58 = vpop.f32.mrf.mxu2  ;;  %v1576_v31 = vpop.f32.mrf.mxu3 }
 0x150   : > { %v1344_v59 = vadd.f32 %v1343_v58, %v1255_v50  ;;  %v1256_v54 = vpop.f32.mrf.mxu1  ;;  %v1667_v11 = vpop.f32.mrf.mxu0  ;;  %v3900_v58 = vsel %vm566_vm3, %v761_v52, %v765_v9 }
 0x151   : > { %v1257_v10 = vadd.f32 %v1256_v54, %v3665_v49 }
 0x152   : > { %v1577_v57 = vadd.f32 %v1576_v31, %v1344_v59 }
 0x154   : > { %v3895_v24 = vadd.f32 %v1665_v40, %v1577_v57 }
 0x157   : > { %v1345_v37 = vpop.f32.mrf.mxu2  ;;  %v1578_v6 = vpop.f32.mrf.mxu3 }
 0x158   : > { %v1346_v17 = vadd.f32 %v1345_v37, %v1257_v10  ;;  %v1259_v62 = vpop.f32.mrf.mxu1  ;;  %v1670_v50 = vpop.f32.mrf.mxu0 }
 0x159   : > { %v1260_v40 = vadd.f32 %v1259_v62, %v3681_v25 }
 0x15a   : > { %v1579_v31 = vadd.f32 %v1578_v6, %v1346_v17 }
 0x15b   : > { %1298 = vmatmul.bf16.gmra.mxu1 %v3900_v58  ;;  %1709 = vmatmul.bf16.gmra.mxu0 %v3878_v35 }
 0x15c   : > { %1387 = vmatmul.bf16.gmra.mxu2 %v3903_v33  ;;  %1620 = vmatmul.bf16.gmra.mxu3 %v3416_v44  ;;  %v3909_v49 = vadd.f32 %v1667_v11, %v1579_v31 }
 0x15f   : > { %v1348_v46 = vpop.f32.mrf.mxu2  ;;  %v1581_v59 = vpop.f32.mrf.mxu3 }
 0x160   : > { %v1349_v54 = vadd.f32 %v1348_v46, %v1260_v40  ;;  %v1261_v28 = vpop.f32.mrf.mxu1  ;;  %v1672_v13 = vpop.f32.mrf.mxu0 }
 0x161   : > { %v1262_v52 = vadd.f32 %v1261_v28, %v3703_v48 }
 0x162   : > { %v1582_v36 = vadd.f32 %v1581_v59, %v1349_v54 }
 0x164   : > { %v3912_v57 = vadd.f32 %v1670_v50, %v1582_v36 }
 0x167   : > { %v1350_v9 = vpop.f32.mrf.mxu2  ;;  %v1583_v5 = vpop.f32.mrf.mxu3 }
 0x168   : > { %v1351_v8 = vadd.f32 %v1350_v9, %v1262_v52  ;;  %v1264_v10 = vpop.f32.mrf.mxu1  ;;  %v1675_v37 = vpop.f32.mrf.mxu0 }
 0x169   : > { %v1265_v11 = vadd.f32 %v1264_v10, %v3583_v34 }
 0x16a   : > { %v1584_v6 = vadd.f32 %v1583_v5, %v1351_v8 }
 0x16b   : > { %1723 = vmatmul.bf16.vlgmr.msra.gmra.mxu1 %v3473_v38  ;;  %2183 = vmatmul.bf16.vlgmr.msra.gmra.mxu0 %v3504_v47 }
 0x16c   : > { %2005 = vmatmul.bf16.vlgmr.msra.gmra.mxu2 %v3312_v27  ;;  %2094 = vmatmul.bf16.vlgmr.msra.gmra.mxu3 %v3501_v7  ;;  %v3919_v25 = vadd.f32 %v1672_v13, %v1584_v6 }
 0x16f   : > { %v1353_v17 = vpop.f32.mrf.mxu2  ;;  %v1586_v48 = vpop.f32.mrf.mxu3 }
 0x170   : > { %v1354_v62 = vadd.f32 %v1353_v17, %v1265_v11  ;;  %v1266_v50 = vpop.f32.mrf.mxu1  ;;  %v1677_v31 = vpop.f32.mrf.mxu0 }
 0x171   : > { %v1267_v59 = vadd.f32 %v1266_v50, %v3599_v63  ;;  %v4216_v50 = vld [vmem:[#allocation8_spill] sm:$0xff] }
 0x172   : > { %v1587_v40 = vadd.f32 %v1586_v48, %v1354_v62 }
 0x174   : > { %v3922_v46 = vadd.f32 %v1675_v37, %v1587_v40 }
 0x177   : > { %v1355_v54 = vpop.f32.mrf.mxu2  ;;  %v1588_v28 = vpop.f32.mrf.mxu3 }
 0x178   : > { %v1356_v36 = vadd.f32 %v1355_v54, %v1267_v59  ;;  %v1269_v27 = vpop.f32.mrf.mxu1  ;;  %v1680_v52 = vpop.f32.mrf.mxu0  ;;  %v4219_v59 = vld [vmem:[#allocation19_spill] sm:$0xff] }
 0x179   : > { %v1270_v13 = vadd.f32 %v1269_v27, %v3621_v55  ;;  %v4217_v55 = vld [vmem:[#allocation5_spill] sm:$0xff] }
 0x17a   : > { %v1589_v7 = vadd.f32 %v1588_v28, %v1356_v36 }
 0x17b   : > { %1728 = vmatmul.bf16.gmra.mxu1 %v3477_v42  ;;  %2188 = vmatmul.bf16.gmra.mxu0 %v3519_v16 }
 0x17c   : > { %2010 = vmatmul.bf16.gmra.mxu2 %v3404_v39  ;;  %2099 = vmatmul.bf16.gmra.mxu3 %v3516_v32  ;;  %v3929_v34 = vadd.f32 %v1677_v31, %v1589_v7  ;;  %v4218_v31 = vld [vmem:[#allocation7_spill] sm:$0xff] }
 0x17f   : > { %v1358_v9 = vpop.f32.mrf.mxu2  ;;  %v1591_v63 = vpop.f32.mrf.mxu3 }
 0x180   : > { %v1359_v5 = vadd.f32 %v1358_v9, %v1270_v13  ;;  %v1271_v8 = vpop.f32.mrf.mxu1  ;;  %v1682_v10 = vpop.f32.mrf.mxu0  ;;  %v4220_v9 = vld [vmem:[#allocation21_spill] sm:$0xff] }
 0x181   : > { %v1272_v42 = vadd.f32 %v1271_v8, %v3631_v51 }
 0x182   : > { %v1592_v37 = vadd.f32 %v1591_v63, %v1359_v5 }
 0x184   : > { %v3932_v6 = vadd.f32 %v1680_v52, %v1592_v37 }
 0x187   : > { %v1360_v11 = vpop.f32.mrf.mxu2  ;;  %v1593_v17 = vpop.f32.mrf.mxu3 }
 0x188   : > { %v1361_v48 = vadd.f32 %v1360_v11, %v1272_v42  ;;  %v1274_v39 = vpop.f32.mrf.mxu1  ;;  %v1685_v62 = vpop.f32.mrf.mxu0 }
 0x189   : > { %v1275_v54 = vadd.f32 %v1274_v39, %v4219_v59 }
 0x18a   : > { %v1594_v32 = vadd.f32 %v1593_v17, %v1361_v48  ;;  %v4222_v17 = vld [vmem:[#allocation2_spill] sm:$0xff]  ;;  %v4223_v48 = vld [vmem:[#allocation9_spill] sm:$0xff] }
 0x18b   : > { %1733 = vmatmul.bf16.gmra.mxu1 %v3504_v47  ;;  %2193 = vmatmul.bf16.gmra.mxu0 %v4216_v50 }
 0x18c   : > { %2015 = vmatmul.bf16.gmra.mxu2 %v4217_v55  ;;  %2104 = vmatmul.bf16.gmra.mxu3 %v4218_v31  ;;  %v3939_v40 = vadd.f32 %v1682_v10, %v1594_v32  ;;  %v4221_v10 = vld [vmem:[#allocation10_spill] sm:$0xff] }
 0x18f   : > { %v1363_v28 = vpop.f32.mrf.mxu2  ;;  %v1596_v51 = vpop.f32.mrf.mxu3 }
 0x190   : > { %v1364_v36 = vadd.f32 %v1363_v28, %v1275_v54  ;;  %v1276_v27 = vpop.f32.mrf.mxu1  ;;  %v1687_v52 = vpop.f32.mrf.mxu0 }
 0x191   : > { %v1277_v47 = vadd.f32 %v1276_v27, %v4220_v9  ;;  %v4225_v27 = vld [vmem:[#allocation27_spill] sm:$0xff] }
 0x192   : > { %v1597_v7 = vadd.f32 %v1596_v51, %v1364_v36 }
 0x194   : > { %v3942_v13 = vadd.f32 %v1685_v62, %v1597_v7  ;;  %v4224_v62 = vld [vmem:[#allocation25_spill] sm:$0xff] }
 0x197   : > { %v1365_v63 = vpop.f32.mrf.mxu2  ;;  %v1598_v5 = vpop.f32.mrf.mxu3 }
 0x198   : > { %v1366_v8 = vadd.f32 %v1365_v63, %v1277_v47  ;;  %v1279_v37 = vpop.f32.mrf.mxu1  ;;  %v1690_v42 = vpop.f32.mrf.mxu0 }
 0x199   : > { %v1280_v32 = vadd.f32 %v1279_v37, %v4224_v62  ;;  %v4227_v37 = vld [vmem:[#allocation3_spill] sm:$0xff] }
 0x19a   : > { %v1599_v11 = vadd.f32 %v1598_v5, %v1366_v8 }
 0x19b   : > { %1738 = vmatmul.bf16.gmra.mxu1 %v3519_v16  ;;  %2198 = vmatmul.bf16.gmra.mxu0 %v4221_v10 }
 0x19c   : > { %2020 = vmatmul.bf16.gmra.mxu2 %v4222_v17  ;;  %2109 = vmatmul.bf16.gmra.mxu3 %v4223_v48  ;;  %v3949_v39 = vadd.f32 %v1687_v52, %v1599_v11  ;;  %v4226_v52 = vld [vmem:[#allocation14_spill] sm:$0xff]  ;;  %v4228_v11 = vld [vmem:[#allocation13_spill] sm:$0xff] }
 0x19f   : > { %v1368_v55 = vpop.f32.mrf.mxu2  ;;  %v1601_v31 = vpop.f32.mrf.mxu3 }
 0x1a0   : > { %v1369_v59 = vadd.f32 %v1368_v55, %v1280_v32  ;;  %v1281_v54 = vpop.f32.mrf.mxu1  ;;  %v1692_v28 = vpop.f32.mrf.mxu0 }
 0x1a1   : > { %v1282_v16 = vadd.f32 %v1281_v54, %v4225_v27  ;;  %v4232_v27 = vld [vmem:[#allocation12_spill] sm:$0xff] }
 0x1a2   : > { %v1602_v51 = vadd.f32 %v1601_v31, %v1369_v59 }
 0x1a4   : > { %v3952_v36 = vadd.f32 %v1690_v42, %v1602_v51  ;;  %v4230_v42 = vld [vmem:[#allocation11_spill] sm:$0xff] }
 0x1a7   : > { %v1370_v7 = vpop.f32.mrf.mxu2  ;;  %v1603_v9 = vpop.f32.mrf.mxu3 }
 0x1a8   : > { %v1371_v47 = vadd.f32 %v1370_v7, %v1282_v16  ;;  %v1284_v63 = vpop.f32.mrf.mxu1  ;;  %v1695_v5 = vpop.f32.mrf.mxu0 }
 0x1a9   : > { %v1285_v48 = vadd.f32 %v1284_v63, %v4230_v42  ;;  %v4234_v63 = vld [vmem:[#allocation4_spill] sm:$0xff] }
 0x1aa   : > { %v1604_v8 = vadd.f32 %v1603_v9, %v1371_v47 }
 0x1ab   : > { %1743 = vmatmul.bf16.gmra.mxu1 %v4216_v50  ;;  %2203 = vmatmul.bf16.gmra.mxu0 %v4226_v52 }
 0x1ac   : > { %2025 = vmatmul.bf16.gmra.mxu2 %v4227_v37  ;;  %2114 = vmatmul.bf16.gmra.mxu3 %v4228_v11  ;;  %v3959_v17 = vadd.f32 %v1692_v28, %v1604_v8  ;;  %v4233_v28 = vld [vmem:[#allocation18_spill] sm:$0xff]  ;;  %v4235_v8 = vld [vmem:[#allocation17_spill] sm:$0xff] }
 0x1ae   : > { %4229 = vst [vmem:[#allocation8_spill] sm:$0xff] %v3959_v17 }
 0x1af   : > { %v1373_v62 = vpop.f32.mrf.mxu2  ;;  %v1606_v32 = vpop.f32.mrf.mxu3 }
 0x1b0   : > { %v1374_v55 = vadd.f32 %v1373_v62, %v1285_v48  ;;  %v1286_v31 = vpop.f32.mrf.mxu1  ;;  %v1697_v59 = vpop.f32.mrf.mxu0 }
 0x1b1   : > { %v1287_v50 = vadd.f32 %v1286_v31, %v4232_v27 }
 0x1b2   : > { %v1607_v54 = vadd.f32 %v1606_v32, %v1374_v55 }
 0x1b4   : > { %v3962_v51 = vadd.f32 %v1695_v5, %v1607_v54  ;;  %v4237_v5 = vld [vmem:[#allocation15_spill] sm:$0xff] }
 0x1b6   : > { %4231 = vst [vmem:[#allocation5_spill] sm:$0xff] %v3962_v51 }
 0x1b7   : > { %v1375_v16 = vpop.f32.mrf.mxu2  ;;  %v1608_v7 = vpop.f32.mrf.mxu3 }
 0x1b8   : > { %v1376_v9 = vadd.f32 %v1375_v16, %v1287_v50  ;;  %v1289_v47 = vpop.f32.mrf.mxu1  ;;  %v1700_v37 = vpop.f32.mrf.mxu0  ;;  %v4239_v16 = vld [vmem:[#allocation16_spill] sm:$0xff] }
 0x1b9   : > { %v1290_v48 = vadd.f32 %v1289_v47, %v4237_v5  ;;  %v4241_v47 = vld [vmem:[#allocation6_spill] sm:$0xff] }
 0x1ba   : > { %v1609_v11 = vadd.f32 %v1608_v7, %v1376_v9 }
 0x1bb   : > { %1748 = vmatmul.bf16.gmra.mxu1 %v4221_v10  ;;  %2208 = vmatmul.bf16.gmra.mxu0 %v4233_v28 }
 0x1bc   : > { %2030 = vmatmul.bf16.gmra.mxu2 %v4234_v63  ;;  %2119 = vmatmul.bf16.gmra.mxu3 %v4235_v8  ;;  %v3969_v42 = vadd.f32 %v1697_v59, %v1609_v11  ;;  %v4240_v59 = vld [vmem:[#allocation24_spill] sm:$0xff]  ;;  %v4242_v11 = vld [vmem:[#allocation23_spill] sm:$0xff] }
 0x1be   : > { %4236 = vst [vmem:[#allocation7_spill] sm:$0xff] %v3969_v42 }
 0x1bf   : > { %v1378_v62 = vpop.f32.mrf.mxu2  ;;  %v1611_v32 = vpop.f32.mrf.mxu3 }
 0x1c0   : > { %v1379_v55 = vadd.f32 %v1378_v62, %v1290_v48  ;;  %v1291_v31 = vpop.f32.mrf.mxu1  ;;  %v1702_v54 = vpop.f32.mrf.mxu0 }
 0x1c1   : > { %v1292_v10 = vadd.f32 %v1291_v31, %v4239_v16 }
 0x1c2   : > { %v1612_v27 = vadd.f32 %v1611_v32, %v1379_v55 }
 0x1c4   : > { %v3972_v50 = vadd.f32 %v1700_v37, %v1612_v27  ;;  %v4243_v37 = vld [vmem:[#allocation20_spill] sm:$0xff] }
 0x1c6   : > { %4238 = vst [vmem:[#allocation19_spill] sm:$0xff] %v3972_v50 }
 0x1c7   : > { %v1380_v7 = vpop.f32.mrf.mxu2  ;;  %v1613_v9 = vpop.f32.mrf.mxu3 }
 0x1c8   : > { %v1381_v51 = vadd.f32 %v1380_v7, %v1292_v10  ;;  %v1294_v63 = vpop.f32.mrf.mxu1  ;;  %v1705_v17 = vpop.f32.mrf.mxu0 }
 0x1c9   : > { %v1295_v48 = vadd.f32 %v1294_v63, %v4243_v37 }
 0x1ca   : > { %v1614_v8 = vadd.f32 %v1613_v9, %v1381_v51  ;;  %v4244_v51 = vld [vmem:[#allocation22_spill] sm:$0xff] }
 0x1cb   : > { %1753 = vmatmul.bf16.gmra.mxu1 %v4226_v52  ;;  %2213 = vmatmul.bf16.gmra.mxu0 %v4240_v59 }
 0x1cc   : > { %2035 = vmatmul.bf16.gmra.mxu2 %v4241_v47  ;;  %2124 = vmatmul.bf16.gmra.mxu3 %v4242_v11  ;;  %v3979_v5 = vadd.f32 %v1702_v54, %v1614_v8  ;;  %v4245_v54 = vld [vmem:[#allocation29_spill] sm:$0xff] }
 0x1cf   : > { %v1383_v62 = vpop.f32.mrf.mxu2  ;;  %v1616_v32 = vpop.f32.mrf.mxu3 }
 0x1d0   : > { %v1384_v55 = vadd.f32 %v1383_v62, %v1295_v48  ;;  %v1296_v31 = vpop.f32.mrf.mxu1  ;;  %v1707_v27 = vpop.f32.mrf.mxu0 }
 0x1d1   : > { %v1297_v52 = vadd.f32 %v1296_v31, %v4244_v51 }
 0x1d2   : > { %v1617_v16 = vadd.f32 %v1616_v32, %v1384_v55 }
 0x1d4   : > { %v3982_v10 = vadd.f32 %v1705_v17, %v1617_v16  ;;  %v4246_v17 = vld [vmem:[#allocation26_spill] sm:$0xff] }
 0x1d7   : > { %v1385_v7 = vpop.f32.mrf.mxu2  ;;  %v1618_v9 = vpop.f32.mrf.mxu3 }
 0x1d8   : > { %v1386_v50 = vadd.f32 %v1385_v7, %v1297_v52  ;;  %v1299_v47 = vpop.f32.mrf.mxu1  ;;  %v1710_v42 = vpop.f32.mrf.mxu0 }
 0x1d9   : > { %v1300_v8 = vadd.f32 %v1299_v47, %v4246_v17 }
 0x1da   : > { %v1619_v11 = vadd.f32 %v1618_v9, %v1386_v50  ;;  %v4247_v50 = vld [vmem:[#allocation28_spill] sm:$0xff] }
 0x1db   : > { %1758 = vmatmul.bf16.gmra.mxu1 %v4233_v28  ;;  %2218 = vmatmul.bf16.gmra.mxu0 %v4245_v54 }
 0x1dc   : > { %2040 = vmatmul.bf16.gmra.mxu2 %v3216_v20  ;;  %2129 = vmatmul.bf16.gmra.mxu3 %v3712_v45  ;;  %v3989_v63 = vadd.f32 %v1707_v27, %v1619_v11  ;;  %v4248_v27 = vld [vmem:[#allocation31_spill] sm:$0xff] }
 0x1df   : > { %v1388_v37 = vpop.f32.mrf.mxu2  ;;  %v1621_v48 = vpop.f32.mrf.mxu3 }
 0x1e0   : > { %v1389_v62 = vadd.f32 %v1388_v37, %v1300_v8  ;;  %v1301_v32 = vpop.f32.mrf.mxu1  ;;  %v1712_v55 = vpop.f32.mrf.mxu0 }
 0x1e1   : > { %v1302_v28 = vadd.f32 %v1301_v32, %v4247_v50 }
 0x1e2   : > { %v1622_v31 = vadd.f32 %v1621_v48, %v1389_v62  ;;  %v4249_v48 = vld [vmem:[#allocation30_spill] sm:$0xff] }
 0x1e4   : > { %v3992_v16 = vadd.f32 %v1710_v42, %v1622_v31 }
 0x1e7   : > { %v1390_v51 = vpop.f32.mrf.mxu2  ;;  %v1623_v52 = vpop.f32.mrf.mxu3 }
 0x1e8   : > { %v1391_v7 = vadd.f32 %v1390_v51, %v1302_v28  ;;  %v1724_v20 = vpop.f32.mrf.mxu1  ;;  %v2184_v9 = vpop.f32.mrf.mxu0 }
 0x1e9   : > { %v1725_v62 = vadd.f32 %v1724_v20, %v4249_v48 }
 0x1ea   : > { %v1624_v45 = vadd.f32 %v1623_v52, %v1391_v7  ;;  %v4250_v52 = vld [vmem:[#allocation32_spill] sm:$0xff] }
 0x1eb   : > { %1763 = vmatmul.bf16.gmra.mxu1 %v4240_v59  ;;  %2223 = vmatmul.bf16.gmra.mxu0 %v4248_v27  ;;  %v4005_v59 = vld [vmem:[%s4150_s2] ss:$0 sm:$0xff] }
 0x1ec   : > { %2045 = vmatmul.bf16.gmra.mxu2 %v3320_v29  ;;  %2134 = vmatmul.bf16.gmra.mxu3 %v3744_v18  ;;  %v3999_v47 = vadd.f32 %v1712_v55, %v1624_v45 }
 0x1ef   : > { %v2006_v42 = vpop.f32.mrf.mxu2  ;;  %v2095_v11 = vpop.f32.mrf.mxu3 }
 0x1f0   : > { %v2096_v17 = vadd.f32 %v2095_v11, %v2006_v42  ;;  %v1726_v8 = vpop.f32.mrf.mxu1  ;;  %v2186_v37 = vpop.f32.mrf.mxu0 }
 0x1f1   : > { %v1727_v7 = vadd.f32 %v1726_v8, %v4250_v52 }
 0x1f2   : > { %v2185_v32 = vadd.f32 %v2184_v9, %v2096_v17 }
 0x1f4   : > { %v2264_v31 = vadd.f32 %v2185_v32, %v1725_v62 }
 0x1f6   : > { %v2300_v29 = vadd.f32 %v4005_v59, %v2264_v31 }
 0x1f7   : > { %v2008_v18 = vpop.f32.mrf.mxu2  ;;  %v2097_v55 = vpop.f32.mrf.mxu3 }
 0x1f8   : > { %2332 = vst [vmem:[%s4012_s17] sm:$0xff] %v2300_v29  ;;  %v2098_v50 = vadd.f32 %v2097_v55, %v2008_v18  ;;  %v1729_v28 = vpop.f32.mrf.mxu1  ;;  %v2189_v51 = vpop.f32.mrf.mxu0  ;;  %v2402_v17 = vmul.f32 %v2300_v29, %v2300_v29 }
 0x1f9   : > { %v1730_v31 = vadd.f32 %v1729_v28, %v3762_v4 }
 0x1fa   : > { %v2187_v20 = vadd.f32 %v2186_v37, %v2098_v50 }
 0x1fb   : > { %1768 = vmatmul.bf16.gmra.mxu1 %v4245_v54  ;;  %2228 = vmatmul.bf16.gmra.mxu0 %v3770_v53 }
 0x1fc   : > { %v2265_v9 = vadd.f32 %v2187_v20, %v1727_v7  ;;  %2050 = vmatmul.bf16.gmra.mxu2 %v3412_v43  ;;  %2139 = vmatmul.bf16.gmra.mxu3 %v3766_v14 }
 0x1fe   : > { %v2301_v45 = vadd.f32 %v4005_v59, %v2265_v9 }
 0x1ff   : > { %v2011_v42 = vpop.f32.mrf.mxu2  ;;  %v2100_v11 = vpop.f32.mrf.mxu3 }
 0x200   : > { %2333 = vst [vmem:[%s4012_s17 + $0x8] sm:$0xff] %v2301_v45  ;;  %v2364_v48 = vadd.f32 %v2301_v45, %v2300_v29  ;;  %v2403_v62 = vmul.f32 %v2301_v45, %v2301_v45  ;;  %v2101_v8 = vadd.f32 %v2100_v11, %v2011_v42  ;;  %v1731_v37 = vpop.f32.mrf.mxu1  ;;  %v2191_v32 = vpop.f32.mrf.mxu0 }
 0x201   : > { %v1732_v42 = vadd.f32 %v1731_v37, %v3783_v56 }
 0x202   : > { %v2434_v54 = vadd.f32 %v2403_v62, %v2402_v17  ;;  %v2190_v18 = vadd.f32 %v2189_v51, %v2101_v8 }
 0x204   : > { %v2266_v55 = vadd.f32 %v2190_v18, %v1730_v31 }
 0x206   : > { %v2302_v43 = vadd.f32 %v4005_v59, %v2266_v55 }
 0x207   : > { %v2013_v14 = vpop.f32.mrf.mxu2  ;;  %v2102_v50 = vpop.f32.mrf.mxu3 }
 0x208   : > { %2334 = vst [vmem:[%s4012_s17 + $0x10] sm:$0xff] %v2302_v43  ;;  %v2365_v52 = vadd.f32 %v2364_v48, %v2302_v43  ;;  %v2404_v7 = vmul.f32 %v2302_v43, %v2302_v43  ;;  %v2103_v20 = vadd.f32 %v2102_v50, %v2013_v14  ;;  %v1734_v9 = vpop.f32.mrf.mxu1  ;;  %v2194_v29 = vpop.f32.mrf.mxu0 }
 0x20a   : > { %v2435_v45 = vadd.f32 %v2434_v54, %v2404_v7  ;;  %v2192_v11 = vadd.f32 %v2191_v32, %v2103_v20 }
 0x20b   : > { %1773 = vmatmul.bf16.gmra.mxu1 %v4248_v27  ;;  %2233 = vmatmul.bf16.gmra.mxu0 %v3804_v12  ;;  %v4251_v27 = vld [vmem:[#allocation33_spill] sm:$0xff] }
 0x20c   : > { %v2267_v4 = vadd.f32 %v2192_v11, %v1732_v42  ;;  %2055 = vmatmul.bf16.gmra.mxu2 %v3456_v22  ;;  %2144 = vmatmul.bf16.gmra.mxu3 %v3800_v26  ;;  %v1735_v54 = vadd.f32 %v1734_v9, %v4251_v27  ;;  %v4252_v42 = vld [vmem:[#allocation34_spill] sm:$0xff] }
 0x20e   : > { %v2303_v28 = vadd.f32 %v4005_v59, %v2267_v4 }
 0x20f   : > { %v2016_v51 = vpop.f32.mrf.mxu2  ;;  %v2105_v17 = vpop.f32.mrf.mxu3 }
 0x210   : > { %2335 = vst [vmem:[%s4012_s17 + $0x18] sm:$0xff] %v2303_v28  ;;  %v2366_v48 = vadd.f32 %v2365_v52, %v2303_v28  ;;  %v2405_v62 = vmul.f32 %v2303_v28, %v2303_v28  ;;  %v2106_v8 = vadd.f32 %v2105_v17, %v2016_v51  ;;  %v1736_v56 = vpop.f32.mrf.mxu1  ;;  %v2196_v37 = vpop.f32.mrf.mxu0 }
 0x211   : > { %v1737_v11 = vadd.f32 %v1736_v56, %v4252_v42 }
 0x212   : > { %v2436_v32 = vadd.f32 %v2435_v45, %v2405_v62  ;;  %v2195_v31 = vadd.f32 %v2194_v29, %v2106_v8 }
 0x214   : > { %v2268_v18 = vadd.f32 %v2195_v31, %v1735_v54 }
 0x216   : > { %v2304_v22 = vadd.f32 %v4005_v59, %v2268_v18 }
 0x217   : > { %v2018_v55 = vpop.f32.mrf.mxu2  ;;  %v2107_v26 = vpop.f32.mrf.mxu3 }
 0x218   : > { %2336 = vst [vmem:[%s4012_s17 + $0x20] sm:$0xff] %v2304_v22  ;;  %v2367_v43 = vadd.f32 %v2366_v48, %v2304_v22  ;;  %v2406_v14 = vmul.f32 %v2304_v22, %v2304_v22  ;;  %v2108_v50 = vadd.f32 %v2107_v26, %v2018_v55  ;;  %v1739_v7 = vpop.f32.mrf.mxu1  ;;  %v2199_v52 = vpop.f32.mrf.mxu0 }
 0x21a   : > { %v2437_v20 = vadd.f32 %v2436_v32, %v2406_v14  ;;  %v2197_v4 = vadd.f32 %v2196_v37, %v2108_v50 }
 0x21b   : > { %1778 = vmatmul.bf16.gmra.mxu1 %v3770_v53  ;;  %2238 = vmatmul.bf16.gmra.mxu0 %v3825_v60  ;;  %v1740_v53 = vadd.f32 %v1739_v7, %v3818_v15 }
 0x21c   : > { %v2269_v9 = vadd.f32 %v2197_v4, %v1737_v11  ;;  %2060 = vmatmul.bf16.gmra.mxu2 %v3220_v21  ;;  %2149 = vmatmul.bf16.gmra.mxu3 %v3822_v61 }
 0x21e   : > { %v2305_v29 = vadd.f32 %v4005_v59, %v2269_v9 }
 0x21f   : > { %v2021_v45 = vpop.f32.mrf.mxu2  ;;  %v2110_v28 = vpop.f32.mrf.mxu3 }
 0x220   : > { %2337 = vst [vmem:[%s4012_s17 + $0x28] sm:$0xff] %v2305_v29  ;;  %v2368_v51 = vadd.f32 %v2367_v43, %v2305_v29  ;;  %v2407_v17 = vmul.f32 %v2305_v29, %v2305_v29  ;;  %v2111_v48 = vadd.f32 %v2110_v28, %v2021_v45  ;;  %v1741_v62 = vpop.f32.mrf.mxu1  ;;  %v2201_v8 = vpop.f32.mrf.mxu0 }
 0x221   : > { %v1742_v43 = vadd.f32 %v1741_v62, %v3838_v1 }
 0x222   : > { %v2438_v56 = vadd.f32 %v2437_v20, %v2407_v17  ;;  %v2200_v37 = vadd.f32 %v2199_v52, %v2111_v48 }
 0x224   : > { %v2270_v32 = vadd.f32 %v2200_v37, %v1740_v53  ;;  %v4254_v37 = vld [vmem:[#allocation36_spill] sm:$0xff] }
 0x226   : > { %v2306_v21 = vadd.f32 %v4005_v59, %v2270_v32 }
 0x227   : > { %v2023_v27 = vpop.f32.mrf.mxu2  ;;  %v2112_v61 = vpop.f32.mrf.mxu3 }
 0x228   : > { %2338 = vst [vmem:[%s4012_s17 + $0x30] sm:$0xff] %v2306_v21  ;;  %v2369_v54 = vadd.f32 %v2368_v51, %v2306_v21  ;;  %v2408_v31 = vmul.f32 %v2306_v21, %v2306_v21  ;;  %v2113_v18 = vadd.f32 %v2112_v61, %v2023_v27  ;;  %v1744_v22 = vpop.f32.mrf.mxu1  ;;  %v2204_v55 = vpop.f32.mrf.mxu0 }
 0x22a   : > { %v2439_v26 = vadd.f32 %v2438_v56, %v2408_v31  ;;  %v2202_v14 = vadd.f32 %v2201_v8, %v2113_v18 }
 0x22b   : > { %1783 = vmatmul.bf16.gmra.mxu1 %v3804_v12  ;;  %2243 = vmatmul.bf16.gmra.mxu0 %v3859_v2  ;;  %v4253_v12 = vld [vmem:[#allocation35_spill] sm:$0xff] }
 0x22c   : > { %v2271_v15 = vadd.f32 %v2202_v14, %v1742_v43  ;;  %2065 = vmatmul.bf16.gmra.mxu2 %v3324_v30  ;;  %2154 = vmatmul.bf16.gmra.mxu3 %v3856_v0  ;;  %v1745_v29 = vadd.f32 %v1744_v22, %v4253_v12 }
 0x22e   : > { %v2307_v50 = vadd.f32 %v4005_v59, %v2271_v15 }
 0x22f   : > { %v2026_v7 = vpop.f32.mrf.mxu2  ;;  %v2115_v52 = vpop.f32.mrf.mxu3 }
 0x230   : > { %2339 = vst [vmem:[%s4012_s17 + $0x38] sm:$0xff] %v2307_v50  ;;  %v2370_v20 = vadd.f32 %v2369_v54, %v2307_v50  ;;  %v2409_v42 = vmul.f32 %v2307_v50, %v2307_v50  ;;  %v2116_v11 = vadd.f32 %v2115_v52, %v2026_v7  ;;  %v1746_v1 = vpop.f32.mrf.mxu1  ;;  %v2206_v4 = vpop.f32.mrf.mxu0 }
 0x231   : > { %v1747_v32 = vadd.f32 %v1746_v1, %v4254_v37 }
 0x232   : > { %v2440_v9 = vadd.f32 %v2439_v26, %v2409_v42  ;;  %v2205_v45 = vadd.f32 %v2204_v55, %v2116_v11 }
 0x234   : > { %v2272_v28 = vadd.f32 %v2205_v45, %v1745_v29 }
 0x236   : > { %v2308_v30 = vadd.f32 %v4005_v59, %v2272_v28 }
 0x237   : > { %v2028_v51 = vpop.f32.mrf.mxu2  ;;  %v2117_v0 = vpop.f32.mrf.mxu3 }
 0x238   : > { %2340 = vst [vmem:[%s4012_s17 + $0x40] sm:$0xff] %v2308_v30  ;;  %v2371_v17 = vadd.f32 %v2370_v20, %v2308_v30  ;;  %v2410_v48 = vmul.f32 %v2308_v30, %v2308_v30  ;;  %v2118_v62 = vadd.f32 %v2117_v0, %v2028_v51  ;;  %v1749_v8 = vpop.f32.mrf.mxu1  ;;  %v2209_v56 = vpop.f32.mrf.mxu0 }
 0x23a   : > { %v2441_v53 = vadd.f32 %v2440_v9, %v2410_v48  ;;  %v2207_v21 = vadd.f32 %v2206_v4, %v2118_v62 }
 0x23b   : > { %1788 = vmatmul.bf16.gmra.mxu1 %v3825_v60  ;;  %2248 = vmatmul.bf16.gmra.mxu0 %v3881_v41  ;;  %v1750_v60 = vadd.f32 %v1749_v8, %v3873_v3 }
 0x23c   : > { %v2273_v27 = vadd.f32 %v2207_v21, %v1747_v32  ;;  %2070 = vmatmul.bf16.gmra.mxu2 %v3416_v44  ;;  %2159 = vmatmul.bf16.gmra.mxu3 %v3878_v35 }
 0x23e   : > { %v2309_v61 = vadd.f32 %v4005_v59, %v2273_v27 }
 0x23f   : > { %v2031_v54 = vpop.f32.mrf.mxu2  ;;  %v2120_v31 = vpop.f32.mrf.mxu3 }
 0x240   : > { %2341 = vst [vmem:[%s4012_s17 + $0x48] sm:$0xff] %v2309_v61  ;;  %v2372_v18 = vadd.f32 %v2371_v17, %v2309_v61  ;;  %v2411_v22 = vmul.f32 %v2309_v61, %v2309_v61  ;;  %v2121_v55 = vadd.f32 %v2120_v31, %v2031_v54  ;;  %v1751_v26 = vpop.f32.mrf.mxu1  ;;  %v2211_v43 = vpop.f32.mrf.mxu0  ;;  %v4255_v31 = vmov 0  }
 0x241   : > { %v1752_v9 = vadd.f32 %v1751_v26, %v3888_v19 }
 0x242   : > { %v2442_v14 = vadd.f32 %v2441_v53, %v2411_v22  ;;  %v2210_v15 = vadd.f32 %v2209_v56, %v2121_v55 }
 0x244   : > { %v2274_v50 = vadd.f32 %v2210_v15, %v1750_v60 }
 0x246   : > { %v2310_v44 = vadd.f32 %v4005_v59, %v2274_v50 }
 0x247   : > { %v2033_v7 = vpop.f32.mrf.mxu2  ;;  %v2122_v35 = vpop.f32.mrf.mxu3 }
 0x248   : > { %2342 = vst [vmem:[%s4012_s17 + $0x50] sm:$0xff] %v2310_v44  ;;  %v2373_v52 = vadd.f32 %v2372_v18, %v2310_v44  ;;  %v2412_v20 = vmul.f32 %v2310_v44, %v2310_v44  ;;  %v2123_v42 = vadd.f32 %v2122_v35, %v2033_v7  ;;  %v1754_v11 = vpop.f32.mrf.mxu1  ;;  %v2214_v1 = vpop.f32.mrf.mxu0 }
 0x24a   : > { %v2443_v4 = vadd.f32 %v2442_v14, %v2412_v20  ;;  %v2212_v12 = vadd.f32 %v2211_v43, %v2123_v42 }
 0x24b   : > { %1793 = vmatmul.bf16.gmra.mxu1 %v3859_v2  ;;  %2253 = vmatmul.bf16.gmra.mxu0 %v3903_v33  ;;  %v1755_v2 = vadd.f32 %v1754_v11, %v3895_v24 }
 0x24c   : > { %v2275_v3 = vadd.f32 %v2212_v12, %v1752_v9  ;;  %2075 = vmatmul.bf16.gmra.mxu2 %v3460_v23  ;;  %2164 = vmatmul.bf16.gmra.mxu3 %v3900_v58 }
 0x24e   : > { %v2311_v29 = vadd.f32 %v4005_v59, %v2275_v3 }
 0x24f   : > { %v2036_v45 = vpop.f32.mrf.mxu2  ;;  %v2125_v28 = vpop.f32.mrf.mxu3 }
 0x250   : > { %2343 = vst [vmem:[%s4012_s17 + $0x58] sm:$0xff] %v2311_v29  ;;  %v2374_v30 = vadd.f32 %v2373_v52, %v2311_v29  ;;  %v2413_v51 = vmul.f32 %v2311_v29, %v2311_v29  ;;  %v2126_v0 = vadd.f32 %v2125_v28, %v2036_v45  ;;  %v1756_v19 = vpop.f32.mrf.mxu1  ;;  %v2216_v17 = vpop.f32.mrf.mxu0 }
 0x251   : > { %v1757_v61 = vadd.f32 %v1756_v19, %v3909_v49 }
 0x252   : > { %v2444_v48 = vadd.f32 %v2443_v4, %v2413_v51  ;;  %v2215_v33 = vadd.f32 %v2214_v1, %v2126_v0 }
 0x254   : > { %v2276_v62 = vadd.f32 %v2215_v33, %v1755_v2 }
 0x256   : > { %v2312_v23 = vadd.f32 %v4005_v59, %v2276_v62 }
 0x257   : > { %v2038_v8 = vpop.f32.mrf.mxu2  ;;  %v2127_v58 = vpop.f32.mrf.mxu3 }
 0x258   : > { %2344 = vst [vmem:[%s4012_s17 + $0x60] sm:$0xff] %v2312_v23  ;;  %v2375_v56 = vadd.f32 %v2374_v30, %v2312_v23  ;;  %v2414_v53 = vmul.f32 %v2312_v23, %v2312_v23  ;;  %v2128_v37 = vadd.f32 %v2127_v58, %v2038_v8  ;;  %v1759_v32 = vpop.f32.mrf.mxu1  ;;  %v2219_v21 = vpop.f32.mrf.mxu0 }
 0x25a   : > { %v2445_v27 = vadd.f32 %v2444_v48, %v2414_v53  ;;  %v2217_v54 = vadd.f32 %v2216_v17, %v2128_v37 }
 0x25b   : > { %1798 = vmatmul.bf16.gmra.mxu1 %v3881_v41  ;;  %2258 = vmatmul.bf16.gmra.mxu0 %v3473_v38  ;;  %v1760_v41 = vadd.f32 %v1759_v32, %v3912_v57 }
 0x25c   : > { %v2277_v24 = vadd.f32 %v2217_v54, %v1757_v61  ;;  %2080 = vmatmul.bf16.gmra.mxu2 %v4255_v31  ;;  %2169 = vmatmul.bf16.gmra.mxu3 %v3473_v38 }
 0x25e   : > { %v2313_v18 = vadd.f32 %v4005_v59, %v2277_v24 }
 0x25f   : > { %v2041_v22 = vpop.f32.mrf.mxu2  ;;  %v2130_v55 = vpop.f32.mrf.mxu3 }
 0x260   : > { %2345 = vst [vmem:[%s4012_s17 + $0x68] sm:$0xff] %v2313_v18  ;;  %v2376_v26 = vadd.f32 %v2375_v56, %v2313_v18  ;;  %v2415_v43 = vmul.f32 %v2313_v18, %v2313_v18  ;;  %v2131_v14 = vadd.f32 %v2130_v55, %v2041_v22  ;;  %v1761_v49 = vpop.f32.mrf.mxu1  ;;  %v2221_v60 = vpop.f32.mrf.mxu0 }
 0x261   : > { %v1762_v9 = vadd.f32 %v1761_v49, %v3919_v25 }
 0x262   : > { %v2446_v15 = vadd.f32 %v2445_v27, %v2415_v43  ;;  %v2220_v50 = vadd.f32 %v2219_v21, %v2131_v14 }
 0x264   : > { %v2278_v44 = vadd.f32 %v2220_v50, %v1760_v41 }
 0x266   : > { %v2314_v7 = vadd.f32 %v4005_v59, %v2278_v44 }
 0x267   : > { %v2043_v38 = vpop.f32.mrf.mxu2  ;;  %v2132_v35 = vpop.f32.mrf.mxu3 }
 0x268   : > { %2346 = vst [vmem:[%s4012_s17 + $0x70] sm:$0xff] %v2314_v7  ;;  %v2377_v52 = vadd.f32 %v2376_v26, %v2314_v7  ;;  %v2416_v20 = vmul.f32 %v2314_v7, %v2314_v7  ;;  %v2133_v42 = vadd.f32 %v2132_v35, %v2043_v38  ;;  %v1764_v11 = vpop.f32.mrf.mxu1  ;;  %v2224_v1 = vpop.f32.mrf.mxu0 }
 0x269   : > { %v1765_v48 = vadd.f32 %v1764_v11, %v3922_v46 }
 0x26a   : > { %v2447_v4 = vadd.f32 %v2446_v15, %v2416_v20  ;;  %v2222_v12 = vadd.f32 %v2221_v60, %v2133_v42 }
 0x26c   : > { %v2279_v3 = vadd.f32 %v2222_v12, %v1762_v9 }
 0x26e   : > { %v2315_v57 = vadd.f32 %v4005_v59, %v2279_v3 }
 0x26f   : > { %v2046_v29 = vpop.f32.mrf.mxu2  ;;  %v2135_v45 = vpop.f32.mrf.mxu3 }
 0x270   : > { %2347 = vst [vmem:[%s4012_s17 + $0x78] sm:$0xff] %v2315_v57  ;;  %v2378_v28 = vadd.f32 %v2377_v52, %v2315_v57  ;;  %v2417_v30 = vmul.f32 %v2315_v57, %v2315_v57  ;;  %v2136_v51 = vadd.f32 %v2135_v45, %v2046_v29  ;;  %v1766_v0 = vpop.f32.mrf.mxu1  ;;  %v2226_v19 = vpop.f32.mrf.mxu0 }
 0x271   : > { %v1767_v21 = vadd.f32 %v1766_v0, %v3929_v34 }
 0x272   : > { %v2448_v17 = vadd.f32 %v2447_v4, %v2417_v30  ;;  %v2225_v2 = vadd.f32 %v2224_v1, %v2136_v51 }
 0x274   : > { %v2280_v33 = vadd.f32 %v2225_v2, %v1765_v48 }
 0x276   : > { %v2316_v25 = vadd.f32 %v4005_v59, %v2280_v33 }
 0x277   : > { %v2048_v62 = vpop.f32.mrf.mxu2  ;;  %v2137_v23 = vpop.f32.mrf.mxu3 }
 0x278   : > { %2348 = vst [vmem:[%s4012_s17 + $0x80] sm:$0xff] %v2316_v25  ;;  %v2379_v8 = vadd.f32 %v2378_v28, %v2316_v25  ;;  %v2418_v58 = vmul.f32 %v2316_v25, %v2316_v25  ;;  %v2138_v56 = vadd.f32 %v2137_v23, %v2048_v62  ;;  %v1769_v53 = vpop.f32.mrf.mxu1  ;;  %v2229_v37 = vpop.f32.mrf.mxu0 }
 0x279   : > { %v1770_v14 = vadd.f32 %v1769_v53, %v3932_v6 }
 0x27a   : > { %v2449_v32 = vadd.f32 %v2448_v17, %v2418_v58  ;;  %v2227_v27 = vadd.f32 %v2226_v19, %v2138_v56 }
 0x27c   : > { %v2281_v61 = vadd.f32 %v2227_v27, %v1767_v21 }
 0x27e   : > { %v2317_v46 = vadd.f32 %v4005_v59, %v2281_v61 }
 0x27f   : > { %v2051_v54 = vpop.f32.mrf.mxu2  ;;  %v2140_v24 = vpop.f32.mrf.mxu3 }
 0x280   : > { %2349 = vst [vmem:[%s4012_s17 + $0x88] sm:$0xff] %v2317_v46  ;;  %v2380_v31 = vadd.f32 %v2379_v8, %v2317_v46  ;;  %v2419_v18 = vmul.f32 %v2317_v46, %v2317_v46  ;;  %v2141_v22 = vadd.f32 %v2140_v24, %v2051_v54  ;;  %v1771_v55 = vpop.f32.mrf.mxu1  ;;  %v2231_v26 = vpop.f32.mrf.mxu0 }
 0x281   : > { %v1772_v20 = vadd.f32 %v1771_v55, %v3939_v40 }
 0x282   : > { %v2450_v43 = vadd.f32 %v2449_v32, %v2419_v18  ;;  %v2230_v49 = vadd.f32 %v2229_v37, %v2141_v22 }
 0x284   : > { %v2282_v60 = vadd.f32 %v2230_v49, %v1770_v14 }
 0x286   : > { %v2318_v34 = vadd.f32 %v4005_v59, %v2282_v60 }
 0x287   : > { %v2053_v15 = vpop.f32.mrf.mxu2  ;;  %v2142_v41 = vpop.f32.mrf.mxu3 }
 0x288   : > { %2350 = vst [vmem:[%s4012_s17 + $0x90] sm:$0xff] %v2318_v34  ;;  %v2381_v50 = vadd.f32 %v2380_v31, %v2318_v34  ;;  %v2420_v44 = vmul.f32 %v2318_v34, %v2318_v34  ;;  %v2143_v7 = vadd.f32 %v2142_v41, %v2053_v15  ;;  %v1774_v38 = vpop.f32.mrf.mxu1  ;;  %v2234_v35 = vpop.f32.mrf.mxu0  ;;  %v4256_v34 = vld [vmem:[#allocation8_spill] sm:$0xff] }
 0x289   : > { %v1775_v28 = vadd.f32 %v1774_v38, %v3942_v13 }
 0x28a   : > { %v2451_v52 = vadd.f32 %v2450_v43, %v2420_v44  ;;  %v2232_v42 = vadd.f32 %v2231_v26, %v2143_v7 }
 0x28c   : > { %v2283_v11 = vadd.f32 %v2232_v42, %v1772_v20 }
 0x28e   : > { %v2319_v6 = vadd.f32 %v4005_v59, %v2283_v11 }
 0x28f   : > { %v2056_v1 = vpop.f32.mrf.mxu2  ;;  %v2145_v4 = vpop.f32.mrf.mxu3 }
 0x290   : > { %2351 = vst [vmem:[%s4012_s17 + $0x98] sm:$0xff] %v2319_v6  ;;  %v2382_v9 = vadd.f32 %v2381_v50, %v2319_v6  ;;  %v2421_v12 = vmul.f32 %v2319_v6, %v2319_v6  ;;  %v2146_v3 = vadd.f32 %v2145_v4, %v2056_v1  ;;  %v1776_v57 = vpop.f32.mrf.mxu1  ;;  %v2236_v29 = vpop.f32.mrf.mxu0  ;;  %v4257_v6 = vld [vmem:[#allocation5_spill] sm:$0xff] }
 0x291   : > { %v1777_v23 = vadd.f32 %v1776_v57, %v3949_v39 }
 0x292   : > { %v2452_v45 = vadd.f32 %v2451_v52, %v2421_v12  ;;  %v2235_v30 = vadd.f32 %v2234_v35, %v2146_v3 }
 0x294   : > { %v2284_v51 = vadd.f32 %v2235_v30, %v1775_v28 }
 0x296   : > { %v2320_v40 = vadd.f32 %v4005_v59, %v2284_v51 }
 0x297   : > { %v2058_v0 = vpop.f32.mrf.mxu2  ;;  %v2147_v19 = vpop.f32.mrf.mxu3 }
 0x298   : > { %2352 = vst [vmem:[%s4012_s17 + $0xa0] sm:$0xff] %v2320_v40  ;;  %v2383_v17 = vadd.f32 %v2382_v9, %v2320_v40  ;;  %v2422_v48 = vmul.f32 %v2320_v40, %v2320_v40  ;;  %v2148_v2 = vadd.f32 %v2147_v19, %v2058_v0  ;;  %v1779_v33 = vpop.f32.mrf.mxu1  ;;  %v2239_v25 = vpop.f32.mrf.mxu0  ;;  %v4258_v0 = vld [vmem:[#allocation7_spill] sm:$0xff] }
 0x299   : > { %v1780_v54 = vadd.f32 %v1779_v33, %v3952_v36 }
 0x29a   : > { %v2453_v62 = vadd.f32 %v2452_v45, %v2422_v48  ;;  %v2237_v8 = vadd.f32 %v2236_v29, %v2148_v2 }
 0x29c   : > { %v2285_v58 = vadd.f32 %v2237_v8, %v1777_v23 }
 0x29e   : > { %v2321_v13 = vadd.f32 %v4005_v59, %v2285_v58 }
 0x29f   : > { %v2061_v56 = vpop.f32.mrf.mxu2  ;;  %v2150_v53 = vpop.f32.mrf.mxu3 }
 0x2a0   : > { %2353 = vst [vmem:[%s4012_s17 + $0xa8] sm:$0xff] %v2321_v13  ;;  %v2384_v37 = vadd.f32 %v2383_v17, %v2321_v13  ;;  %v2423_v32 = vmul.f32 %v2321_v13, %v2321_v13  ;;  %v2151_v21 = vadd.f32 %v2150_v53, %v2061_v56  ;;  %v1781_v27 = vpop.f32.mrf.mxu1  ;;  %v2241_v61 = vpop.f32.mrf.mxu0  ;;  %v4259_v53 = vld [vmem:[#allocation19_spill] sm:$0xff] }
 0x2a1   : > { %v1782_v15 = vadd.f32 %v1781_v27, %v4256_v34 }
 0x2a2   : > { %v2454_v46 = vadd.f32 %v2453_v62, %v2423_v32  ;;  %v2240_v24 = vadd.f32 %v2239_v25, %v2151_v21 }
 0x2a4   : > { %v2286_v31 = vadd.f32 %v2240_v24, %v1780_v54 }
 0x2a6   : > { %v2322_v39 = vadd.f32 %v4005_v59, %v2286_v31 }
 0x2a7   : > { %v2063_v18 = vpop.f32.mrf.mxu2  ;;  %v2152_v22 = vpop.f32.mrf.mxu3 }
 0x2a8   : > { %2354 = vst [vmem:[%s4012_s17 + $0xb0] sm:$0xff] %v2322_v39  ;;  %v2385_v55 = vadd.f32 %v2384_v37, %v2322_v39  ;;  %v2424_v26 = vmul.f32 %v2322_v39, %v2322_v39  ;;  %v2153_v43 = vadd.f32 %v2152_v22, %v2063_v18  ;;  %v1784_v14 = vpop.f32.mrf.mxu1  ;;  %v2244_v49 = vpop.f32.mrf.mxu0 }
 0x2a9   : > { %v1785_v1 = vadd.f32 %v1784_v14, %v4257_v6 }
 0x2aa   : > { %v2455_v60 = vadd.f32 %v2454_v46, %v2424_v26  ;;  %v2242_v41 = vadd.f32 %v2241_v61, %v2153_v43 }
 0x2ac   : > { %v2287_v50 = vadd.f32 %v2242_v41, %v1782_v15 }
 0x2ae   : > { %v2323_v36 = vadd.f32 %v4005_v59, %v2287_v50 }
 0x2af   : > { %v2066_v44 = vpop.f32.mrf.mxu2  ;;  %v2155_v7 = vpop.f32.mrf.mxu3 }
 0x2b0   : > { %2355 = vst [vmem:[%s4012_s17 + $0xb8] sm:$0xff] %v2323_v36  ;;  %v2386_v38 = vadd.f32 %v2385_v55, %v2323_v36  ;;  %v2425_v35 = vmul.f32 %v2323_v36, %v2323_v36  ;;  %v2156_v52 = vadd.f32 %v2155_v7, %v2066_v44  ;;  %v1786_v20 = vpop.f32.mrf.mxu1  ;;  %v2246_v42 = vpop.f32.mrf.mxu0 }
 0x2b1   : > { %v1787_v19 = vadd.f32 %v1786_v20, %v4258_v0 }
 0x2b2   : > { %v2456_v11 = vadd.f32 %v2455_v60, %v2425_v35  ;;  %v2245_v4 = vadd.f32 %v2244_v49, %v2156_v52 }
 0x2b4   : > { %v2288_v9 = vadd.f32 %v2245_v4, %v1785_v1 }
 0x2b6   : > { %v2324_v12 = vadd.f32 %v4005_v59, %v2288_v9 }
 0x2b7   : > { %v2068_v3 = vpop.f32.mrf.mxu2  ;;  %v2157_v57 = vpop.f32.mrf.mxu3 }
 0x2b8   : > { %2356 = vst [vmem:[%s4012_s17 + $0xc0] sm:$0xff] %v2324_v12  ;;  %v2387_v29 = vadd.f32 %v2386_v38, %v2324_v12  ;;  %v2426_v45 = vmul.f32 %v2324_v12, %v2324_v12  ;;  %v2158_v28 = vadd.f32 %v2157_v57, %v2068_v3  ;;  %v1789_v30 = vpop.f32.mrf.mxu1  ;;  %v2249_v51 = vpop.f32.mrf.mxu0 }
 0x2b9   : > { %v1790_v37 = vadd.f32 %v1789_v30, %v4259_v53 }
 0x2ba   : > { %v2457_v40 = vadd.f32 %v2456_v11, %v2426_v45  ;;  %v2247_v17 = vadd.f32 %v2246_v42, %v2158_v28 }
 0x2bc   : > { %v2289_v48 = vadd.f32 %v2247_v17, %v1787_v19 }
 0x2be   : > { %v2325_v2 = vadd.f32 %v4005_v59, %v2289_v48 }
 0x2bf   : > { %v2071_v33 = vpop.f32.mrf.mxu2  ;;  %v2160_v25 = vpop.f32.mrf.mxu3 }
 0x2c0   : > { %2357 = vst [vmem:[%s4012_s17 + $0xc8] sm:$0xff] %v2325_v2  ;;  %v2388_v62 = vadd.f32 %v2387_v29, %v2325_v2  ;;  %v2427_v23 = vmul.f32 %v2325_v2, %v2325_v2  ;;  %v2161_v8 = vadd.f32 %v2160_v25, %v2071_v33  ;;  %v1791_v58 = vpop.f32.mrf.mxu1  ;;  %v2251_v13 = vpop.f32.mrf.mxu0 }
 0x2c1   : > { %v1792_v22 = vadd.f32 %v1791_v58, %v3979_v5 }
 0x2c2   : > { %v2458_v56 = vadd.f32 %v2457_v40, %v2427_v23  ;;  %v2250_v32 = vadd.f32 %v2249_v51, %v2161_v8 }
 0x2c4   : > { %v2290_v21 = vadd.f32 %v2250_v32, %v1790_v37 }
 0x2c6   : > { %v2326_v27 = vadd.f32 %v4005_v59, %v2290_v21 }
 0x2c7   : > { %v2073_v61 = vpop.f32.mrf.mxu2  ;;  %v2162_v46 = vpop.f32.mrf.mxu3 }
 0x2c8   : > { %2358 = vst [vmem:[%s4012_s17 + $0xd0] sm:$0xff] %v2326_v27  ;;  %v2389_v54 = vadd.f32 %v2388_v62, %v2326_v27  ;;  %v2428_v24 = vmul.f32 %v2326_v27, %v2326_v27  ;;  %v2163_v31 = vadd.f32 %v2162_v46, %v2073_v61  ;;  %v1794_v39 = vpop.f32.mrf.mxu1  ;;  %v2254_v26 = vpop.f32.mrf.mxu0 }
 0x2c9   : > { %v1795_v36 = vadd.f32 %v1794_v39, %v3982_v10 }
 0x2ca   : > { %v2459_v18 = vadd.f32 %v2458_v56, %v2428_v24  ;;  %v2252_v55 = vadd.f32 %v2251_v13, %v2163_v31 }
 0x2cc   : > { %v2291_v43 = vadd.f32 %v2252_v55, %v1792_v22 }
 0x2ce   : > { %v2327_v14 = vadd.f32 %v4005_v59, %v2291_v43 }
 0x2cf   : > { %v2076_v49 = vpop.f32.mrf.mxu2  ;;  %v2165_v60 = vpop.f32.mrf.mxu3 }
 0x2d0   : > { %2359 = vst [vmem:[%s4012_s17 + $0xd8] sm:$0xff] %v2327_v14  ;;  %v2390_v34 = vadd.f32 %v2389_v54, %v2327_v14  ;;  %v2429_v15 = vmul.f32 %v2327_v14, %v2327_v14  ;;  %v2166_v41 = vadd.f32 %v2165_v60, %v2076_v49  ;;  %v1796_v7 = vpop.f32.mrf.mxu1  ;;  %v2256_v35 = vpop.f32.mrf.mxu0 }
 0x2d1   : > { %v1797_v4 = vadd.f32 %v1796_v7, %v3989_v63 }
 0x2d2   : > { %v2460_v50 = vadd.f32 %v2459_v18, %v2429_v15  ;;  %v2255_v44 = vadd.f32 %v2254_v26, %v2166_v41 }
 0x2d4   : > { %v2292_v38 = vadd.f32 %v2255_v44, %v1795_v36 }
 0x2d6   : > { %v2328_v5 = vadd.f32 %v4005_v59, %v2292_v38 }
 0x2d7   : > { %v2078_v52 = vpop.f32.mrf.mxu2  ;;  %v2167_v20 = vpop.f32.mrf.mxu3 }
 0x2d8   : > { %2360 = vst [vmem:[%s4012_s17 + $0xe0] sm:$0xff] %v2328_v5  ;;  %v2391_v42 = vadd.f32 %v2390_v34, %v2328_v5  ;;  %v2430_v11 = vmul.f32 %v2328_v5, %v2328_v5  ;;  %v2168_v6 = vadd.f32 %v2167_v20, %v2078_v52  ;;  %v1799_v3 = vpop.f32.mrf.mxu1  ;;  %v2259_v57 = vpop.f32.mrf.mxu0 }
 0x2d9   : > { %v1800_v0 = vadd.f32 %v1799_v3, %v3992_v16 }
 0x2da   : > { %v2461_v1 = vadd.f32 %v2460_v50, %v2430_v11  ;;  %v2257_v9 = vadd.f32 %v2256_v35, %v2168_v6 }
 0x2dc   : > { %v2293_v12 = vadd.f32 %v2257_v9, %v1797_v4 }
 0x2de   : > { %v2329_v10 = vadd.f32 %v4005_v59, %v2293_v12 }
 0x2df   : > { %v2081_v29 = vpop.f32.mrf.mxu2  ;;  %v2170_v45 = vpop.f32.mrf.mxu3 }
 0x2e0   : > { %2361 = vst [vmem:[%s4012_s17 + $0xe8] sm:$0xff] %v2329_v10  ;;  %v2392_v28 = vadd.f32 %v2391_v42, %v2329_v10  ;;  %v2431_v30 = vmul.f32 %v2329_v10, %v2329_v10  ;;  %v2171_v51 = vadd.f32 %v2170_v45, %v2081_v29  ;;  %v1801_v48 = vpop.f32.mrf.mxu1  ;;  %v2261_v8 = vpop.f32.mrf.mxu0 }
 0x2e1   : > { %v1802_v13 = vadd.f32 %v1801_v48, %v3999_v47 }
 0x2e2   : > { %v2462_v40 = vadd.f32 %v2461_v1, %v2431_v30  ;;  %v2260_v19 = vadd.f32 %v2259_v57, %v2171_v51 }
 0x2e4   : > { %v2294_v17 = vadd.f32 %v2260_v19, %v1800_v0 }
 0x2e6   : > { %v2330_v63 = vadd.f32 %v4005_v59, %v2294_v17 }
 0x2e7   : > { %v2083_v2 = vpop.f32.mrf.mxu2  ;;  %v2172_v33 = vpop.f32.mrf.mxu3 }
 0x2e8   : > { %2362 = vst [vmem:[%s4012_s17 + $0xf0] sm:$0xff] %v2330_v63  ;;  %v2393_v25 = vadd.f32 %v2392_v28, %v2330_v63  ;;  %v2432_v62 = vmul.f32 %v2330_v63, %v2330_v63  ;;  %v2173_v23 = vadd.f32 %v2172_v33, %v2083_v2 }
 0x2ea   : > { %v2463_v58 = vadd.f32 %v2462_v40, %v2432_v62  ;;  %v2262_v56 = vadd.f32 %v2261_v8, %v2173_v23 }
 0x2ec   : > { %v2295_v53 = vadd.f32 %v2262_v56, %v1802_v13 }
 0x2ee   : > { %v2331_v16 = vadd.f32 %v4005_v59, %v2295_v53 }
 0x2f0   : > { %2363 = vst [vmem:[%s4012_s17 + $0xf8] sm:$0xff] %v2331_v16  ;;  %v2394_v37 = vadd.f32 %v2393_v25, %v2331_v16  ;;  %v2433_v32 = vmul.f32 %v2331_v16, %v2331_v16 }
 0x2f2   : > { %v2395_v21 = vrot.slane %v2394_v37, 4  ;;  %v2464_v27 = vadd.f32 %v2463_v58, %v2433_v32 }
 0x2f4   : > { %v2396_v61 = vadd.f32 %v2395_v21, %v2394_v37  ;;  %v2465_v46 = vrot.slane %v2464_v27, 4 }
 0x2f6   : > { %v2397_v54 = vrot.slane %v2396_v61, 2  ;;  %v2466_v24 = vadd.f32 %v2465_v46, %v2464_v27 }
 0x2f8   : > { %v2398_v31 = vadd.f32 %v2397_v54, %v2396_v61  ;;  %v2467_v39 = vrot.slane %v2466_v24, 2 }
 0x2fa   : > { %v2399_v18 = vrot.slane %v2398_v31, 1  ;;  %v2468_v22 = vadd.f32 %v2467_v39, %v2466_v24 }
 0x2fc   : > { %v2400_v47 = vadd.f32 %v2399_v18, %v2398_v31  ;;  %v2469_v59 = vrot.slane %v2468_v22, 1 }
 0x2fe   : > { %2401 = vst [vmem:[%s238_s21] sm:$0x1] %v2400_v47  ;;  %v2470_v55 = vadd.f32 %v2469_v59, %v2468_v22 }
 0x300   : > { %2471 = vst [vmem:[%s241_s25] sm:$0x1] %v2470_v55 }
 0x301 PF: > { %s16_s18 = sadd.s32 1, %s3086_s18  }
 0x302   : > { %p13_p4 = scmp.ge.s32.totalorder %s16_s18, 4  }
 0x304   :  { %15 = sbr.rel (!%p13_p4) target bundleno = 1 (0x1), region = 88 }

// kernel: vgg_block_forward.4
= control target key start
LH: loop header
LB: loop body
LE: loop exit
PB: predicated region body
PF: predicated region fallthrough
CT: control target
= control target key end

     0   :  { %s3289_s24 = smov 0   ;;  %s4365_s0 = inlined_call_operand.vmem [shape: f32[2,16,16,128], index: 0, kind: input, shape index: {}]   ;;  %s4366_s1 = inlined_call_operand.vmem [shape: f32[1,128], index: 1, kind: input, shape index: {}]   ;;  %s4367_s2 = inlined_call_operand.vmem [shape: f32[1,128], index: 2, kind: input, shape index: {}]   ;;  %s4368_s3 = inlined_call_operand.vmem [shape: bf16[3,384,128], index: 3, kind: input, shape index: {}]   ;;  %s4369_s4 = inlined_call_operand.vmem [shape: f32[1,128], index: 4, kind: input, shape index: {}]   ;;  %s4370_s5 = inlined_call_operand.vmem [shape: f32[2,16,16,128], index: 5, kind: output, shape index: {0}]   ;;  %s4371_s6 = inlined_call_operand.vmem [shape: f32[2,1,128], index: 6, kind: output, shape index: {1}]   ;;  %s4372_s7 = inlined_call_operand.vmem [shape: f32[2,1,128], index: 7, kind: output, shape index: {2}]  }
   0x1 LB: > { %s2735_s25 = sadd.s32 4294967295, %s3246_s24   ;;  %p2739_p0 = scmp.ge.s32.totalorder %s3246_s24, 1  ;;  %s3246_s24 = sphi %s3289_s24, %s18_s24  }
   0x2   : > { %p242_p1 = scmp.lt.s32.totalorder %s3246_s24, 3 }
   0x4   : > { %p243_p2 = pnand %p2739_p0, %p242_p1 }
   0x6   : > { %246 = sbr.rel (%p243_p2) target bundleno = 769 (0x301), region = 40 }
   0xb   : > { %v3163_v0 = vld [vmem:[%s4368_s3 + $0xf8] sm:$0xff]  ;;  %p280_p3 = scmp.lt.s32.totalorder %s2735_s25, 1  ;;  %v3162_v1 = vld [vmem:[%s4368_s3 + $0xf0] sm:$0xff]  ;;  %v3308_v2 = vld [vmem:[%s4366_s1] ss:$0 sm:$0xff]  ;;  %vm689_vm0 = vcmask 1040384  }
   0xc   : > { %1284 = vmatpush.bf16.msra.mxu0 %v3163_v0  ;;  %3204 = vmatpush.bf16.msra.mxu1 %v3163_v0  ;;  %v3161_v3 = vld [vmem:[%s4368_s3 + $0xe8] sm:$0xff]  ;;  %v3324_v4 = vld [vmem:[%s4367_s2] ss:$0 sm:$0xff]  ;;  %vm690_vm1 = vsmask.f32 256  ;;  %v3159_v39 = vld [vmem:[%s4368_s3 + $0xd8] sm:$0xff] }
   0xd   : > { %s4482_s25 = smov (!%p280_p3, %s2735_s25), 1  ;;  %3205 = vmatpush.bf16.msra.mxu2 %v3163_v0  ;;  %3206 = vmatpush.bf16.msra.mxu3 %v3163_v0  ;;  %v3160_v23 = vld [vmem:[%s4368_s3 + $0xe0] sm:$0xff]  ;;  %v3158_v59 = vld [vmem:[%s4368_s3 + $0xd0] sm:$0xff]  ;;  %vm3382_vm2 = vmand %vm689_vm0, %vm690_vm1  ;;  %vm724_vm3 = vsmask.f32 7424  ;;  %vm975_vm4 = vcmask 1046528  }
   0xe   : > { %s3130_s9 = sshll.u32 %s4482_s25, 8  ;;  %s292_s26 = scalar_lea.vmem %s4371_s6, %s4482_s25 }
   0xf   : > { %s3319_s14 = scalar_lea.vmem %s4365_s0, %s3130_s9  ;;  %s4229_s22 = scalar_lea.vmem %s4370_s5, %s3130_s9 }
  0x10   : > { %1285 = vmatpush.bf16.msra.mxu0 %v3162_v1  ;;  %3207 = vmatpush.bf16.msra.mxu1 %v3162_v1  ;;  %v297_v5 = vld [vmem:[%s3319_s14] sm:$0xff]  ;;  %v298_v6 = vld [vmem:[%s3319_s14 + $0x8] sm:$0xff]  ;;  %v299_v44 = vld [vmem:[%s3319_s14 + $0x10] sm:$0xff]  ;;  %s295_s29 = scalar_lea.vmem %s4372_s7, %s4482_s25 }
  0x11   : > { %v305_v7 = vld [vmem:[%s3319_s14 + $0x40] sm:$0xff]  ;;  %3208 = vmatpush.bf16.msra.mxu2 %v3162_v1  ;;  %3209 = vmatpush.bf16.msra.mxu3 %v3162_v1  ;;  %v333_v8 = vmul.f32 %v3308_v2, %v297_v5  ;;  %v334_v9 = vmul.f32 %v3308_v2, %v298_v6  ;;  %v306_v10 = vld [vmem:[%s3319_s14 + $0x48] sm:$0xff]  ;;  %v300_v45 = vld [vmem:[%s3319_s14 + $0x18] sm:$0xff]  ;;  %v335_v57 = vmul.f32 %v3308_v2, %v299_v44 }
  0x12   : > { %v341_v11 = vmul.f32 %v3308_v2, %v305_v7  ;;  %v313_v12 = vld [vmem:[%s3319_s14 + $0x80] sm:$0xff]  ;;  %v314_v13 = vld [vmem:[%s3319_s14 + $0x88] sm:$0xff]  ;;  %v342_v14 = vmul.f32 %v3308_v2, %v306_v10  ;;  %v307_v50 = vld [vmem:[%s3319_s14 + $0x50] sm:$0xff]  ;;  %v336_v58 = vmul.f32 %v3308_v2, %v300_v45 }
  0x13   : > { %v349_v15 = vmul.f32 %v3308_v2, %v313_v12  ;;  %v350_v16 = vmul.f32 %v3308_v2, %v314_v13  ;;  %v321_v17 = vld [vmem:[%s3319_s14 + $0xc0] sm:$0xff]  ;;  %v322_v18 = vld [vmem:[%s3319_s14 + $0xc8] sm:$0xff]  ;;  %v369_v19 = vadd.f32 %v3324_v4, %v333_v8  ;;  %v370_v20 = vadd.f32 %v3324_v4, %v334_v9  ;;  %v308_v6 = vld [vmem:[%s3319_s14 + $0x58] sm:$0xff] }
  0x14   : > { %v377_v21 = vadd.f32 %v3324_v4, %v341_v11  ;;  %v357_v22 = vmul.f32 %v3308_v2, %v321_v17  ;;  %1286 = vmatpush.bf16.msra.mxu0 %v3161_v3  ;;  %3210 = vmatpush.bf16.msra.mxu1 %v3161_v3  ;;  %v378_v24 = vadd.f32 %v3324_v4, %v342_v14  ;;  %v3179_v45 = vld [vmem:[%s4368_s3 + $0x178] sm:$0xff] }
  0x15   : > { %v385_v25 = vadd.f32 %v3324_v4, %v349_v15  ;;  %v386_v26 = vadd.f32 %v3324_v4, %v350_v16  ;;  %3211 = vmatpush.bf16.msra.mxu2 %v3161_v3  ;;  %3212 = vmatpush.bf16.msra.mxu3 %v3161_v3  ;;  %v401_v27 = vmax.f32 %v369_v19, 0.0  ;;  %v402_v28 = vmax.f32 %v370_v20, 0.0  ;;  %v3157_v15 = vld [vmem:[%s4368_s3 + $0xc8] sm:$0xff] }
  0x16   : > { %v409_v29 = vmax.f32 %v377_v21, 0.0  ;;  %v358_v30 = vmul.f32 %v3308_v2, %v322_v18  ;;  %v410_v31 = vmax.f32 %v378_v24, 0.0  ;;  %v393_v34 = vadd.f32 %v3324_v4, %v357_v22 }
  0x17   : > { %v417_v32 = vmax.f32 %v385_v25, 0.0  ;;  %v418_v33 = vmax.f32 %v386_v26, 0.0  ;;  %v433_v35 = vpack.c.bf16 %v401_v27, %v401_v27  ;;  %v434_v36 = vpack.c.bf16 %v402_v28, %v402_v28  ;;  %v315_v28 = vld [vmem:[%s3319_s14 + $0x90] sm:$0xff] }
  0x18   : > { %v441_v37 = vpack.c.bf16 %v409_v29, %v409_v29  ;;  %v394_v38 = vadd.f32 %v3324_v4, %v358_v30  ;;  %1287 = vmatpush.bf16.msra.mxu0 %v3160_v23  ;;  %3213 = vmatpush.bf16.msra.mxu1 %v3160_v23  ;;  %v442_v40 = vpack.c.bf16 %v410_v31, %v410_v31  ;;  %v425_v43 = vmax.f32 %v393_v34, 0.0  ;;  %v323_v34 = vld [vmem:[%s3319_s14 + $0xd0] sm:$0xff] }
  0x19   : > { %v449_v41 = vpack.c.bf16 %v417_v32, %v417_v32  ;;  %v450_v42 = vpack.c.bf16 %v418_v33, %v418_v33  ;;  %3214 = vmatpush.bf16.msra.mxu2 %v3160_v23  ;;  %3215 = vmatpush.bf16.msra.mxu3 %v3160_v23  ;;  %v497_v46 = vunpack.c.l.b16 %v433_v35  ;;  %v498_v47 = vunpack.c.l.b16 %v434_v36  ;;  %v316_v33 = vld [vmem:[%s3319_s14 + $0x98] sm:$0xff]  ;;  %v3156_v36 = vld [vmem:[%s4368_s3 + $0xc0] sm:$0xff] }
  0x1a   : > { %v505_v48 = vunpack.c.l.b16 %v441_v37  ;;  %v426_v49 = vmax.f32 %v394_v38, 0.0  ;;  %v506_v51 = vunpack.c.l.b16 %v442_v40  ;;  %v457_v54 = vpack.c.bf16 %v425_v43, %v425_v43  ;;  %v324_v35 = vld [vmem:[%s3319_s14 + $0xd8] sm:$0xff] }
  0x1b   : > { %v513_v52 = vunpack.c.l.b16 %v449_v41  ;;  %v514_v53 = vunpack.c.l.b16 %v450_v42  ;;  %v529_v55 = vpack.c.b16 %v498_v47, %v497_v46  ;;  %v343_v63 = vmul.f32 %v3308_v2, %v307_v50  ;;  %v3139_v46 = vld [vmem:[%s4368_s3 + $0x38] sm:$0xff] }
  0x1c   : > { %v458_v56 = vpack.c.bf16 %v426_v49, %v426_v49  ;;  %1288 = vmatpush.bf16.msra.mxu0 %v3159_v39  ;;  %3216 = vmatpush.bf16.msra.mxu1 %v3159_v39  ;;  %v533_v60 = vpack.c.b16 %v506_v51, %v505_v48  ;;  %v521_v62 = vunpack.c.l.b16 %v457_v54  ;;  %v371_v5 = vadd.f32 %v3324_v4, %v335_v57  ;;  %v301_v51 = vld [vmem:[%s3319_s14 + $0x20] sm:$0xff] }
  0x1d   : > { %v537_v61 = vpack.c.b16 %v514_v53, %v513_v52  ;;  %3217 = vmatpush.bf16.msra.mxu2 %v3159_v39  ;;  %3218 = vmatpush.bf16.msra.mxu3 %v3159_v39  ;;  %v546_v0 = vshrl.u32 %v529_v55, 16  ;;  %v549_v1 = vshll.u32 %v529_v55, 16  ;;  %v372_v13 = vadd.f32 %v3324_v4, %v336_v58 }
  0x1e   : > { %v522_v3 = vunpack.c.l.b16 %v458_v56  ;;  %v574_v7 = vshrl.u32 %v533_v60, 16  ;;  %v577_v8 = vshll.u32 %v533_v60, 16  ;;  %v403_v14 = vmax.f32 %v371_v5, 0.0  ;;  %v302_v60 = vld [vmem:[%s3319_s14 + $0x28] sm:$0xff]  ;;  %v3178_v5 = vld [vmem:[%s4368_s3 + $0x170] sm:$0xff] }
  0x1f   : > { %v602_v9 = vshrl.u32 %v537_v61, 16  ;;  %v605_v10 = vshll.u32 %v537_v61, 16  ;;  %v3367_v11 = vrot.slane %v546_v0, 7  ;;  %v344_v18 = vmul.f32 %v3308_v2, %v308_v6  ;;  %v3138_v6 = vld [vmem:[%s4368_s3 + $0x30] sm:$0xff] }
  0x20   : > { %v541_v12 = vpack.c.b16 %v522_v3, %v521_v62  ;;  %1289 = vmatpush.bf16.msra.mxu0 %v3158_v59  ;;  %3219 = vmatpush.bf16.msra.mxu1 %v3158_v59  ;;  %v3373_v16 = vrot.slane %v574_v7, 7  ;;  %v379_v19 = vadd.f32 %v3324_v4, %v343_v63  ;;  %v404_v24 = vmax.f32 %v372_v13, 0.0  ;;  %v3171_v62 = vld [vmem:[%s4368_s3 + $0x138] sm:$0xff] }
  0x21   : > { %v3375_v17 = vrot.slane %v602_v9, 7  ;;  %3220 = vmatpush.bf16.msra.mxu2 %v3158_v59  ;;  %3221 = vmatpush.bf16.msra.mxu3 %v3158_v59  ;;  %v551_v20 = vor.u32 %v549_v1, %v3367_v11  ;;  %v435_v26 = vpack.c.bf16 %v403_v14, %v403_v14  ;;  %v380_v27 = vadd.f32 %v3324_v4, %v344_v18  ;;  %v3147_v63 = vld [vmem:[%s4368_s3 + $0x78] sm:$0xff] }
  0x22   : > { %v630_v22 = vshrl.u32 %v541_v12, 16  ;;  %v633_v23 = vshll.u32 %v541_v12, 16  ;;  %v579_v25 = vor.u32 %v577_v8, %v3373_v16  ;;  %v436_v31 = vpack.c.bf16 %v404_v24, %v404_v24 }
  0x23   : > { %v607_v29 = vor.u32 %v605_v10, %v3375_v17  ;;  %v411_v32 = vmax.f32 %v379_v19, 0.0  ;;  %v3400_v37 = vsel %vm3382_vm2, 0, %v551_v20  ;;  %v499_v39 = vunpack.c.l.b16 %v435_v26 }
  0x24   : > { %v3390_v30 = vrot.slane %v630_v22, 7  ;;  %1290 = vmatpush.bf16.msra.mxu0 %v3157_v15  ;;  %3222 = vmatpush.bf16.msra.mxu1 %v3157_v15  ;;  %v3404_v38 = vsel %vm3382_vm2, 0, %v579_v25  ;;  %v412_v40 = vmax.f32 %v380_v27, 0.0  ;;  %v500_v42 = vunpack.c.l.b16 %v436_v31  ;;  %v3170_v27 = vld [vmem:[%s4368_s3 + $0x130] sm:$0xff]  ;;  %v310_v31 = vld [vmem:[%s3319_s14 + $0x68] sm:$0xff] }
  0x25   : > { %4400 = vst [vmem:[#allocation2_spill] sm:$0xff] %v3404_v38  ;;  %3223 = vmatpush.bf16.msra.mxu2 %v3157_v15  ;;  %3224 = vmatpush.bf16.msra.mxu3 %v3157_v15  ;;  %v443_v43 = vpack.c.bf16 %v411_v32, %v411_v32  ;;  %v351_v44 = vmul.f32 %v3308_v2, %v315_v28  ;;  %v3420_v52 = vsel %vm3382_vm2, 0, %v607_v29  ;;  %v3146_v28 = vld [vmem:[%s4368_s3 + $0x70] sm:$0xff] }
  0x26   : > { %v635_v41 = vor.u32 %v633_v23, %v3390_v30  ;;  %v444_v47 = vpack.c.bf16 %v412_v40, %v412_v40  ;;  %v352_v48 = vmul.f32 %v3308_v2, %v316_v33  ;;  %v359_v49 = vmul.f32 %v3308_v2, %v323_v34  ;;  %v309_v23 = vld [vmem:[%s3319_s14 + $0x60] sm:$0xff] }
  0x27   : > { %v360_v50 = vmul.f32 %v3308_v2, %v324_v35  ;;  %v530_v53 = vpack.c.b16 %v500_v42, %v499_v39  ;;  %v507_v54 = vunpack.c.l.b16 %v443_v43  ;;  %v387_v55 = vadd.f32 %v3324_v4, %v351_v44  ;;  %v3177_v35 = vld [vmem:[%s4368_s3 + $0x168] sm:$0xff] }
  0x28   : > { %1291 = vmatpush.bf16.msra.mxu0 %v3156_v36  ;;  %3225 = vmatpush.bf16.msra.mxu1 %v3156_v36  ;;  %v508_v56 = vunpack.c.l.b16 %v444_v47  ;;  %v388_v57 = vadd.f32 %v3324_v4, %v352_v48  ;;  %v395_v58 = vadd.f32 %v3324_v4, %v359_v49  ;;  %v3429_v61 = vsel %vm3382_vm2, 0, %v635_v41  ;;  %v317_v47 = vld [vmem:[%s3319_s14 + $0xa0] sm:$0xff]  ;;  %v3169_v49 = vld [vmem:[%s4368_s3 + $0x128] sm:$0xff] }
  0x29   : > { %v396_v59 = vadd.f32 %v3324_v4, %v360_v50  ;;  %3226 = vmatpush.bf16.msra.mxu2 %v3156_v36  ;;  %3227 = vmatpush.bf16.msra.mxu3 %v3156_v36  ;;  %v553_v0 = vshrl.u32 %v530_v53, 16  ;;  %v419_v1 = vmax.f32 %v387_v55, 0.0  ;;  %v337_v3 = vmul.f32 %v3308_v2, %v301_v51  ;;  %v3137_v36 = vld [vmem:[%s4368_s3 + $0x28] sm:$0xff] }
  0x2a   : > { %v534_v7 = vpack.c.b16 %v508_v56, %v507_v54  ;;  %v420_v8 = vmax.f32 %v388_v57, 0.0  ;;  %v427_v9 = vmax.f32 %v395_v58, 0.0  ;;  %v556_v12 = vshll.u32 %v530_v53, 16  ;;  %v3145_v50 = vld [vmem:[%s4368_s3 + $0x68] sm:$0xff]  ;;  %v3176_v58 = vld [vmem:[%s4368_s3 + $0x160] sm:$0xff] }
  0x2b   : > { %v428_v10 = vmax.f32 %v396_v59, 0.0  ;;  %1292 = vmatmul.bf16.vlgmr.msra.gmra.mxu0 %v3400_v37  ;;  %1312 = vmatmul.bf16.vlgmr.msra.gmra.mxu1 %v3404_v38  ;;  %v451_v13 = vpack.c.bf16 %v419_v1, %v419_v1  ;;  %v338_v14 = vmul.f32 %v3308_v2, %v302_v60  ;;  %v373_v15 = vadd.f32 %v3324_v4, %v337_v3  ;;  %v318_v54 = vld [vmem:[%s3319_s14 + $0xa8] sm:$0xff]  ;;  %v3136_v59 = vld [vmem:[%s4368_s3 + $0x20] sm:$0xff] }
  0x2c   : > { %1332 = vmatmul.bf16.vlgmr.msra.gmra.mxu2 %v3420_v52  ;;  %1352 = vmatmul.bf16.vlgmr.msra.gmra.mxu3 %v3429_v61  ;;  %v3450_v18 = vrot.slane %v553_v0, 7  ;;  %v581_v19 = vshrl.u32 %v534_v7, 16  ;;  %v452_v20 = vpack.c.bf16 %v420_v8, %v420_v8  ;;  %v459_v22 = vpack.c.bf16 %v427_v9, %v427_v9 }
  0x2d   : > { %1462 = vmatpush.bf16.msrb.mxu2 %v3179_v45  ;;  %1695 = vmatpush.bf16.msrb.mxu3 %v3139_v46  ;;  %v584_v24 = vshll.u32 %v534_v7, 16  ;;  %v515_v25 = vunpack.c.l.b16 %v451_v13  ;;  %v460_v26 = vpack.c.bf16 %v428_v10, %v428_v10  ;;  %v374_v29 = vadd.f32 %v3324_v4, %v338_v14  ;;  %v3168_v14 = vld [vmem:[%s4368_s3 + $0x120] sm:$0xff] }
  0x2e   : > { %1373 = vmatpush.bf16.msrb.mxu1 %v3171_v62  ;;  %1784 = vmatpush.bf16.msrb.mxu0 %v3147_v63  ;;  %v3461_v32 = vrot.slane %v581_v19, 7  ;;  %v516_v33 = vunpack.c.l.b16 %v452_v20  ;;  %v523_v34 = vunpack.c.l.b16 %v459_v22  ;;  %v405_v39 = vmax.f32 %v373_v15, 0.0  ;;  %v325_v62 = vld [vmem:[%s3319_s14 + $0xe0] sm:$0xff] }
  0x2f   : > { %v524_v40 = vunpack.c.l.b16 %v460_v26  ;;  %v406_v41 = vmax.f32 %v374_v29, 0.0  ;;  %v345_v42 = vmul.f32 %v3308_v2, %v309_v23  ;;  %v558_v43 = vor.u32 %v556_v12, %v3450_v18  ;;  %v3144_v15 = vld [vmem:[%s4368_s3 + $0x60] sm:$0xff]  ;;  %v326_v23 = vld [vmem:[%s3319_s14 + $0xe8] sm:$0xff] }
  0x30   : > { %v538_v44 = vpack.c.b16 %v516_v33, %v515_v25  ;;  %v437_v45 = vpack.c.bf16 %v405_v39, %v405_v39  ;;  %v346_v46 = vmul.f32 %v3308_v2, %v310_v31  ;;  %v586_v55 = vor.u32 %v584_v24, %v3461_v32  ;;  %v3175_v24 = vld [vmem:[%s4368_s3 + $0x158] sm:$0xff]  ;;  %v303_v31 = vld [vmem:[%s3319_s14 + $0x30] sm:$0xff] }
  0x31   : > { %1463 = vmatpush.bf16.msrb.mxu2 %v3178_v5  ;;  %1696 = vmatpush.bf16.msrb.mxu3 %v3138_v6  ;;  %v542_v48 = vpack.c.b16 %v524_v40, %v523_v34  ;;  %v438_v51 = vpack.c.bf16 %v406_v41, %v406_v41  ;;  %v381_v53 = vadd.f32 %v3324_v4, %v345_v42  ;;  %v3135_v25 = vld [vmem:[%s4368_s3 + $0x18] sm:$0xff]  ;;  %v3516_v26 = vsel %vm3382_vm2, 0, %v558_v43 }
  0x32   : > { %1374 = vmatpush.bf16.msrb.mxu1 %v3170_v27  ;;  %1785 = vmatpush.bf16.msrb.mxu0 %v3146_v28  ;;  %v609_v56 = vshrl.u32 %v538_v44, 16  ;;  %v612_v57 = vshll.u32 %v538_v44, 16  ;;  %v501_v60 = vunpack.c.l.b16 %v437_v45  ;;  %v382_v3 = vadd.f32 %v3324_v4, %v346_v46  ;;  %v3167_v43 = vld [vmem:[%s4368_s3 + $0x118] sm:$0xff] }
  0x33   : > { %v637_v63 = vshrl.u32 %v542_v48, 16  ;;  %v640_v0 = vshll.u32 %v542_v48, 16  ;;  %v502_v1 = vunpack.c.l.b16 %v438_v51  ;;  %v413_v6 = vmax.f32 %v381_v53, 0.0  ;;  %v3143_v44 = vld [vmem:[%s4368_s3 + $0x58] sm:$0xff] }
  0x34   : > { %v3490_v5 = vrot.slane %v609_v56, 7  ;;  %v353_v7 = vmul.f32 %v3308_v2, %v317_v47  ;;  %v354_v8 = vmul.f32 %v3308_v2, %v318_v54  ;;  %v414_v12 = vmax.f32 %v382_v3, 0.0  ;;  %v304_v45 = vld [vmem:[%s3319_s14 + $0x38] sm:$0xff] }
  0x35   : > { %1464 = vmatpush.bf16.msrb.mxu2 %v3177_v35  ;;  %1697 = vmatpush.bf16.msrb.mxu3 %v3137_v36  ;;  %v3494_v9 = vrot.slane %v637_v63, 7  ;;  %v3496_v10 = vpack.c.b16 %v502_v1, %v501_v60  ;;  %v361_v13 = vmul.f32 %v3308_v2, %v325_v62  ;;  %v445_v20 = vpack.c.bf16 %v413_v6, %v413_v6  ;;  %v311_v60 = vld [vmem:[%s3319_s14 + $0x70] sm:$0xff]  ;;  %v312_v62 = vld [vmem:[%s3319_s14 + $0x78] sm:$0xff] }
  0x36   : > { %1375 = vmatpush.bf16.msrb.mxu1 %v3169_v49  ;;  %1786 = vmatpush.bf16.msrb.mxu0 %v3145_v50  ;;  %v614_v19 = vor.u32 %v612_v57, %v3490_v5  ;;  %v389_v22 = vadd.f32 %v3324_v4, %v353_v7  ;;  %v3520_v27 = vsel %vm3382_vm2, 0, %v586_v55  ;;  %v446_v29 = vpack.c.bf16 %v414_v12, %v414_v12  ;;  %v3174_v49 = vld [vmem:[%s4368_s3 + $0x150] sm:$0xff] }
  0x37   : > { %4401 = vst [vmem:[#allocation3_spill] sm:$0xff] %v3520_v27  ;;  %v642_v28 = vor.u32 %v640_v0, %v3494_v9  ;;  %v560_v33 = vshrl.u32 %v3496_v10, 16  ;;  %v509_v34 = vunpack.c.l.b16 %v445_v20  ;;  %v390_v35 = vadd.f32 %v3324_v4, %v354_v8  ;;  %v3134_v50 = vld [vmem:[%s4368_s3 + $0x10] sm:$0xff] }
  0x38   : > { %v421_v36 = vmax.f32 %v389_v22, 0.0  ;;  %v3528_v39 = vsel %vm3382_vm2, 0, %v614_v19  ;;  %v510_v41 = vunpack.c.l.b16 %v446_v29  ;;  %v362_v42 = vmul.f32 %v3308_v2, %v326_v23  ;;  %v3166_v6 = vld [vmem:[%s4368_s3 + $0x110] sm:$0xff] }
  0x39   : > { %1465 = vmatpush.bf16.msrb.mxu2 %v3176_v58  ;;  %1698 = vmatpush.bf16.msrb.mxu3 %v3136_v59  ;;  %v3532_v40 = vsel %vm3382_vm2, 0, %v642_v28  ;;  %v422_v46 = vmax.f32 %v390_v35, 0.0  ;;  %v397_v48 = vadd.f32 %v3324_v4, %v361_v13  ;;  %v339_v51 = vmul.f32 %v3308_v2, %v303_v31  ;;  %v3173_v13 = vld [vmem:[%s4368_s3 + $0x148] sm:$0xff] }
  0x3a   : > { %1376 = vmatpush.bf16.msrb.mxu1 %v3168_v14  ;;  %1787 = vmatpush.bf16.msrb.mxu0 %v3144_v15  ;;  %v453_v47 = vpack.c.bf16 %v421_v36, %v421_v36  ;;  %v563_v53 = vshll.u32 %v3496_v10, 16  ;;  %v535_v54 = vpack.c.b16 %v510_v41, %v509_v34  ;;  %v398_v55 = vadd.f32 %v3324_v4, %v362_v42  ;;  %v3133_v14 = vld [vmem:[%s4368_s3 + $0x8] sm:$0xff]  ;;  %v3142_v15 = vld [vmem:[%s4368_s3 + $0x50] sm:$0xff] }
  0x3b   : > { %1297 = vmatmul.bf16.gmra.mxu0 %v3516_v26  ;;  %1317 = vmatmul.bf16.gmra.mxu1 %v3520_v27  ;;  %v454_v56 = vpack.c.bf16 %v422_v46, %v422_v46  ;;  %v429_v58 = vmax.f32 %v397_v48, 0.0  ;;  %v340_v59 = vmul.f32 %v3308_v2, %v304_v45  ;;  %v3559_v63 = vrot.slane %v560_v33, 7  ;;  %v319_v36 = vld [vmem:[%s3319_s14 + $0xb0] sm:$0xff]  ;;  %v3165_v41 = vld [vmem:[%s4368_s3 + $0x108] sm:$0xff] }
  0x3c   : > { %1337 = vmatmul.bf16.gmra.mxu2 %v3528_v39  ;;  %1357 = vmatmul.bf16.gmra.mxu3 %v3532_v40  ;;  %v517_v57 = vunpack.c.l.b16 %v453_v47  ;;  %v588_v0 = vshrl.u32 %v535_v54, 16  ;;  %v591_v1 = vshll.u32 %v535_v54, 16  ;;  %v430_v3 = vmax.f32 %v398_v55, 0.0  ;;  %v3141_v42 = vld [vmem:[%s4368_s3 + $0x48] sm:$0xff]  ;;  %v3172_v47 = vld [vmem:[%s4368_s3 + $0x140] sm:$0xff] }
  0x3d   : > { %1466 = vmatpush.bf16.msrb.mxu2 %v3175_v24  ;;  %1699 = vmatpush.bf16.msrb.mxu3 %v3135_v25  ;;  %v518_v7 = vunpack.c.l.b16 %v454_v56  ;;  %v461_v8 = vpack.c.bf16 %v429_v58, %v429_v58  ;;  %v375_v10 = vadd.f32 %v3324_v4, %v339_v51  ;;  %v376_v12 = vadd.f32 %v3324_v4, %v340_v59  ;;  %v3132_v54 = vld [vmem:[%s4368_s3] sm:$0xff]  ;;  %v327_v59 = vld [vmem:[%s3319_s14 + $0xf0] sm:$0xff] }
  0x3e   : > { %1377 = vmatpush.bf16.msrb.mxu1 %v3167_v43  ;;  %1788 = vmatpush.bf16.msrb.mxu0 %v3143_v44  ;;  %v3575_v19 = vrot.slane %v588_v0, 7  ;;  %v462_v20 = vpack.c.bf16 %v430_v3, %v430_v3  ;;  %v347_v22 = vmul.f32 %v3308_v2, %v311_v60  ;;  %v348_v23 = vmul.f32 %v3308_v2, %v312_v62  ;;  %v3164_v3 = vld [vmem:[%s4368_s3 + $0x100] sm:$0xff] }
  0x3f   : > { %v539_v24 = vpack.c.b16 %v518_v7, %v517_v57  ;;  %v525_v25 = vunpack.c.l.b16 %v461_v8  ;;  %v407_v28 = vmax.f32 %v375_v10, 0.0  ;;  %v408_v29 = vmax.f32 %v376_v12, 0.0 }
  0x40   : > { %v565_v31 = vor.u32 %v563_v53, %v3559_v63  ;;  %v526_v33 = vunpack.c.l.b16 %v462_v20  ;;  %v383_v34 = vadd.f32 %v3324_v4, %v347_v22  ;;  %v384_v35 = vadd.f32 %v3324_v4, %v348_v23  ;;  %v320_v53 = vld [vmem:[%s3319_s14 + $0xb8] sm:$0xff] }
  0x41   : > { %1467 = vmatpush.bf16.msrb.mxu2 %v3174_v49  ;;  %1700 = vmatpush.bf16.msrb.mxu3 %v3134_v50  ;;  %v616_v43 = vshrl.u32 %v539_v24, 16  ;;  %v619_v44 = vshll.u32 %v539_v24, 16  ;;  %v439_v45 = vpack.c.bf16 %v407_v28, %v407_v28  ;;  %v440_v46 = vpack.c.bf16 %v408_v29, %v408_v29 }
  0x42   : > { %1378 = vmatpush.bf16.msrb.mxu1 %v3166_v6  ;;  %1789 = vmatpush.bf16.msrb.mxu0 %v3142_v15  ;;  %v593_v48 = vor.u32 %v591_v1, %v3575_v19  ;;  %v543_v49 = vpack.c.b16 %v526_v33, %v525_v25  ;;  %v415_v50 = vmax.f32 %v383_v34, 0.0  ;;  %v416_v51 = vmax.f32 %v384_v35, 0.0  ;;  %v3140_v6 = vld [vmem:[%s4368_s3 + $0x40] sm:$0xff] }
  0x43   : > { %v3597_v55 = vrot.slane %v616_v43, 7  ;;  %v503_v56 = vunpack.c.l.b16 %v439_v45  ;;  %v504_v57 = vunpack.c.l.b16 %v440_v46  ;;  %v355_v58 = vmul.f32 %v3308_v2, %v319_v36 }
  0x44   : > { %v644_v60 = vshrl.u32 %v543_v49, 16  ;;  %v647_v62 = vshll.u32 %v543_v49, 16  ;;  %v447_v0 = vpack.c.bf16 %v415_v50, %v415_v50  ;;  %v448_v1 = vpack.c.bf16 %v416_v51, %v416_v51  ;;  %v3195_v49 = vld [vmem:[%s4368_s3 + $0x1f8] sm:$0xff] }
  0x45   : > { %1468 = vmatpush.bf16.msrb.mxu2 %v3173_v13  ;;  %1701 = vmatpush.bf16.msrb.mxu3 %v3133_v14  ;;  %v621_v7 = vor.u32 %v619_v44, %v3597_v55  ;;  %v532_v8 = vpack.c.b16 %v504_v57, %v503_v56  ;;  %v356_v10 = vmul.f32 %v3308_v2, %v320_v53  ;;  %v328_v13 = vld [vmem:[%s3319_s14 + $0xf8] sm:$0xff]  ;;  %v3616_v23 = vsel %vm3382_vm2, 0, %v565_v31 }
  0x46   : > { %1379 = vmatpush.bf16.msrb.mxu1 %v3165_v41  ;;  %1790 = vmatpush.bf16.msrb.mxu0 %v3141_v42  ;;  %v391_v12 = vadd.f32 %v3324_v4, %v355_v58  ;;  %v3611_v14 = vrot.slane %v644_v60, 7  ;;  %v511_v15 = vunpack.c.l.b16 %v447_v0  ;;  %v512_v20 = vunpack.c.l.b16 %v448_v1 }
  0x47   : > { %v363_v22 = vmul.f32 %v3308_v2, %v327_v59  ;;  %v3620_v24 = vsel %vm3382_vm2, 0, %v593_v48  ;;  %v3624_v25 = vsel %vm3382_vm2, 0, %v621_v7  ;;  %v392_v28 = vadd.f32 %v3324_v4, %v356_v10  ;;  %v3187_v48 = vld [vmem:[%s4368_s3 + $0x1b8] sm:$0xff] }
  0x48   : > { %4402 = vst [vmem:[#allocation4_spill] sm:$0xff] %v3620_v24  ;;  %v649_v29 = vor.u32 %v647_v62, %v3611_v14  ;;  %v536_v33 = vpack.c.b16 %v512_v20, %v511_v15  ;;  %v423_v34 = vmax.f32 %v391_v12, 0.0  ;;  %v364_v35 = vmul.f32 %v3308_v2, %v328_v13 }
  0x49   : > { %1469 = vmatpush.bf16.msrb.mxu2 %v3172_v47  ;;  %1702 = vmatpush.bf16.msrb.mxu3 %v3132_v54  ;;  %v424_v31 = vmax.f32 %v392_v28, 0.0  ;;  %v399_v36 = vadd.f32 %v3324_v4, %v363_v22  ;;  %v567_v42 = vshrl.u32 %v532_v8, 16  ;;  %v3155_v54 = vld [vmem:[%s4368_s3 + $0xb8] sm:$0xff]  ;;  %v570_v57 = vshll.u32 %v532_v8, 16 }
  0x4a   : > { %1380 = vmatpush.bf16.msrb.mxu1 %v3164_v3  ;;  %1791 = vmatpush.bf16.msrb.mxu0 %v3140_v6  ;;  %v3634_v41 = vsel %vm3382_vm2, 0, %v649_v29  ;;  %v455_v43 = vpack.c.bf16 %v423_v34, %v423_v34  ;;  %v595_v2 = vshrl.u32 %v536_v33, 16  ;;  %v400_v45 = vadd.f32 %v3324_v4, %v364_v35  ;;  %v3203_v4 = vld [vmem:[%s4368_s3 + $0x238] sm:$0xff] }
  0x4b   : > { %1302 = vmatmul.bf16.gmra.mxu0 %v3616_v23  ;;  %1322 = vmatmul.bf16.gmra.mxu1 %v3620_v24  ;;  %v456_v44 = vpack.c.bf16 %v424_v31, %v424_v31  ;;  %v431_v46 = vmax.f32 %v399_v36, 0.0  ;;  %v3651_v56 = vrot.slane %v567_v42, 7  ;;  %v598_v58 = vshll.u32 %v536_v33, 16 }
  0x4c   : > { %1342 = vmatmul.bf16.gmra.mxu2 %v3624_v25  ;;  %1362 = vmatmul.bf16.gmra.mxu3 %v3634_v41  ;;  %v519_v47 = vunpack.c.l.b16 %v455_v43  ;;  %v432_v51 = vmax.f32 %v400_v45, 0.0  ;;  %v3653_v59 = vrot.slane %v595_v2, 7  ;;  %v736_v31 = vshll.u32 %v3400_v37, 16 }
  0x4d   : > { %v520_v50 = vunpack.c.l.b16 %v456_v44  ;;  %v463_v53 = vpack.c.bf16 %v431_v46, %v431_v46  ;;  %2155 = vmatpush.bf16.msra.mxu2 %v3187_v48  ;;  %2244 = vmatpush.bf16.msra.mxu3 %v3195_v49  ;;  %v572_v7 = vor.u32 %v570_v57, %v3651_v56  ;;  %v708_v36 = vsel %vm3382_vm2, %v3367_v11, 0  ;;  %v3154_v57 = vld [vmem:[%s4368_s3 + $0xb0] sm:$0xff] }
  0x4e   : > { %v464_v62 = vpack.c.bf16 %v432_v51, %v432_v51  ;;  %1873 = vmatpush.bf16.msra.mxu1 %v3155_v54  ;;  %2333 = vmatpush.bf16.msra.mxu0 %v3203_v4  ;;  %v600_v10 = vor.u32 %v598_v58, %v3653_v59  ;;  %v734_v42 = vshrl.u32 %v3400_v37, 16  ;;  %v738_v43 = vrot.slane %v736_v31, 1  ;;  %v3186_v54 = vld [vmem:[%s4368_s3 + $0x1b0] sm:$0xff] }
  0x4f   : > { %v540_v60 = vpack.c.b16 %v520_v50, %v519_v47  ;;  %v527_v0 = vunpack.c.l.b16 %v463_v53  ;;  %v3662_v22 = vsel %vm3382_vm2, 0, %v572_v7  ;;  %v741_v2 = vshll.u32 %v708_v36, 16  ;;  %v3194_v4 = vld [vmem:[%s4368_s3 + $0x1f0] sm:$0xff] }
  0x50   : > { %v528_v6 = vunpack.c.l.b16 %v464_v62  ;;  %4403 = vst [vmem:[#allocation5_spill] sm:$0xff] %v3662_v22  ;;  %v3666_v28 = vsel %vm3382_vm2, 0, %v600_v10  ;;  %v739_v44 = vor.u32 %v738_v43, %v734_v42  ;;  %v978_v46 = vrot.slane %v3400_v37, 1  ;;  %v3202_v58 = vld [vmem:[%s4368_s3 + $0x230] sm:$0xff] }
  0x51   : > { %v623_v1 = vshrl.u32 %v540_v60, 16  ;;  %v626_v3 = vshll.u32 %v540_v60, 16  ;;  %4404 = vst [vmem:[#allocation6_spill] sm:$0xff] %v3666_v28  ;;  %v743_v45 = vrot.slane %v741_v2, 1  ;;  %v979_v47 = vrot.slane %v708_v36, 1  ;;  %2156 = vmatpush.bf16.msra.mxu2 %v3186_v54  ;;  %2245 = vmatpush.bf16.msra.mxu3 %v3194_v4 }
  0x52   : > { %v544_v8 = vpack.c.b16 %v528_v6, %v527_v0  ;;  %v4373_v48 = vmov 0   ;;  %v748_v11 = vshll.u32 %v3516_v26, 16  ;;  %v709_v53 = vsel %vm3382_vm2, %v3450_v18, 0  ;;  %1874 = vmatpush.bf16.msra.mxu1 %v3154_v57  ;;  %2334 = vmatpush.bf16.msra.mxu0 %v3202_v58 }
  0x53   : > { %v3657_v12 = vrot.slane %v623_v1, 7  ;;  %v3690_v49 = vrot.slane %v4373_v48, 1  ;;  %v744_v50 = vsel %vm724_vm3, %v739_v44, %v743_v45  ;;  %v3694_v51 = vsel %vm975_vm4, %v978_v46, %v979_v47  ;;  %v3185_v45 = vld [vmem:[%s4368_s3 + $0x1a8] sm:$0xff] }
  0x54   : > { %v651_v15 = vshrl.u32 %v544_v8, 16  ;;  %v654_v20 = vshll.u32 %v544_v8, 16  ;;  %v746_v18 = vshrl.u32 %v3516_v26, 16  ;;  %v750_v60 = vrot.slane %v748_v11, 1  ;;  %v3193_v46 = vld [vmem:[%s4368_s3 + $0x1e8] sm:$0xff] }
  0x55   : > { %v628_v13 = vor.u32 %v626_v3, %v3657_v12  ;;  %v753_v62 = vshll.u32 %v709_v53, 16  ;;  %v981_v3 = vrot.slane %v3516_v26, 1  ;;  %v982_v6 = vrot.slane %v709_v53, 1  ;;  %2157 = vmatpush.bf16.msra.mxu2 %v3185_v45  ;;  %2246 = vmatpush.bf16.msra.mxu3 %v3193_v46  ;;  %v3153_v53 = vld [vmem:[%s4368_s3 + $0xa8] sm:$0xff] }
  0x56   : > { %v3668_v29 = vrot.slane %v651_v15, 7  ;;  %v751_v0 = vor.u32 %v750_v60, %v746_v18  ;;  %v760_v8 = vshll.u32 %v3616_v23, 16  ;;  %v758_v15 = vshrl.u32 %v3616_v23, 16  ;;  %1875 = vmatpush.bf16.msra.mxu1 %v3153_v53 }
  0x57   : > { %v3672_v33 = vsel %vm3382_vm2, 0, %v628_v13  ;;  %v755_v1 = vrot.slane %v753_v62, 1  ;;  %v3721_v10 = vsel %vm975_vm4, %v981_v3, %v982_v6  ;;  %v710_v13 = vsel %vm3382_vm2, %v3559_v63, 0 }
  0x58   : > { %v656_v34 = vor.u32 %v654_v20, %v3668_v29  ;;  %v762_v20 = vrot.slane %v760_v8, 1  ;;  %v984_v42 = vrot.slane %v3616_v23, 1  ;;  %v985_v43 = vrot.slane %v710_v13, 1 }
  0x59   : > { %v3718_v7 = vsel %vm724_vm3, %v751_v0, %v755_v1  ;;  %v711_v63 = vsel %vm3382_vm2, %v3651_v56, 0  ;;  %v770_v47 = vshrl.u32 %v3662_v22, 16  ;;  %v3201_v56 = vld [vmem:[%s4368_s3 + $0x228] sm:$0xff]  ;;  %v987_v57 = vrot.slane %v3662_v22, 1 }
  0x5a   : > { %v3680_v35 = vsel %vm3382_vm2, 0, %v656_v34  ;;  %v765_v34 = vshll.u32 %v710_v13, 16  ;;  %v763_v31 = vor.u32 %v762_v20, %v758_v15  ;;  %v3736_v44 = vsel %vm975_vm4, %v984_v42, %v985_v43  ;;  %2335 = vmatpush.bf16.msra.mxu0 %v3201_v56  ;;  %v3152_v56 = vld [vmem:[%s4368_s3 + $0xa0] sm:$0xff] }
  0x5b   : > { %1307 = vmatmul.bf16.gmra.mxu0 %v3662_v22  ;;  %1327 = vmatmul.bf16.gmra.mxu1 %v3666_v28  ;;  %v777_v11 = vshll.u32 %v711_v63, 16  ;;  %v988_v58 = vrot.slane %v711_v63, 1  ;;  %v784_v62 = vshll.u32 %v3404_v38, 16  ;;  %v712_v0 = vsel %vm3382_vm2, %v3373_v16, 0  ;;  %v3192_v63 = vld [vmem:[%s4368_s3 + $0x1e0] sm:$0xff] }
  0x5c   : > { %1347 = vmatmul.bf16.gmra.mxu2 %v3672_v33  ;;  %1367 = vmatmul.bf16.gmra.mxu3 %v3680_v35  ;;  %v767_v36 = vrot.slane %v765_v34, 1  ;;  %v782_v1 = vshrl.u32 %v3404_v38, 16  ;;  %v789_v6 = vshll.u32 %v712_v0, 16  ;;  %v990_v15 = vrot.slane %v3404_v38, 1 }
  0x5d   : > { %v779_v4 = vrot.slane %v777_v11, 1  ;;  %v3764_v60 = vsel %vm975_vm4, %v987_v57, %v988_v58  ;;  %v786_v3 = vrot.slane %v784_v62, 1  ;;  %v991_v20 = vrot.slane %v712_v0, 1  ;;  %2247 = vmatpush.bf16.msra.mxu3 %v3192_v63  ;;  %1876 = vmatpush.bf16.msra.mxu1 %v3152_v56 }
  0x5e   : > { %v3733_v2 = vsel %vm724_vm3, %v763_v31, %v767_v36  ;;  %4406 = vst [vmem:[#allocation8_spill] sm:$0xff] %v3764_v60  ;;  %v791_v13 = vrot.slane %v789_v6, 1  ;;  %v796_v16 = vshll.u32 %v3520_v27, 16  ;;  %v713_v43 = vsel %vm3382_vm2, %v3461_v32, 0 }
  0x5f   : > { %v787_v8 = vor.u32 %v786_v3, %v782_v1  ;;  %v3784_v42 = vsel %vm975_vm4, %v990_v15, %v991_v20  ;;  %v794_v32 = vshrl.u32 %v3520_v27, 16  ;;  %v801_v53 = vshll.u32 %v713_v43, 16 }
  0x60   : > { %4408 = vst [vmem:[#allocation10_spill] sm:$0xff] %v3784_v42  ;;  %v798_v11 = vrot.slane %v796_v16, 1  ;;  %v993_v58 = vrot.slane %v3520_v27, 1  ;;  %v994_v62 = vrot.slane %v713_v43, 1  ;;  %v808_v15 = vshll.u32 %v3620_v24, 16 }
  0x61   : > { %v3781_v36 = vsel %vm724_vm3, %v787_v8, %v791_v13  ;;  %v803_v57 = vrot.slane %v801_v53, 1  ;;  %v714_v20 = vsel %vm3382_vm2, %v3575_v19, 0 }
  0x62   : > { %4407 = vst [vmem:[#allocation9_spill] sm:$0xff] %v3781_v36  ;;  %v3828_v13 = vsel %vm975_vm4, %v993_v58, %v994_v62  ;;  %v813_v53 = vshll.u32 %v714_v20, 16 }
  0x63   : > { %4412 = vst [vmem:[#allocation14_spill] sm:$0xff] %v3828_v13 }
  0x6b   : > { %1381 = vmatmul.bf16.vlgmr.msrb.gmra.mxu1 %v744_v50  ;;  %1792 = vmatmul.bf16.vlgmr.msrb.gmra.mxu0 %v3690_v49 }
  0x6c   : > { %1470 = vmatmul.bf16.vlgmr.msrb.gmra.mxu2 %v3694_v51  ;;  %1703 = vmatmul.bf16.vlgmr.msrb.gmra.mxu3 %v4373_v48 }
  0x7b   : > { %1386 = vmatmul.bf16.gmra.mxu1 %v3718_v7  ;;  %1797 = vmatmul.bf16.gmra.mxu0 %v744_v50 }
  0x7c   : > { %1475 = vmatmul.bf16.gmra.mxu2 %v3721_v10  ;;  %1708 = vmatmul.bf16.gmra.mxu3 %v3400_v37  ;;  %v772_v37 = vshll.u32 %v3662_v22, 16 }
  0x7e   : > { %v774_v50 = vrot.slane %v772_v37, 1  ;;  %v3184_v37 = vld [vmem:[%s4368_s3 + $0x1a0] sm:$0xff] }
  0x7f   : > { %2158 = vmatpush.bf16.msra.mxu2 %v3184_v37 }
  0x80   : > { %v775_v54 = vor.u32 %v774_v50, %v770_v47 }
  0x82   : > { %v3761_v18 = vsel %vm724_vm3, %v775_v54, %v779_v4  ;;  %v3200_v54 = vld [vmem:[%s4368_s3 + $0x220] sm:$0xff]  ;;  %v799_v4 = vor.u32 %v798_v11, %v794_v32  ;;  %v806_v32 = vshrl.u32 %v3620_v24, 16  ;;  %v810_v11 = vrot.slane %v808_v15, 1 }
  0x83   : > { %4405 = vst [vmem:[#allocation7_spill] sm:$0xff] %v3761_v18  ;;  %2336 = vmatpush.bf16.msra.mxu0 %v3200_v54  ;;  %v815_v54 = vrot.slane %v813_v53, 1  ;;  %v820_v15 = vshll.u32 %v3666_v28, 16 }
  0x84   : > { %v3825_v8 = vsel %vm724_vm3, %v799_v4, %v803_v57  ;;  %v811_v56 = vor.u32 %v810_v11, %v806_v32  ;;  %v996_v4 = vrot.slane %v3620_v24, 1  ;;  %v997_v57 = vrot.slane %v714_v20, 1  ;;  %v3183_v32 = vld [vmem:[%s4368_s3 + $0x198] sm:$0xff] }
  0x85   : > { %4411 = vst [vmem:[#allocation13_spill] sm:$0xff] %v3825_v8  ;;  %v715_v20 = vsel %vm3382_vm2, %v3653_v59, 0  ;;  %v3191_v11 = vld [vmem:[%s4368_s3 + $0x1d8] sm:$0xff]  ;;  %2159 = vmatpush.bf16.msra.mxu2 %v3183_v32  ;;  %v818_v59 = vshrl.u32 %v3666_v28, 16  ;;  %v999_v32 = vrot.slane %v3666_v28, 1 }
  0x86   : > { %2248 = vmatpush.bf16.msra.mxu3 %v3191_v11  ;;  %v1000_v11 = vrot.slane %v715_v20, 1 }
  0x8b   : > { %1391 = vmatmul.bf16.gmra.mxu1 %v3733_v2  ;;  %1802 = vmatmul.bf16.gmra.mxu0 %v3718_v7 }
  0x8c   : > { %1480 = vmatmul.bf16.gmra.mxu2 %v3736_v44  ;;  %1713 = vmatmul.bf16.gmra.mxu3 %v3516_v26 }
  0x9b   : > { %1396 = vmatmul.bf16.gmra.mxu1 %v3761_v18  ;;  %1807 = vmatmul.bf16.gmra.mxu0 %v3733_v2 }
  0x9c   : > { %1485 = vmatmul.bf16.gmra.mxu2 %v3764_v60  ;;  %1718 = vmatmul.bf16.gmra.mxu3 %v3616_v23 }
  0xa8   : > { %v3776_v34 = vpop.f32.mrf.mxu0  ;;  %v3778_v31 = vpop.f32.mrf.mxu1 }
  0xab   : > { %1401 = vmatmul.bf16.gmra.mxu1 %v3781_v36  ;;  %1812 = vmatmul.bf16.gmra.mxu0 %v3761_v18 }
  0xac   : > { %1490 = vmatmul.bf16.gmra.mxu2 %v3784_v42  ;;  %1723 = vmatmul.bf16.gmra.mxu3 %v3662_v22  ;;  %v3904_v42 = vsel %vm975_vm4, %v999_v32, %v1000_v11 }
  0xad   : > { %4422 = vst [vmem:[#allocation24_spill] sm:$0xff] %v3904_v42 }
  0xaf   : > { %v3800_v45 = vpop.f32.mrf.mxu2  ;;  %v3802_v46 = vpop.f32.mrf.mxu3 }
  0xb0   : > { %4409 = vst [vmem:[#allocation11_spill] sm:$0xff] %v3802_v46  ;;  %v3804_v47 = vpop.f32.mrf.mxu0  ;;  %v3806_v50 = vpop.f32.mrf.mxu1  ;;  %v3199_v46 = vld [vmem:[%s4368_s3 + $0x218] sm:$0xff] }
  0xb1   : > { %2337 = vmatpush.bf16.msra.mxu0 %v3199_v46  ;;  %v832_v46 = vshll.u32 %v3420_v52, 16 }
  0xb7   : > { %v3816_v0 = vpop.f32.mrf.mxu2  ;;  %v3818_v1 = vpop.f32.mrf.mxu3 }
  0xb8   : > { %4410 = vst [vmem:[#allocation12_spill] sm:$0xff] %v3818_v1  ;;  %v3820_v3 = vpop.f32.mrf.mxu0  ;;  %v3822_v6 = vpop.f32.mrf.mxu1  ;;  %v3860_v1 = vsel %vm975_vm4, %v996_v4, %v997_v57  ;;  %v822_v57 = vrot.slane %v820_v15, 1 }
  0xb9   : > { %4416 = vst [vmem:[#allocation18_spill] sm:$0xff] %v3860_v1 }
  0xbb   : > { %1406 = vmatmul.bf16.gmra.mxu1 %v3825_v8  ;;  %1817 = vmatmul.bf16.gmra.mxu0 %v3781_v36 }
  0xbc   : > { %1495 = vmatmul.bf16.gmra.mxu2 %v3828_v13  ;;  %1728 = vmatmul.bf16.gmra.mxu3 %v3404_v38 }
  0xbf   : > { %v3838_v16 = vpop.f32.mrf.mxu2  ;;  %v3840_v43 = vpop.f32.mrf.mxu3 }
  0xc0   : > { %4413 = vst [vmem:[#allocation15_spill] sm:$0xff] %v3840_v43  ;;  %v3842_v37 = vpop.f32.mrf.mxu0  ;;  %v3844_v63 = vpop.f32.mrf.mxu1  ;;  %v3857_v43 = vsel %vm724_vm3, %v811_v56, %v815_v54 }
  0xc1   : > { %4415 = vst [vmem:[#allocation17_spill] sm:$0xff] %v3857_v43 }
  0xc7   : > { %v3848_v58 = vpop.f32.mrf.mxu2  ;;  %v3850_v19 = vpop.f32.mrf.mxu3 }
  0xc8   : > { %4414 = vst [vmem:[#allocation16_spill] sm:$0xff] %v3850_v19  ;;  %v3852_v62 = vpop.f32.mrf.mxu0  ;;  %v3854_v48 = vpop.f32.mrf.mxu1  ;;  %v825_v19 = vshll.u32 %v715_v20, 16 }
  0xcb   : > { %1411 = vmatmul.bf16.gmra.mxu1 %v3857_v43  ;;  %1822 = vmatmul.bf16.gmra.mxu0 %v3825_v8  ;;  %v823_v8 = vor.u32 %v822_v57, %v818_v59  ;;  %v834_v59 = vrot.slane %v832_v46, 1 }
  0xcc   : > { %1500 = vmatmul.bf16.gmra.mxu2 %v3860_v1  ;;  %1733 = vmatmul.bf16.gmra.mxu3 %v3520_v27  ;;  %v3151_v1 = vld [vmem:[%s4368_s3 + $0x98] sm:$0xff] }
  0xcd   : > { %1877 = vmatpush.bf16.msra.mxu1 %v3151_v1  ;;  %v716_v1 = vsel %vm3382_vm2, %v3375_v17, 0 }
  0xce   : > { %v837_v57 = vshll.u32 %v716_v1, 16 }
  0xcf   : > { %v3876_v53 = vpop.f32.mrf.mxu2  ;;  %v3878_v56 = vpop.f32.mrf.mxu3 }
  0xd0   : > { %4417 = vst [vmem:[#allocation19_spill] sm:$0xff] %v3876_v53  ;;  %v3880_v54 = vpop.f32.mrf.mxu0  ;;  %v3882_v4 = vpop.f32.mrf.mxu1 }
  0xd1   : > { %4418 = vst [vmem:[#allocation20_spill] sm:$0xff] %v3878_v56  ;;  %v827_v56 = vrot.slane %v825_v19, 1 }
  0xd3   : > { %v3901_v38 = vsel %vm724_vm3, %v823_v8, %v827_v56  ;;  %v830_v56 = vshrl.u32 %v3420_v52, 16 }
  0xd4   : > { %4421 = vst [vmem:[#allocation23_spill] sm:$0xff] %v3901_v38 }
  0xd5   : > { %v835_v11 = vor.u32 %v834_v59, %v830_v56 }
  0xd7   : > { %v3892_v27 = vpop.f32.mrf.mxu2  ;;  %v3894_v13 = vpop.f32.mrf.mxu3 }
  0xd8   : > { %4419 = vst [vmem:[#allocation21_spill] sm:$0xff] %v3892_v27  ;;  %v3896_v15 = vpop.f32.mrf.mxu0  ;;  %v3898_v36 = vpop.f32.mrf.mxu1 }
  0xd9   : > { %4420 = vst [vmem:[#allocation22_spill] sm:$0xff] %v3894_v13  ;;  %v839_v13 = vrot.slane %v837_v57, 1  ;;  %v842_v57 = vshrl.u32 %v3528_v39, 16 }
  0xdb   : > { %1416 = vmatmul.bf16.gmra.mxu1 %v3901_v38  ;;  %1827 = vmatmul.bf16.gmra.mxu0 %v3857_v43  ;;  %v1003_v43 = vrot.slane %v716_v1, 1  ;;  %v844_v1 = vshll.u32 %v3528_v39, 16 }
  0xdc   : > { %1505 = vmatmul.bf16.gmra.mxu2 %v3904_v42  ;;  %1738 = vmatmul.bf16.gmra.mxu3 %v3620_v24  ;;  %v1002_v42 = vrot.slane %v3420_v52, 1 }
  0xde   : > { %v3932_v53 = vsel %vm975_vm4, %v1002_v42, %v1003_v43  ;;  %v3182_v42 = vld [vmem:[%s4368_s3 + $0x190] sm:$0xff] }
  0xdf   : > { %v3914_v19 = vpop.f32.mrf.mxu2  ;;  %v3916_v8 = vpop.f32.mrf.mxu3  ;;  %4427 = vst [vmem:[#allocation29_spill] sm:$0xff] %v3932_v53  ;;  %2160 = vmatpush.bf16.msra.mxu2 %v3182_v42  ;;  %v3198_v42 = vld [vmem:[%s4368_s3 + $0x210] sm:$0xff] }
  0xe0   : > { %4423 = vst [vmem:[#allocation25_spill] sm:$0xff] %v3914_v19  ;;  %v3918_v20 = vpop.f32.mrf.mxu0  ;;  %v3921_v32 = vpop.f32.mrf.mxu1  ;;  %2338 = vmatpush.bf16.msra.mxu0 %v3198_v42 }
  0xe1   : > { %4424 = vst [vmem:[#allocation26_spill] sm:$0xff] %v3916_v8  ;;  %v3929_v8 = vsel %vm724_vm3, %v835_v11, %v839_v13  ;;  %v717_v13 = vsel %vm3382_vm2, %v3490_v5, 0  ;;  %v846_v11 = vrot.slane %v844_v1, 1  ;;  %v1005_v1 = vrot.slane %v3528_v39, 1 }
  0xe7   : > { %v3924_v24 = vpop.f32.mrf.mxu2  ;;  %v3926_v17 = vpop.f32.mrf.mxu3 }
  0xe8   : > { %4425 = vst [vmem:[#allocation27_spill] sm:$0xff] %v3924_v24  ;;  %v1793_v19 = vpop.f32.mrf.mxu0  ;;  %v1382_v27 = vpop.f32.mrf.mxu1  ;;  %v1006_v24 = vrot.slane %v717_v13, 1 }
  0xe9   : > { %4426 = vst [vmem:[#allocation28_spill] sm:$0xff] %v3926_v17  ;;  %v1383_v46 = vadd.f32 %v1382_v27, %v3776_v34  ;;  %v3190_v27 = vld [vmem:[%s4368_s3 + $0x1d0] sm:$0xff]  ;;  %v849_v17 = vshll.u32 %v717_v13, 16 }
  0xea   : > { %2249 = vmatpush.bf16.msra.mxu3 %v3190_v27  ;;  %v847_v27 = vor.u32 %v846_v11, %v842_v57  ;;  %v3964_v60 = vsel %vm975_vm4, %v1005_v1, %v1006_v24  ;;  %v718_v24 = vsel %vm3382_vm2, %v3597_v55, 0 }
  0xeb   : > { %1421 = vmatmul.bf16.gmra.mxu1 %v3929_v8  ;;  %1832 = vmatmul.bf16.gmra.mxu0 %v3901_v38  ;;  %4429 = vst [vmem:[#allocation31_spill] sm:$0xff] %v3964_v60  ;;  %v861_v42 = vshll.u32 %v718_v24, 16 }
  0xec   : > { %1510 = vmatmul.bf16.gmra.mxu2 %v3932_v53  ;;  %1743 = vmatmul.bf16.gmra.mxu3 %v3666_v28  ;;  %v3150_v28 = vld [vmem:[%s4368_s3 + $0x90] sm:$0xff] }
  0xed   : > { %1878 = vmatpush.bf16.msra.mxu1 %v3150_v28 }
  0xef   : > { %v1471_v34 = vpop.f32.mrf.mxu2  ;;  %v1704_v56 = vpop.f32.mrf.mxu3 }
  0xf0   : > { %v1472_v43 = vadd.f32 %v1471_v34, %v1383_v46  ;;  %v1795_v59 = vpop.f32.mrf.mxu0  ;;  %v1384_v53 = vpop.f32.mrf.mxu1  ;;  %v851_v46 = vrot.slane %v849_v17, 1 }
  0xf1   : > { %v1385_v38 = vadd.f32 %v1384_v53, %v3804_v47 }
  0xf2   : > { %v1705_v5 = vadd.f32 %v1704_v56, %v1472_v43  ;;  %v3961_v18 = vsel %vm724_vm3, %v847_v27, %v851_v46 }
  0xf4   : > { %v3957_v34 = vadd.f32 %v1793_v19, %v1705_v5 }
  0xf6   : > { %4428 = vst [vmem:[#allocation30_spill] sm:$0xff] %v3957_v34 }
  0xf7   : > { %v1473_v43 = vpop.f32.mrf.mxu2  ;;  %v1706_v47 = vpop.f32.mrf.mxu3 }
  0xf8   : > { %v1474_v56 = vadd.f32 %v1473_v43, %v1385_v38  ;;  %v1798_v53 = vpop.f32.mrf.mxu0  ;;  %v1387_v22 = vpop.f32.mrf.mxu1  ;;  %v856_v38 = vshll.u32 %v3624_v25, 16  ;;  %v863_v43 = vrot.slane %v861_v42, 1 }
  0xf9   : > { %v1388_v28 = vadd.f32 %v1387_v22, %v3820_v3  ;;  %v854_v3 = vshrl.u32 %v3624_v25, 16 }
  0xfa   : > { %v1707_v57 = vadd.f32 %v1706_v47, %v1474_v56  ;;  %v858_v5 = vrot.slane %v856_v38, 1  ;;  %v1008_v47 = vrot.slane %v3624_v25, 1 }
  0xfb   : > { %1426 = vmatmul.bf16.gmra.mxu1 %v3961_v18  ;;  %1837 = vmatmul.bf16.gmra.mxu0 %v3929_v8 }
  0xfc   : > { %1515 = vmatmul.bf16.gmra.mxu2 %v3964_v60  ;;  %v3971_v19 = vadd.f32 %v1795_v59, %v1707_v57  ;;  %1748 = vmatmul.bf16.gmra.mxu3 %v3420_v52  ;;  %v859_v59 = vor.u32 %v858_v5, %v854_v3  ;;  %v1009_v57 = vrot.slane %v718_v24, 1 }
  0xfe   : > { %4430 = vst [vmem:[#allocation32_spill] sm:$0xff] %v3971_v19  ;;  %v3983_v34 = vsel %vm724_vm3, %v859_v59, %v863_v43  ;;  %v3986_v60 = vsel %vm975_vm4, %v1008_v47, %v1009_v57  ;;  %v3149_v47 = vld [vmem:[%s4368_s3 + $0x88] sm:$0xff] }
  0xff   : > { %v1476_v17 = vpop.f32.mrf.mxu2  ;;  %v1709_v11 = vpop.f32.mrf.mxu3  ;;  %v3197_v57 = vld [vmem:[%s4368_s3 + $0x208] sm:$0xff]  ;;  %1879 = vmatpush.bf16.msra.mxu1 %v3149_v47  ;;  %v878_v47 = vshrl.u32 %v3429_v61, 16 }
 0x100   : > { %v1477_v13 = vadd.f32 %v1476_v17, %v1388_v28  ;;  %v1800_v22 = vpop.f32.mrf.mxu0  ;;  %v1389_v27 = vpop.f32.mrf.mxu1  ;;  %2339 = vmatpush.bf16.msra.mxu0 %v3197_v57 }
 0x101   : > { %v1390_v1 = vadd.f32 %v1389_v27, %v3842_v37  ;;  %v866_v27 = vshrl.u32 %v3672_v33, 16 }
 0x102   : > { %v1710_v46 = vadd.f32 %v1709_v11, %v1477_v13  ;;  %v719_v11 = vsel %vm3382_vm2, %v3657_v12, 0 }
 0x104   : > { %v3979_v56 = vadd.f32 %v1798_v53, %v1710_v46  ;;  %v868_v53 = vshll.u32 %v3672_v33, 16 }
 0x106   : > { %v870_v46 = vrot.slane %v868_v53, 1 }
 0x107   : > { %v1478_v55 = vpop.f32.mrf.mxu2  ;;  %v1711_v28 = vpop.f32.mrf.mxu3 }
 0x108   : > { %v1479_v19 = vadd.f32 %v1478_v55, %v1390_v1  ;;  %v1803_v17 = vpop.f32.mrf.mxu0  ;;  %v1392_v38 = vpop.f32.mrf.mxu1  ;;  %v873_v1 = vshll.u32 %v719_v11, 16  ;;  %v871_v55 = vor.u32 %v870_v46, %v866_v27 }
 0x109   : > { %v1393_v37 = vadd.f32 %v1392_v38, %v3852_v62  ;;  %v3181_v62 = vld [vmem:[%s4368_s3 + $0x188] sm:$0xff] }
 0x10a   : > { %v1712_v13 = vadd.f32 %v1711_v28, %v1479_v19  ;;  %v3189_v19 = vld [vmem:[%s4368_s3 + $0x1c8] sm:$0xff]  ;;  %2161 = vmatpush.bf16.msra.mxu2 %v3181_v62  ;;  %v875_v28 = vrot.slane %v873_v1, 1  ;;  %v720_v1 = vsel %vm3382_vm2, %v3390_v30, 0 }
 0x10b   : > { %1431 = vmatmul.bf16.gmra.mxu1 %v3983_v34  ;;  %1842 = vmatmul.bf16.gmra.mxu0 %v3961_v18 }
 0x10c   : > { %1520 = vmatmul.bf16.gmra.mxu2 %v3986_v60  ;;  %v3993_v24 = vadd.f32 %v1800_v22, %v1712_v13  ;;  %1753 = vmatmul.bf16.gmra.mxu3 %v3528_v39  ;;  %v1011_v13 = vrot.slane %v3672_v33, 1 }
 0x10d   : > { %2250 = vmatpush.bf16.msra.mxu3 %v3189_v19 }
 0x10f   : > { %v1481_v3 = vpop.f32.mrf.mxu2  ;;  %v1714_v22 = vpop.f32.mrf.mxu3 }
 0x110   : > { %v1482_v5 = vadd.f32 %v1481_v3, %v1393_v37  ;;  %v1805_v42 = vpop.f32.mrf.mxu0  ;;  %v1394_v59 = vpop.f32.mrf.mxu1  ;;  %v1012_v37 = vrot.slane %v719_v11, 1  ;;  %v4017_v3 = vsel %vm724_vm3, %v871_v55, %v875_v28  ;;  %v885_v55 = vshll.u32 %v720_v1, 16 }
 0x111   : > { %v1395_v43 = vadd.f32 %v1394_v59, %v3880_v54 }
 0x112   : > { %v1715_v12 = vadd.f32 %v1714_v22, %v1482_v5  ;;  %v4020_v22 = vsel %vm975_vm4, %v1011_v13, %v1012_v37 }
 0x114   : > { %v4013_v38 = vadd.f32 %v1803_v17, %v1715_v12  ;;  %v880_v17 = vshll.u32 %v3429_v61, 16 }
 0x116   : > { %4431 = vst [vmem:[#allocation33_spill] sm:$0xff] %v4013_v38  ;;  %v882_v57 = vrot.slane %v880_v17, 1 }
 0x117   : > { %v1483_v53 = vpop.f32.mrf.mxu2  ;;  %v1716_v54 = vpop.f32.mrf.mxu3 }
 0x118   : > { %v1484_v62 = vadd.f32 %v1483_v53, %v1395_v43  ;;  %v1808_v19 = vpop.f32.mrf.mxu0  ;;  %v1397_v5 = vpop.f32.mrf.mxu1  ;;  %v887_v53 = vrot.slane %v885_v55, 1 }
 0x119   : > { %v1398_v46 = vadd.f32 %v1397_v5, %v3896_v15  ;;  %v1015_v5 = vrot.slane %v720_v1, 1  ;;  %v721_v1 = vsel %vm3382_vm2, %v3494_v9, 0 }
 0x11a   : > { %v1717_v27 = vadd.f32 %v1716_v54, %v1484_v62  ;;  %v1014_v54 = vrot.slane %v3429_v61, 1  ;;  %v897_v9 = vshll.u32 %v721_v1, 16 }
 0x11b   : > { %1436 = vmatmul.bf16.gmra.mxu1 %v4017_v3  ;;  %1847 = vmatmul.bf16.gmra.mxu0 %v3983_v34 }
 0x11c   : > { %1525 = vmatmul.bf16.gmra.mxu2 %v4020_v22  ;;  %v4027_v11 = vadd.f32 %v1805_v42, %v1717_v27  ;;  %1758 = vmatmul.bf16.gmra.mxu3 %v3624_v25  ;;  %v883_v42 = vor.u32 %v882_v57, %v878_v47  ;;  %v4042_v38 = vsel %vm975_vm4, %v1014_v54, %v1015_v5  ;;  %v3188_v47 = vld [vmem:[%s4368_s3 + $0x1c0] sm:$0xff] }
 0x11d   : > { %2251 = vmatpush.bf16.msra.mxu3 %v3188_v47  ;;  %v3148_v5 = vld [vmem:[%s4368_s3 + $0x80] sm:$0xff] }
 0x11e   : > { %4432 = vst [vmem:[#allocation34_spill] sm:$0xff] %v4027_v11  ;;  %v4039_v11 = vsel %vm724_vm3, %v883_v42, %v887_v53  ;;  %1880 = vmatpush.bf16.msra.mxu1 %v3148_v5 }
 0x11f   : > { %v1486_v59 = vpop.f32.mrf.mxu2  ;;  %v1719_v43 = vpop.f32.mrf.mxu3 }
 0x120   : > { %v1487_v12 = vadd.f32 %v1486_v59, %v1398_v46  ;;  %v1810_v15 = vpop.f32.mrf.mxu0  ;;  %v1399_v28 = vpop.f32.mrf.mxu1 }
 0x121   : > { %v1400_v37 = vadd.f32 %v1399_v28, %v3918_v20  ;;  %v892_v20 = vshll.u32 %v3532_v40, 16 }
 0x122   : > { %v1720_v13 = vadd.f32 %v1719_v43, %v1487_v12  ;;  %v3180_v43 = vld [vmem:[%s4368_s3 + $0x180] sm:$0xff] }
 0x123   : > { %2162 = vmatpush.bf16.msra.mxu2 %v3180_v43  ;;  %v894_v42 = vrot.slane %v892_v20, 1 }
 0x124   : > { %v4035_v62 = vadd.f32 %v1808_v19, %v1720_v13 }
 0x127   : > { %v1488_v30 = vpop.f32.mrf.mxu2  ;;  %v1721_v46 = vpop.f32.mrf.mxu3 }
 0x128   : > { %v1489_v27 = vadd.f32 %v1488_v30, %v1400_v37  ;;  %v1813_v59 = vpop.f32.mrf.mxu0  ;;  %v1402_v17 = vpop.f32.mrf.mxu1  ;;  %v890_v37 = vshrl.u32 %v3532_v40, 16 }
 0x129   : > { %v1403_v57 = vadd.f32 %v1402_v17, %v3778_v31  ;;  %v3196_v31 = vld [vmem:[%s4368_s3 + $0x200] sm:$0xff]  ;;  %v1017_v17 = vrot.slane %v3532_v40, 1 }
 0x12a   : > { %v1722_v12 = vadd.f32 %v1721_v46, %v1489_v27  ;;  %v895_v30 = vor.u32 %v894_v42, %v890_v37  ;;  %v899_v27 = vrot.slane %v897_v9, 1  ;;  %2340 = vmatpush.bf16.msra.mxu0 %v3196_v31 }
 0x12b   : > { %1441 = vmatmul.bf16.gmra.mxu1 %v4039_v11  ;;  %1852 = vmatmul.bf16.gmra.mxu0 %v4017_v3 }
 0x12c   : > { %1530 = vmatmul.bf16.gmra.mxu2 %v4042_v38  ;;  %v4048_v19 = vadd.f32 %v1810_v15, %v1722_v12  ;;  %1763 = vmatmul.bf16.gmra.mxu3 %v3672_v33  ;;  %v1018_v12 = vrot.slane %v721_v1, 1  ;;  %v722_v1 = vsel %vm3382_vm2, %v3611_v14, 0 }
 0x12e   : > { %v4076_v37 = vsel %vm975_vm4, %v1017_v17, %v1018_v12  ;;  %v909_v17 = vshll.u32 %v722_v1, 16 }
 0x12f   : > { %v1491_v55 = vpop.f32.mrf.mxu2  ;;  %v1724_v28 = vpop.f32.mrf.mxu3 }
 0x130   : > { %v1492_v15 = vadd.f32 %v1491_v55, %v1403_v57  ;;  %v1815_v13 = vpop.f32.mrf.mxu0  ;;  %v1404_v53 = vpop.f32.mrf.mxu1 }
 0x131   : > { %v1405_v20 = vadd.f32 %v1404_v53, %v3806_v50  ;;  %v904_v50 = vshll.u32 %v3634_v41, 16 }
 0x132   : > { %v1725_v54 = vadd.f32 %v1724_v28, %v1492_v15  ;;  %v4073_v15 = vsel %vm724_vm3, %v895_v30, %v899_v27  ;;  %v902_v30 = vshrl.u32 %v3634_v41, 16 }
 0x133   : > { %v906_v27 = vrot.slane %v904_v50, 1 }
 0x134   : > { %v4068_v46 = vadd.f32 %v1813_v59, %v1725_v54 }
 0x136   : > { %4433 = vst [vmem:[#allocation35_spill] sm:$0xff] %v4068_v46 }
 0x137   : > { %v1493_v43 = vpop.f32.mrf.mxu2  ;;  %v1726_v57 = vpop.f32.mrf.mxu3 }
 0x138   : > { %v1494_v47 = vadd.f32 %v1493_v43, %v1405_v20  ;;  %v1818_v55 = vpop.f32.mrf.mxu0  ;;  %v1407_v28 = vpop.f32.mrf.mxu1  ;;  %v911_v43 = vrot.slane %v909_v17, 1 }
 0x139   : > { %v1408_v9 = vadd.f32 %v1407_v28, %v3822_v6 }
 0x13a   : > { %v1727_v42 = vadd.f32 %v1726_v57, %v1494_v47  ;;  %v1020_v57 = vrot.slane %v3634_v41, 1 }
 0x13b   : > { %1446 = vmatmul.bf16.gmra.mxu1 %v4073_v15  ;;  %1857 = vmatmul.bf16.gmra.mxu0 %v4039_v11 }
 0x13c   : > { %1535 = vmatmul.bf16.gmra.mxu2 %v4076_v37  ;;  %v4082_v59 = vadd.f32 %v1815_v13, %v1727_v42  ;;  %1768 = vmatmul.bf16.gmra.mxu3 %v3429_v61  ;;  %v907_v13 = vor.u32 %v906_v27, %v902_v30  ;;  %v1021_v42 = vrot.slane %v722_v1, 1  ;;  %v723_v1 = vsel %vm3382_vm2, %v3668_v29, 0 }
 0x13d   : > { %v1024_v21 = vrot.slane %v723_v1, 1 }
 0x13e   : > { %4434 = vst [vmem:[#allocation36_spill] sm:$0xff] %v4082_v59  ;;  %v4095_v59 = vsel %vm724_vm3, %v907_v13, %v911_v43  ;;  %v4098_v46 = vsel %vm975_vm4, %v1020_v57, %v1021_v42  ;;  %v921_v43 = vshll.u32 %v723_v1, 16 }
 0x13f   : > { %v1496_v53 = vpop.f32.mrf.mxu2  ;;  %v1729_v5 = vpop.f32.mrf.mxu3 }
 0x140   : > { %v1497_v54 = vadd.f32 %v1496_v53, %v1408_v9  ;;  %v1820_v31 = vpop.f32.mrf.mxu0  ;;  %v1409_v12 = vpop.f32.mrf.mxu1 }
 0x141   : > { %v1410_v14 = vadd.f32 %v1409_v12, %v3844_v63  ;;  %v916_v63 = vshll.u32 %v3680_v35, 16 }
 0x142   : > { %v1730_v20 = vadd.f32 %v1729_v5, %v1497_v54 }
 0x143   : > { %v918_v13 = vrot.slane %v916_v63, 1 }
 0x144   : > { %v4090_v47 = vadd.f32 %v1818_v55, %v1730_v20  ;;  %v914_v20 = vshrl.u32 %v3680_v35, 16 }
 0x147   : > { %v1498_v6 = vpop.f32.mrf.mxu2  ;;  %v1731_v9 = vpop.f32.mrf.mxu3 }
 0x148   : > { %v1499_v28 = vadd.f32 %v1498_v6, %v1410_v14  ;;  %v1823_v53 = vpop.f32.mrf.mxu0  ;;  %v1412_v50 = vpop.f32.mrf.mxu1  ;;  %v923_v14 = vrot.slane %v921_v43, 1 }
 0x149   : > { %v1413_v5 = vadd.f32 %v1412_v50, %v3854_v48 }
 0x14a   : > { %v1732_v54 = vadd.f32 %v1731_v9, %v1499_v28  ;;  %v1023_v28 = vrot.slane %v3680_v35, 1 }
 0x14b   : > { %1451 = vmatmul.bf16.gmra.mxu1 %v4095_v59  ;;  %1862 = vmatmul.bf16.gmra.mxu0 %v4073_v15 }
 0x14c   : > { %1540 = vmatmul.bf16.gmra.mxu2 %v4098_v46  ;;  %v4104_v55 = vadd.f32 %v1820_v31, %v1732_v54  ;;  %1773 = vmatmul.bf16.gmra.mxu3 %v3532_v40  ;;  %v919_v31 = vor.u32 %v918_v13, %v914_v20 }
 0x14f   : > { %v1501_v30 = vpop.f32.mrf.mxu2  ;;  %v1734_v17 = vpop.f32.mrf.mxu3 }
 0x150   : > { %v1502_v27 = vadd.f32 %v1501_v30, %v1413_v5  ;;  %v1825_v12 = vpop.f32.mrf.mxu0  ;;  %v1414_v57 = vpop.f32.mrf.mxu1  ;;  %v4117_v5 = vsel %vm724_vm3, %v919_v31, %v923_v14  ;;  %v4120_v30 = vsel %vm975_vm4, %v1023_v28, %v1024_v21 }
 0x151   : > { %v1415_v29 = vadd.f32 %v1414_v57, %v3882_v4 }
 0x152   : > { %v1735_v42 = vadd.f32 %v1734_v17, %v1502_v27 }
 0x154   : > { %v4112_v6 = vadd.f32 %v1823_v53, %v1735_v42 }
 0x157   : > { %v1503_v48 = vpop.f32.mrf.mxu2  ;;  %v1736_v50 = vpop.f32.mrf.mxu3 }
 0x158   : > { %v1504_v9 = vadd.f32 %v1503_v48, %v1415_v29  ;;  %v1828_v54 = vpop.f32.mrf.mxu0  ;;  %v1417_v63 = vpop.f32.mrf.mxu1 }
 0x159   : > { %v1418_v4 = vadd.f32 %v1417_v63, %v3898_v36 }
 0x15a   : > { %v1737_v27 = vadd.f32 %v1736_v50, %v1504_v9 }
 0x15b   : > { %1456 = vmatmul.bf16.gmra.mxu1 %v4117_v5  ;;  %1867 = vmatmul.bf16.gmra.mxu0 %v4095_v59 }
 0x15c   : > { %1545 = vmatmul.bf16.gmra.mxu2 %v4120_v30  ;;  %v4125_v53 = vadd.f32 %v1825_v12, %v1737_v27  ;;  %1778 = vmatmul.bf16.gmra.mxu3 %v3634_v41 }
 0x15f   : > { %v1506_v1 = vpop.f32.mrf.mxu2  ;;  %v1739_v20 = vpop.f32.mrf.mxu3 }
 0x160   : > { %v1507_v17 = vadd.f32 %v1506_v1, %v1418_v4  ;;  %v1830_v13 = vpop.f32.mrf.mxu0  ;;  %v1419_v43 = vpop.f32.mrf.mxu1 }
 0x161   : > { %v1420_v31 = vadd.f32 %v1419_v43, %v3921_v32 }
 0x162   : > { %v1740_v57 = vadd.f32 %v1739_v20, %v1507_v17 }
 0x164   : > { %v4129_v42 = vadd.f32 %v1828_v54, %v1740_v57 }
 0x167   : > { %v1508_v14 = vpop.f32.mrf.mxu2  ;;  %v1741_v21 = vpop.f32.mrf.mxu3 }
 0x168   : > { %v1509_v28 = vadd.f32 %v1508_v14, %v1420_v31  ;;  %v1833_v29 = vpop.f32.mrf.mxu0  ;;  %v1422_v12 = vpop.f32.mrf.mxu1 }
 0x169   : > { %v1423_v9 = vadd.f32 %v1422_v12, %v3800_v45 }
 0x16a   : > { %v1742_v48 = vadd.f32 %v1741_v21, %v1509_v28 }
 0x16b   : > { %1881 = vmatmul.bf16.vlgmr.msra.gmra.mxu1 %v3690_v49  ;;  %2341 = vmatmul.bf16.vlgmr.msra.gmra.mxu0 %v3721_v10 }
 0x16c   : > { %2163 = vmatmul.bf16.vlgmr.msra.gmra.mxu2 %v3516_v26  ;;  %v4135_v36 = vadd.f32 %v1830_v13, %v1742_v48  ;;  %2252 = vmatmul.bf16.vlgmr.msra.gmra.mxu3 %v3718_v7 }
 0x16f   : > { %v1511_v50 = vpop.f32.mrf.mxu2  ;;  %v1744_v54 = vpop.f32.mrf.mxu3 }
 0x170   : > { %v1512_v32 = vadd.f32 %v1511_v50, %v1423_v9  ;;  %v1835_v63 = vpop.f32.mrf.mxu0  ;;  %v1424_v27 = vpop.f32.mrf.mxu1 }
 0x171   : > { %v1425_v17 = vadd.f32 %v1424_v27, %v3816_v0 }
 0x172   : > { %v1745_v4 = vadd.f32 %v1744_v54, %v1512_v32 }
 0x174   : > { %v4139_v1 = vadd.f32 %v1833_v29, %v1745_v4  ;;  %v4437_v4 = vld [vmem:[#allocation7_spill] sm:$0xff] }
 0x177   : > { %v1513_v20 = vpop.f32.mrf.mxu2  ;;  %v1746_v57 = vpop.f32.mrf.mxu3 }
 0x178   : > { %v1514_v43 = vadd.f32 %v1513_v20, %v1425_v17  ;;  %v1838_v26 = vpop.f32.mrf.mxu0  ;;  %v1427_v13 = vpop.f32.mrf.mxu1  ;;  %v4438_v17 = vld [vmem:[#allocation19_spill] sm:$0xff] }
 0x179   : > { %v1428_v45 = vadd.f32 %v1427_v13, %v3838_v16  ;;  %v4436_v16 = vld [vmem:[#allocation5_spill] sm:$0xff] }
 0x17a   : > { %v1747_v31 = vadd.f32 %v1746_v57, %v1514_v43 }
 0x17b   : > { %1886 = vmatmul.bf16.gmra.mxu1 %v3694_v51  ;;  %2346 = vmatmul.bf16.gmra.mxu0 %v3736_v44 }
 0x17c   : > { %2168 = vmatmul.bf16.gmra.mxu2 %v3616_v23  ;;  %v4145_v7 = vadd.f32 %v1835_v63, %v1747_v31  ;;  %2257 = vmatmul.bf16.gmra.mxu3 %v3733_v2  ;;  %v4435_v2 = vld [vmem:[#allocation8_spill] sm:$0xff] }
 0x17f   : > { %v1516_v14 = vpop.f32.mrf.mxu2  ;;  %v1749_v28 = vpop.f32.mrf.mxu3 }
 0x180   : > { %v1517_v0 = vadd.f32 %v1516_v14, %v1428_v45  ;;  %v1840_v21 = vpop.f32.mrf.mxu0  ;;  %v1429_v29 = vpop.f32.mrf.mxu1  ;;  %v4439_v14 = vld [vmem:[#allocation21_spill] sm:$0xff] }
 0x181   : > { %v1430_v51 = vadd.f32 %v1429_v29, %v3848_v58 }
 0x182   : > { %v1750_v12 = vadd.f32 %v1749_v28, %v1517_v0 }
 0x184   : > { %v4149_v48 = vadd.f32 %v1838_v26, %v1750_v12 }
 0x187   : > { %v1518_v9 = vpop.f32.mrf.mxu2  ;;  %v1751_v32 = vpop.f32.mrf.mxu3 }
 0x188   : > { %v1519_v50 = vadd.f32 %v1518_v9, %v1430_v51  ;;  %v1843_v23 = vpop.f32.mrf.mxu0  ;;  %v1432_v54 = vpop.f32.mrf.mxu1  ;;  %v4440_v9 = vld [vmem:[#allocation10_spill] sm:$0xff] }
 0x189   : > { %v1433_v20 = vadd.f32 %v1432_v54, %v4438_v17  ;;  %v4442_v54 = vld [vmem:[#allocation9_spill] sm:$0xff] }
 0x18a   : > { %v1752_v63 = vadd.f32 %v1751_v32, %v1519_v50  ;;  %v4441_v50 = vld [vmem:[#allocation2_spill] sm:$0xff] }
 0x18b   : > { %1891 = vmatmul.bf16.gmra.mxu1 %v3721_v10  ;;  %2351 = vmatmul.bf16.gmra.mxu0 %v4435_v2 }
 0x18c   : > { %2173 = vmatmul.bf16.gmra.mxu2 %v4436_v16  ;;  %v4155_v27 = vadd.f32 %v1840_v21, %v1752_v63  ;;  %2262 = vmatmul.bf16.gmra.mxu3 %v4437_v4 }
 0x18f   : > { %v1521_v43 = vpop.f32.mrf.mxu2  ;;  %v1754_v57 = vpop.f32.mrf.mxu3 }
 0x190   : > { %v1522_v58 = vadd.f32 %v1521_v43, %v1433_v20  ;;  %v1845_v26 = vpop.f32.mrf.mxu0  ;;  %v1434_v13 = vpop.f32.mrf.mxu1 }
 0x191   : > { %v1435_v10 = vadd.f32 %v1434_v13, %v4439_v14  ;;  %v4444_v13 = vld [vmem:[#allocation27_spill] sm:$0xff] }
 0x192   : > { %v1755_v31 = vadd.f32 %v1754_v57, %v1522_v58 }
 0x194   : > { %v4159_v45 = vadd.f32 %v1843_v23, %v1755_v31  ;;  %v4443_v23 = vld [vmem:[#allocation25_spill] sm:$0xff] }
 0x197   : > { %v1523_v0 = vpop.f32.mrf.mxu2  ;;  %v1756_v29 = vpop.f32.mrf.mxu3 }
 0x198   : > { %v1524_v28 = vadd.f32 %v1523_v0, %v1435_v10  ;;  %v1848_v12 = vpop.f32.mrf.mxu0  ;;  %v1437_v21 = vpop.f32.mrf.mxu1 }
 0x199   : > { %v1438_v63 = vadd.f32 %v1437_v21, %v4443_v23  ;;  %v4446_v21 = vld [vmem:[#allocation3_spill] sm:$0xff] }
 0x19a   : > { %v1757_v51 = vadd.f32 %v1756_v29, %v1524_v28  ;;  %v4445_v29 = vld [vmem:[#allocation14_spill] sm:$0xff] }
 0x19b   : > { %1896 = vmatmul.bf16.gmra.mxu1 %v3736_v44  ;;  %2356 = vmatmul.bf16.gmra.mxu0 %v4440_v9 }
 0x19c   : > { %2178 = vmatmul.bf16.gmra.mxu2 %v4441_v50  ;;  %v4165_v32 = vadd.f32 %v1845_v26, %v1757_v51  ;;  %2267 = vmatmul.bf16.gmra.mxu3 %v4442_v54  ;;  %v4447_v50 = vld [vmem:[#allocation13_spill] sm:$0xff] }
 0x19f   : > { %v1526_v16 = vpop.f32.mrf.mxu2  ;;  %v1759_v17 = vpop.f32.mrf.mxu3 }
 0x1a0   : > { %v1527_v4 = vadd.f32 %v1526_v16, %v1438_v63  ;;  %v1850_v20 = vpop.f32.mrf.mxu0  ;;  %v1439_v43 = vpop.f32.mrf.mxu1 }
 0x1a1   : > { %v1440_v44 = vadd.f32 %v1439_v43, %v4444_v13  ;;  %v4450_v13 = vld [vmem:[#allocation12_spill] sm:$0xff] }
 0x1a2   : > { %v1760_v58 = vadd.f32 %v1759_v17, %v1527_v4 }
 0x1a4   : > { %v4169_v57 = vadd.f32 %v1848_v12, %v1760_v58  ;;  %v4448_v12 = vld [vmem:[#allocation11_spill] sm:$0xff] }
 0x1a7   : > { %v1528_v31 = vpop.f32.mrf.mxu2  ;;  %v1761_v10 = vpop.f32.mrf.mxu3 }
 0x1a8   : > { %v1529_v14 = vadd.f32 %v1528_v31, %v1440_v44  ;;  %v1853_v0 = vpop.f32.mrf.mxu0  ;;  %v1442_v26 = vpop.f32.mrf.mxu1 }
 0x1a9   : > { %v1443_v54 = vadd.f32 %v1442_v26, %v4448_v12  ;;  %v4452_v26 = vld [vmem:[#allocation4_spill] sm:$0xff]  ;;  %v4454_v12 = vld [vmem:[#allocation17_spill] sm:$0xff] }
 0x1aa   : > { %v1762_v28 = vadd.f32 %v1761_v10, %v1529_v14 }
 0x1ab   : > { %1901 = vmatmul.bf16.gmra.mxu1 %v4435_v2  ;;  %2361 = vmatmul.bf16.gmra.mxu0 %v4445_v29 }
 0x1ac   : > { %2183 = vmatmul.bf16.gmra.mxu2 %v4446_v21  ;;  %v4175_v51 = vadd.f32 %v1850_v20, %v1762_v28  ;;  %2272 = vmatmul.bf16.gmra.mxu3 %v4447_v50  ;;  %v4451_v21 = vld [vmem:[#allocation18_spill] sm:$0xff] }
 0x1af   : > { %v1531_v23 = vpop.f32.mrf.mxu2  ;;  %v1764_v16 = vpop.f32.mrf.mxu3 }
 0x1b0   : > { %v1532_v63 = vadd.f32 %v1531_v23, %v1443_v54  ;;  %v1855_v4 = vpop.f32.mrf.mxu0  ;;  %v1444_v17 = vpop.f32.mrf.mxu1 }
 0x1b1   : > { %v1445_v2 = vadd.f32 %v1444_v17, %v4450_v13 }
 0x1b2   : > { %v1765_v43 = vadd.f32 %v1764_v16, %v1532_v63 }
 0x1b4   : > { %v4179_v58 = vadd.f32 %v1853_v0, %v1765_v43  ;;  %v4455_v0 = vld [vmem:[#allocation15_spill] sm:$0xff] }
 0x1b6   : > { %4449 = vst [vmem:[#allocation8_spill] sm:$0xff] %v4179_v58 }
 0x1b7   : > { %v1533_v44 = vpop.f32.mrf.mxu2  ;;  %v1766_v14 = vpop.f32.mrf.mxu3 }
 0x1b8   : > { %v1534_v31 = vadd.f32 %v1533_v44, %v1445_v2  ;;  %v1858_v10 = vpop.f32.mrf.mxu0  ;;  %v1447_v20 = vpop.f32.mrf.mxu1  ;;  %v4457_v44 = vld [vmem:[#allocation16_spill] sm:$0xff] }
 0x1b9   : > { %v1448_v54 = vadd.f32 %v1447_v20, %v4455_v0  ;;  %v4459_v20 = vld [vmem:[#allocation6_spill] sm:$0xff] }
 0x1ba   : > { %v1767_v28 = vadd.f32 %v1766_v14, %v1534_v31 }
 0x1bb   : > { %1906 = vmatmul.bf16.gmra.mxu1 %v4440_v9  ;;  %2366 = vmatmul.bf16.gmra.mxu0 %v4451_v21 }
 0x1bc   : > { %2188 = vmatmul.bf16.gmra.mxu2 %v4452_v26  ;;  %v4185_v50 = vadd.f32 %v1855_v4, %v1767_v28  ;;  %2277 = vmatmul.bf16.gmra.mxu3 %v4454_v12  ;;  %v4458_v12 = vld [vmem:[#allocation24_spill] sm:$0xff] }
 0x1be   : > { %4453 = vst [vmem:[#allocation5_spill] sm:$0xff] %v4185_v50 }
 0x1bf   : > { %v1536_v23 = vpop.f32.mrf.mxu2  ;;  %v1769_v16 = vpop.f32.mrf.mxu3 }
 0x1c0   : > { %v1537_v63 = vadd.f32 %v1536_v23, %v1448_v54  ;;  %v1860_v17 = vpop.f32.mrf.mxu0  ;;  %v1449_v43 = vpop.f32.mrf.mxu1  ;;  %v4460_v54 = vld [vmem:[#allocation23_spill] sm:$0xff] }
 0x1c1   : > { %v1450_v9 = vadd.f32 %v1449_v43, %v4457_v44 }
 0x1c2   : > { %v1770_v13 = vadd.f32 %v1769_v16, %v1537_v63 }
 0x1c4   : > { %v4189_v2 = vadd.f32 %v1858_v10, %v1770_v13  ;;  %v4461_v10 = vld [vmem:[#allocation20_spill] sm:$0xff] }
 0x1c6   : > { %4456 = vst [vmem:[#allocation7_spill] sm:$0xff] %v4189_v2 }
 0x1c7   : > { %v1538_v31 = vpop.f32.mrf.mxu2  ;;  %v1771_v58 = vpop.f32.mrf.mxu3 }
 0x1c8   : > { %v1539_v14 = vadd.f32 %v1538_v31, %v1450_v9  ;;  %v1863_v26 = vpop.f32.mrf.mxu0  ;;  %v1452_v4 = vpop.f32.mrf.mxu1 }
 0x1c9   : > { %v1453_v23 = vadd.f32 %v1452_v4, %v4461_v10 }
 0x1ca   : > { %v1772_v28 = vadd.f32 %v1771_v58, %v1539_v14  ;;  %v4462_v58 = vld [vmem:[#allocation22_spill] sm:$0xff] }
 0x1cb   : > { %1911 = vmatmul.bf16.gmra.mxu1 %v4445_v29  ;;  %2371 = vmatmul.bf16.gmra.mxu0 %v4458_v12 }
 0x1cc   : > { %2193 = vmatmul.bf16.gmra.mxu2 %v4459_v20  ;;  %v4195_v0 = vadd.f32 %v1860_v17, %v1772_v28  ;;  %2282 = vmatmul.bf16.gmra.mxu3 %v4460_v54  ;;  %v4463_v54 = vld [vmem:[#allocation29_spill] sm:$0xff] }
 0x1cf   : > { %v1541_v63 = vpop.f32.mrf.mxu2  ;;  %v1774_v43 = vpop.f32.mrf.mxu3 }
 0x1d0   : > { %v1542_v16 = vadd.f32 %v1541_v63, %v1453_v23  ;;  %v1865_v13 = vpop.f32.mrf.mxu0  ;;  %v1454_v44 = vpop.f32.mrf.mxu1 }
 0x1d1   : > { %v1455_v29 = vadd.f32 %v1454_v44, %v4462_v58 }
 0x1d2   : > { %v1775_v9 = vadd.f32 %v1774_v43, %v1542_v16 }
 0x1d4   : > { %v4199_v31 = vadd.f32 %v1863_v26, %v1775_v9  ;;  %v4464_v26 = vld [vmem:[#allocation26_spill] sm:$0xff] }
 0x1d7   : > { %v1543_v14 = vpop.f32.mrf.mxu2  ;;  %v1776_v50 = vpop.f32.mrf.mxu3 }
 0x1d8   : > { %v1544_v2 = vadd.f32 %v1543_v14, %v1455_v29  ;;  %v1868_v20 = vpop.f32.mrf.mxu0  ;;  %v1457_v17 = vpop.f32.mrf.mxu1 }
 0x1d9   : > { %v1458_v10 = vadd.f32 %v1457_v17, %v4464_v26 }
 0x1da   : > { %v1777_v28 = vadd.f32 %v1776_v50, %v1544_v2  ;;  %v4466_v50 = vld [vmem:[#allocation28_spill] sm:$0xff] }
 0x1db   : > { %1916 = vmatmul.bf16.gmra.mxu1 %v4451_v21  ;;  %2376 = vmatmul.bf16.gmra.mxu0 %v4463_v54 }
 0x1dc   : > { %2198 = vmatmul.bf16.gmra.mxu2 %v3420_v52  ;;  %v4205_v4 = vadd.f32 %v1865_v13, %v1777_v28  ;;  %2287 = vmatmul.bf16.gmra.mxu3 %v3929_v8  ;;  %v4467_v8 = vld [vmem:[#allocation31_spill] sm:$0xff] }
 0x1df   : > { %v1546_v23 = vpop.f32.mrf.mxu2  ;;  %v1779_v16 = vpop.f32.mrf.mxu3 }
 0x1e0   : > { %v1547_v63 = vadd.f32 %v1546_v23, %v1458_v10  ;;  %v1870_v43 = vpop.f32.mrf.mxu0  ;;  %v1459_v44 = vpop.f32.mrf.mxu1 }
 0x1e1   : > { %v1460_v21 = vadd.f32 %v1459_v44, %v4466_v50 }
 0x1e2   : > { %v1780_v9 = vadd.f32 %v1779_v16, %v1547_v63  ;;  %v4469_v16 = vld [vmem:[#allocation30_spill] sm:$0xff] }
 0x1e4   : > { %v4209_v58 = vadd.f32 %v1868_v20, %v1780_v9 }
 0x1e6   : > { %4465 = vst [vmem:[#allocation19_spill] sm:$0xff] %v4209_v58 }
 0x1e7   : > { %v1548_v2 = vpop.f32.mrf.mxu2  ;;  %v1781_v14 = vpop.f32.mrf.mxu3 }
 0x1e8   : > { %v1549_v29 = vadd.f32 %v1548_v2, %v1460_v21  ;;  %v2342_v52 = vpop.f32.mrf.mxu0  ;;  %v1882_v13 = vpop.f32.mrf.mxu1 }
 0x1e9   : > { %v1883_v44 = vadd.f32 %v1882_v13, %v4469_v16 }
 0x1ea   : > { %v1782_v28 = vadd.f32 %v1781_v14, %v1549_v29  ;;  %v4470_v14 = vld [vmem:[#allocation32_spill] sm:$0xff] }
 0x1eb   : > { %1921 = vmatmul.bf16.gmra.mxu1 %v4458_v12  ;;  %2381 = vmatmul.bf16.gmra.mxu0 %v4467_v8  ;;  %v4222_v12 = vld [vmem:[%s4369_s4] ss:$0 sm:$0xff] }
 0x1ec   : > { %2203 = vmatmul.bf16.gmra.mxu2 %v3528_v39  ;;  %v4215_v17 = vadd.f32 %v1870_v43, %v1782_v28  ;;  %2292 = vmatmul.bf16.gmra.mxu3 %v3961_v18 }
 0x1ee   : > { %4468 = vst [vmem:[#allocation21_spill] sm:$0xff] %v4215_v17 }
 0x1ef   : > { %v2164_v20 = vpop.f32.mrf.mxu2  ;;  %v2253_v26 = vpop.f32.mrf.mxu3 }
 0x1f0   : > { %v2344_v10 = vpop.f32.mrf.mxu0  ;;  %v2254_v23 = vadd.f32 %v2253_v26, %v2164_v20  ;;  %v1884_v63 = vpop.f32.mrf.mxu1 }
 0x1f2   : > { %v2343_v9 = vadd.f32 %v2342_v52, %v2254_v23  ;;  %v1885_v52 = vadd.f32 %v1884_v63, %v4470_v14 }
 0x1f4   : > { %v2422_v50 = vadd.f32 %v2343_v9, %v1883_v44 }
 0x1f6   : > { %v2458_v39 = vadd.f32 %v4222_v12, %v2422_v50 }
 0x1f7   : > { %v2166_v18 = vpop.f32.mrf.mxu2  ;;  %v2255_v43 = vpop.f32.mrf.mxu3 }
 0x1f8   : > { %v2347_v21 = vpop.f32.mrf.mxu0  ;;  %2490 = vst [vmem:[%s4229_s22] sm:$0xff] %v2458_v39  ;;  %v2256_v2 = vadd.f32 %v2255_v43, %v2166_v18  ;;  %v1887_v29 = vpop.f32.mrf.mxu1  ;;  %v2560_v44 = vmul.f32 %v2458_v39, %v2458_v39 }
 0x1f9   : > { %v1888_v18 = vadd.f32 %v1887_v29, %v3979_v56 }
 0x1fa   : > { %v2345_v13 = vadd.f32 %v2344_v10, %v2256_v2 }
 0x1fb   : > { %1926 = vmatmul.bf16.gmra.mxu1 %v4463_v54  ;;  %2386 = vmatmul.bf16.gmra.mxu0 %v3986_v60 }
 0x1fc   : > { %2208 = vmatmul.bf16.gmra.mxu2 %v3624_v25  ;;  %v2423_v28 = vadd.f32 %v2345_v13, %v1885_v52  ;;  %2297 = vmatmul.bf16.gmra.mxu3 %v3983_v34 }
 0x1fe   : > { %v2459_v20 = vadd.f32 %v4222_v12, %v2423_v28 }
 0x1ff   : > { %v2169_v26 = vpop.f32.mrf.mxu2  ;;  %v2258_v23 = vpop.f32.mrf.mxu3 }
 0x200   : > { %v2349_v16 = vpop.f32.mrf.mxu0  ;;  %2491 = vst [vmem:[%s4229_s22 + $0x8] sm:$0xff] %v2459_v20  ;;  %v2522_v9 = vadd.f32 %v2459_v20, %v2458_v39  ;;  %v2561_v63 = vmul.f32 %v2459_v20, %v2459_v20  ;;  %v2259_v10 = vadd.f32 %v2258_v23, %v2169_v26  ;;  %v1889_v50 = vpop.f32.mrf.mxu1 }
 0x201   : > { %v1890_v20 = vadd.f32 %v1889_v50, %v3993_v24 }
 0x202   : > { %v2592_v54 = vadd.f32 %v2561_v63, %v2560_v44  ;;  %v2348_v43 = vadd.f32 %v2347_v21, %v2259_v10 }
 0x204   : > { %v2424_v25 = vadd.f32 %v2348_v43, %v1888_v18 }
 0x206   : > { %v2460_v2 = vadd.f32 %v4222_v12, %v2424_v25 }
 0x207   : > { %v2171_v34 = vpop.f32.mrf.mxu2  ;;  %v2260_v14 = vpop.f32.mrf.mxu3 }
 0x208   : > { %v2352_v52 = vpop.f32.mrf.mxu0  ;;  %2492 = vst [vmem:[%s4229_s22 + $0x10] sm:$0xff] %v2460_v2  ;;  %v2523_v13 = vadd.f32 %v2522_v9, %v2460_v2  ;;  %v2562_v28 = vmul.f32 %v2460_v2, %v2460_v2  ;;  %v2261_v17 = vadd.f32 %v2260_v14, %v2171_v34  ;;  %v1892_v58 = vpop.f32.mrf.mxu1 }
 0x20a   : > { %v2593_v39 = vadd.f32 %v2592_v54, %v2562_v28  ;;  %v2350_v26 = vadd.f32 %v2349_v16, %v2261_v17  ;;  %v4472_v28 = vld [vmem:[#allocation34_spill] sm:$0xff] }
 0x20b   : > { %1931 = vmatmul.bf16.gmra.mxu1 %v4467_v8  ;;  %2391 = vmatmul.bf16.gmra.mxu0 %v4020_v22  ;;  %v4471_v8 = vld [vmem:[#allocation33_spill] sm:$0xff] }
 0x20c   : > { %2213 = vmatmul.bf16.gmra.mxu2 %v3672_v33  ;;  %v2425_v56 = vadd.f32 %v2350_v26, %v1890_v20  ;;  %2302 = vmatmul.bf16.gmra.mxu3 %v4017_v3  ;;  %v1893_v10 = vadd.f32 %v1892_v58, %v4471_v8 }
 0x20e   : > { %v2461_v21 = vadd.f32 %v4222_v12, %v2425_v56 }
 0x20f   : > { %v2174_v29 = vpop.f32.mrf.mxu2  ;;  %v2263_v23 = vpop.f32.mrf.mxu3 }
 0x210   : > { %v2354_v44 = vpop.f32.mrf.mxu0  ;;  %2493 = vst [vmem:[%s4229_s22 + $0x18] sm:$0xff] %v2461_v21  ;;  %v2524_v9 = vadd.f32 %v2523_v13, %v2461_v21  ;;  %v2563_v63 = vmul.f32 %v2461_v21, %v2461_v21  ;;  %v2264_v24 = vadd.f32 %v2263_v23, %v2174_v29  ;;  %v1894_v17 = vpop.f32.mrf.mxu1 }
 0x211   : > { %v1895_v20 = vadd.f32 %v1894_v17, %v4472_v28 }
 0x212   : > { %v2594_v16 = vadd.f32 %v2593_v39, %v2563_v63  ;;  %v2353_v50 = vadd.f32 %v2352_v52, %v2264_v24 }
 0x214   : > { %v2426_v54 = vadd.f32 %v2353_v50, %v1893_v10 }
 0x216   : > { %v2462_v33 = vadd.f32 %v4222_v12, %v2426_v54 }
 0x217   : > { %v2176_v18 = vpop.f32.mrf.mxu2  ;;  %v2265_v3 = vpop.f32.mrf.mxu3 }
 0x218   : > { %v2357_v43 = vpop.f32.mrf.mxu0  ;;  %2494 = vst [vmem:[%s4229_s22 + $0x20] sm:$0xff] %v2462_v33  ;;  %v2525_v25 = vadd.f32 %v2524_v9, %v2462_v33  ;;  %v2564_v2 = vmul.f32 %v2462_v33, %v2462_v33  ;;  %v2266_v34 = vadd.f32 %v2265_v3, %v2176_v18  ;;  %v1897_v14 = vpop.f32.mrf.mxu1 }
 0x21a   : > { %v2595_v13 = vadd.f32 %v2594_v16, %v2564_v2  ;;  %v2355_v26 = vadd.f32 %v2354_v44, %v2266_v34 }
 0x21b   : > { %1936 = vmatmul.bf16.gmra.mxu1 %v3986_v60  ;;  %2396 = vmatmul.bf16.gmra.mxu0 %v4042_v38  ;;  %v1898_v60 = vadd.f32 %v1897_v14, %v4035_v62 }
 0x21c   : > { %2218 = vmatmul.bf16.gmra.mxu2 %v3429_v61  ;;  %v2427_v58 = vadd.f32 %v2355_v26, %v1895_v20  ;;  %2307 = vmatmul.bf16.gmra.mxu3 %v4039_v11 }
 0x21e   : > { %v2463_v52 = vadd.f32 %v4222_v12, %v2427_v58 }
 0x21f   : > { %v2179_v39 = vpop.f32.mrf.mxu2  ;;  %v2268_v56 = vpop.f32.mrf.mxu3 }
 0x220   : > { %v2359_v21 = vpop.f32.mrf.mxu0  ;;  %2495 = vst [vmem:[%s4229_s22 + $0x28] sm:$0xff] %v2463_v52  ;;  %v2526_v29 = vadd.f32 %v2525_v25, %v2463_v52  ;;  %v2565_v23 = vmul.f32 %v2463_v52, %v2463_v52  ;;  %v2269_v9 = vadd.f32 %v2268_v56, %v2179_v39  ;;  %v1899_v44 = vpop.f32.mrf.mxu1 }
 0x221   : > { %v1900_v3 = vadd.f32 %v1899_v44, %v4048_v19 }
 0x222   : > { %v2596_v63 = vadd.f32 %v2595_v13, %v2565_v23  ;;  %v2358_v24 = vadd.f32 %v2357_v43, %v2269_v9 }
 0x224   : > { %v2428_v17 = vadd.f32 %v2358_v24, %v1898_v60  ;;  %v4474_v60 = vld [vmem:[#allocation36_spill] sm:$0xff] }
 0x226   : > { %v2464_v61 = vadd.f32 %v4222_v12, %v2428_v17 }
 0x227   : > { %v2181_v16 = vpop.f32.mrf.mxu2  ;;  %v2270_v11 = vpop.f32.mrf.mxu3 }
 0x228   : > { %v2362_v8 = vpop.f32.mrf.mxu0  ;;  %2496 = vst [vmem:[%s4229_s22 + $0x30] sm:$0xff] %v2464_v61  ;;  %v2527_v10 = vadd.f32 %v2526_v29, %v2464_v61  ;;  %v2566_v50 = vmul.f32 %v2464_v61, %v2464_v61  ;;  %v2271_v54 = vadd.f32 %v2270_v11, %v2181_v16  ;;  %v1902_v33 = vpop.f32.mrf.mxu1 }
 0x22a   : > { %v2597_v18 = vadd.f32 %v2596_v63, %v2566_v50  ;;  %v2360_v25 = vadd.f32 %v2359_v21, %v2271_v54 }
 0x22b   : > { %1941 = vmatmul.bf16.gmra.mxu1 %v4020_v22  ;;  %2401 = vmatmul.bf16.gmra.mxu0 %v4076_v37  ;;  %v4473_v22 = vld [vmem:[#allocation35_spill] sm:$0xff] }
 0x22c   : > { %2223 = vmatmul.bf16.gmra.mxu2 %v3532_v40  ;;  %v2429_v62 = vadd.f32 %v2360_v25, %v1900_v3  ;;  %2312 = vmatmul.bf16.gmra.mxu3 %v4073_v15  ;;  %v1903_v58 = vadd.f32 %v1902_v33, %v4473_v22 }
 0x22e   : > { %v2465_v43 = vadd.f32 %v4222_v12, %v2429_v62 }
 0x22f   : > { %v2184_v2 = vpop.f32.mrf.mxu2  ;;  %v2273_v34 = vpop.f32.mrf.mxu3 }
 0x230   : > { %v2364_v14 = vpop.f32.mrf.mxu0  ;;  %2497 = vst [vmem:[%s4229_s22 + $0x38] sm:$0xff] %v2465_v43  ;;  %v2528_v13 = vadd.f32 %v2527_v10, %v2465_v43  ;;  %v2567_v28 = vmul.f32 %v2465_v43, %v2465_v43  ;;  %v2274_v19 = vadd.f32 %v2273_v34, %v2184_v2  ;;  %v1904_v20 = vpop.f32.mrf.mxu1 }
 0x231   : > { %v1905_v24 = vadd.f32 %v1904_v20, %v4474_v60 }
 0x232   : > { %v2598_v26 = vadd.f32 %v2597_v18, %v2567_v28  ;;  %v2363_v52 = vadd.f32 %v2362_v8, %v2274_v19 }
 0x234   : > { %v2430_v39 = vadd.f32 %v2363_v52, %v1903_v58 }
 0x236   : > { %v2466_v40 = vadd.f32 %v4222_v12, %v2430_v39 }
 0x237   : > { %v2186_v56 = vpop.f32.mrf.mxu2  ;;  %v2275_v15 = vpop.f32.mrf.mxu3 }
 0x238   : > { %v2367_v21 = vpop.f32.mrf.mxu0  ;;  %2498 = vst [vmem:[%s4229_s22 + $0x40] sm:$0xff] %v2466_v40  ;;  %v2529_v29 = vadd.f32 %v2528_v13, %v2466_v40  ;;  %v2568_v23 = vmul.f32 %v2466_v40, %v2466_v40  ;;  %v2276_v9 = vadd.f32 %v2275_v15, %v2186_v56  ;;  %v1907_v44 = vpop.f32.mrf.mxu1 }
 0x23a   : > { %v2599_v63 = vadd.f32 %v2598_v26, %v2568_v23  ;;  %v2365_v17 = vadd.f32 %v2364_v14, %v2276_v9 }
 0x23b   : > { %1946 = vmatmul.bf16.gmra.mxu1 %v4042_v38  ;;  %2406 = vmatmul.bf16.gmra.mxu0 %v4098_v46  ;;  %v1908_v38 = vadd.f32 %v1907_v44, %v4090_v47 }
 0x23c   : > { %2228 = vmatmul.bf16.gmra.mxu2 %v3634_v41  ;;  %v2431_v61 = vadd.f32 %v2365_v17, %v1905_v24  ;;  %2317 = vmatmul.bf16.gmra.mxu3 %v4095_v59 }
 0x23e   : > { %v2467_v16 = vadd.f32 %v4222_v12, %v2431_v61 }
 0x23f   : > { %v2189_v11 = vpop.f32.mrf.mxu2  ;;  %v2278_v8 = vpop.f32.mrf.mxu3 }
 0x240   : > { %v2369_v10 = vpop.f32.mrf.mxu0  ;;  %2499 = vst [vmem:[%s4229_s22 + $0x48] sm:$0xff] %v2467_v16  ;;  %v2530_v50 = vadd.f32 %v2529_v29, %v2467_v16  ;;  %v2569_v54 = vmul.f32 %v2467_v16, %v2467_v16  ;;  %v2279_v33 = vadd.f32 %v2278_v8, %v2189_v11  ;;  %v1909_v18 = vpop.f32.mrf.mxu1 }
 0x241   : > { %v1910_v20 = vadd.f32 %v1909_v18, %v4104_v55 }
 0x242   : > { %v2600_v3 = vadd.f32 %v2599_v63, %v2569_v54  ;;  %v2368_v25 = vadd.f32 %v2367_v21, %v2279_v33 }
 0x244   : > { %v2432_v62 = vadd.f32 %v2368_v25, %v1908_v38 }
 0x246   : > { %v2468_v41 = vadd.f32 %v4222_v12, %v2432_v62 }
 0x247   : > { %v2191_v43 = vpop.f32.mrf.mxu2  ;;  %v2280_v59 = vpop.f32.mrf.mxu3 }
 0x248   : > { %v2372_v2 = vpop.f32.mrf.mxu0  ;;  %2500 = vst [vmem:[%s4229_s22 + $0x50] sm:$0xff] %v2468_v41  ;;  %v2531_v34 = vadd.f32 %v2530_v50, %v2468_v41  ;;  %v2570_v14 = vmul.f32 %v2468_v41, %v2468_v41  ;;  %v2281_v13 = vadd.f32 %v2280_v59, %v2191_v43  ;;  %v1912_v28 = vpop.f32.mrf.mxu1 }
 0x24a   : > { %v2601_v19 = vadd.f32 %v2600_v3, %v2570_v14  ;;  %v2370_v26 = vadd.f32 %v2369_v10, %v2281_v13 }
 0x24b   : > { %1951 = vmatmul.bf16.gmra.mxu1 %v4076_v37  ;;  %2411 = vmatmul.bf16.gmra.mxu0 %v4120_v30  ;;  %v1913_v37 = vadd.f32 %v1912_v28, %v4112_v6  ;;  %v4475_v6 = vmov 0  }
 0x24c   : > { %2233 = vmatmul.bf16.gmra.mxu2 %v3680_v35  ;;  %v2433_v47 = vadd.f32 %v2370_v26, %v1910_v20  ;;  %2322 = vmatmul.bf16.gmra.mxu3 %v4117_v5 }
 0x24e   : > { %v2469_v22 = vadd.f32 %v4222_v12, %v2433_v47 }
 0x24f   : > { %v2194_v58 = vpop.f32.mrf.mxu2  ;;  %v2283_v52 = vpop.f32.mrf.mxu3 }
 0x250   : > { %v2374_v39 = vpop.f32.mrf.mxu0  ;;  %2501 = vst [vmem:[%s4229_s22 + $0x58] sm:$0xff] %v2469_v22  ;;  %v2532_v40 = vadd.f32 %v2531_v34, %v2469_v22  ;;  %v2571_v56 = vmul.f32 %v2469_v22, %v2469_v22  ;;  %v2284_v55 = vadd.f32 %v2283_v52, %v2194_v58  ;;  %v1914_v15 = vpop.f32.mrf.mxu1 }
 0x251   : > { %v1915_v61 = vadd.f32 %v1914_v15, %v4125_v53 }
 0x252   : > { %v2602_v21 = vadd.f32 %v2601_v19, %v2571_v56  ;;  %v2373_v30 = vadd.f32 %v2372_v2, %v2284_v55 }
 0x254   : > { %v2434_v29 = vadd.f32 %v2373_v30, %v1913_v37 }
 0x256   : > { %v2470_v35 = vadd.f32 %v4222_v12, %v2434_v29 }
 0x257   : > { %v2196_v23 = vpop.f32.mrf.mxu2  ;;  %v2285_v5 = vpop.f32.mrf.mxu3 }
 0x258   : > { %v2377_v9 = vpop.f32.mrf.mxu0  ;;  %2502 = vst [vmem:[%s4229_s22 + $0x60] sm:$0xff] %v2470_v35  ;;  %v2533_v44 = vadd.f32 %v2532_v40, %v2470_v35  ;;  %v2572_v63 = vmul.f32 %v2470_v35, %v2470_v35  ;;  %v2286_v60 = vadd.f32 %v2285_v5, %v2196_v23  ;;  %v1917_v24 = vpop.f32.mrf.mxu1 }
 0x25a   : > { %v2603_v17 = vadd.f32 %v2602_v21, %v2572_v63  ;;  %v2375_v16 = vadd.f32 %v2374_v39, %v2286_v60 }
 0x25b   : > { %1956 = vmatmul.bf16.gmra.mxu1 %v4098_v46  ;;  %2416 = vmatmul.bf16.gmra.mxu0 %v3690_v49  ;;  %v1918_v46 = vadd.f32 %v1917_v24, %v4129_v42 }
 0x25c   : > { %2238 = vmatmul.bf16.gmra.mxu2 %v4475_v6  ;;  %v2435_v11 = vadd.f32 %v2375_v16, %v1915_v61  ;;  %2327 = vmatmul.bf16.gmra.mxu3 %v3690_v49 }
 0x25e   : > { %v2471_v8 = vadd.f32 %v4222_v12, %v2435_v11 }
 0x25f   : > { %v2199_v10 = vpop.f32.mrf.mxu2  ;;  %v2288_v50 = vpop.f32.mrf.mxu3 }
 0x260   : > { %v2379_v54 = vpop.f32.mrf.mxu0  ;;  %2503 = vst [vmem:[%s4229_s22 + $0x68] sm:$0xff] %v2471_v8  ;;  %v2534_v33 = vadd.f32 %v2533_v44, %v2471_v8  ;;  %v2573_v18 = vmul.f32 %v2471_v8, %v2471_v8  ;;  %v2289_v53 = vadd.f32 %v2288_v50, %v2199_v10  ;;  %v1919_v3 = vpop.f32.mrf.mxu1 }
 0x261   : > { %v1920_v19 = vadd.f32 %v1919_v3, %v4135_v36 }
 0x262   : > { %v2604_v38 = vadd.f32 %v2603_v17, %v2573_v18  ;;  %v2378_v25 = vadd.f32 %v2377_v9, %v2289_v53 }
 0x264   : > { %v2436_v62 = vadd.f32 %v2378_v25, %v1918_v46 }
 0x266   : > { %v2472_v41 = vadd.f32 %v4222_v12, %v2436_v62 }
 0x267   : > { %v2201_v43 = vpop.f32.mrf.mxu2  ;;  %v2290_v49 = vpop.f32.mrf.mxu3 }
 0x268   : > { %v2382_v59 = vpop.f32.mrf.mxu0  ;;  %2504 = vst [vmem:[%s4229_s22 + $0x70] sm:$0xff] %v2472_v41  ;;  %v2535_v2 = vadd.f32 %v2534_v33, %v2472_v41  ;;  %v2574_v34 = vmul.f32 %v2472_v41, %v2472_v41  ;;  %v2291_v14 = vadd.f32 %v2290_v49, %v2201_v43  ;;  %v1922_v13 = vpop.f32.mrf.mxu1 }
 0x269   : > { %v1923_v15 = vadd.f32 %v1922_v13, %v4139_v1 }
 0x26a   : > { %v2605_v28 = vadd.f32 %v2604_v38, %v2574_v34  ;;  %v2380_v20 = vadd.f32 %v2379_v54, %v2291_v14 }
 0x26c   : > { %v2437_v26 = vadd.f32 %v2380_v20, %v1920_v19 }
 0x26e   : > { %v2473_v42 = vadd.f32 %v4222_v12, %v2437_v26 }
 0x26f   : > { %v2204_v47 = vpop.f32.mrf.mxu2  ;;  %v2293_v22 = vpop.f32.mrf.mxu3 }
 0x270   : > { %v2384_v58 = vpop.f32.mrf.mxu0  ;;  %2505 = vst [vmem:[%s4229_s22 + $0x78] sm:$0xff] %v2473_v42  ;;  %v2536_v52 = vadd.f32 %v2535_v2, %v2473_v42  ;;  %v2575_v39 = vmul.f32 %v2473_v42, %v2473_v42  ;;  %v2294_v40 = vadd.f32 %v2293_v22, %v2204_v47  ;;  %v1924_v56 = vpop.f32.mrf.mxu1 }
 0x271   : > { %v1925_v60 = vadd.f32 %v1924_v56, %v4145_v7 }
 0x272   : > { %v2606_v55 = vadd.f32 %v2605_v28, %v2575_v39  ;;  %v2383_v21 = vadd.f32 %v2382_v59, %v2294_v40 }
 0x274   : > { %v2438_v37 = vadd.f32 %v2383_v21, %v1923_v15 }
 0x276   : > { %v2474_v36 = vadd.f32 %v4222_v12, %v2438_v37 }
 0x277   : > { %v2206_v30 = vpop.f32.mrf.mxu2  ;;  %v2295_v29 = vpop.f32.mrf.mxu3 }
 0x278   : > { %v2387_v35 = vpop.f32.mrf.mxu0  ;;  %2506 = vst [vmem:[%s4229_s22 + $0x80] sm:$0xff] %v2474_v36  ;;  %v2537_v23 = vadd.f32 %v2536_v52, %v2474_v36  ;;  %v2576_v5 = vmul.f32 %v2474_v36, %v2474_v36  ;;  %v2296_v9 = vadd.f32 %v2295_v29, %v2206_v30  ;;  %v1927_v44 = vpop.f32.mrf.mxu1 }
 0x279   : > { %v1928_v33 = vadd.f32 %v1927_v44, %v4149_v48 }
 0x27a   : > { %v2607_v63 = vadd.f32 %v2606_v55, %v2576_v5  ;;  %v2385_v24 = vadd.f32 %v2384_v58, %v2296_v9 }
 0x27c   : > { %v2439_v17 = vadd.f32 %v2385_v24, %v1925_v60 }
 0x27e   : > { %v2475_v1 = vadd.f32 %v4222_v12, %v2439_v17 }
 0x27f   : > { %v2209_v61 = vpop.f32.mrf.mxu2  ;;  %v2298_v16 = vpop.f32.mrf.mxu3 }
 0x280   : > { %v2389_v6 = vpop.f32.mrf.mxu0  ;;  %2507 = vst [vmem:[%s4229_s22 + $0x88] sm:$0xff] %v2475_v1  ;;  %v2538_v11 = vadd.f32 %v2537_v23, %v2475_v1  ;;  %v2577_v8 = vmul.f32 %v2475_v1, %v2475_v1  ;;  %v2299_v10 = vadd.f32 %v2298_v16, %v2209_v61  ;;  %v1929_v50 = vpop.f32.mrf.mxu1 }
 0x281   : > { %v1930_v59 = vadd.f32 %v1929_v50, %v4155_v27 }
 0x282   : > { %v2608_v54 = vadd.f32 %v2607_v63, %v2577_v8  ;;  %v2388_v18 = vadd.f32 %v2387_v35, %v2299_v10 }
 0x284   : > { %v2440_v53 = vadd.f32 %v2388_v18, %v1928_v33 }
 0x286   : > { %v2476_v7 = vadd.f32 %v4222_v12, %v2440_v53 }
 0x287   : > { %v2211_v3 = vpop.f32.mrf.mxu2  ;;  %v2300_v38 = vpop.f32.mrf.mxu3 }
 0x288   : > { %v2392_v46 = vpop.f32.mrf.mxu0  ;;  %2508 = vst [vmem:[%s4229_s22 + $0x90] sm:$0xff] %v2476_v7  ;;  %v2539_v25 = vadd.f32 %v2538_v11, %v2476_v7  ;;  %v2578_v62 = vmul.f32 %v2476_v7, %v2476_v7  ;;  %v2301_v41 = vadd.f32 %v2300_v38, %v2211_v3  ;;  %v1932_v43 = vpop.f32.mrf.mxu1 }
 0x289   : > { %v1933_v22 = vadd.f32 %v1932_v43, %v4159_v45 }
 0x28a   : > { %v2609_v49 = vadd.f32 %v2608_v54, %v2578_v62  ;;  %v2390_v2 = vadd.f32 %v2389_v6, %v2301_v41 }
 0x28c   : > { %v2441_v34 = vadd.f32 %v2390_v2, %v1930_v59  ;;  %v4476_v2 = vld [vmem:[#allocation8_spill] sm:$0xff] }
 0x28e   : > { %v2477_v48 = vadd.f32 %v4222_v12, %v2441_v34 }
 0x28f   : > { %v2214_v14 = vpop.f32.mrf.mxu2  ;;  %v2303_v13 = vpop.f32.mrf.mxu3 }
 0x290   : > { %v2394_v28 = vpop.f32.mrf.mxu0  ;;  %2509 = vst [vmem:[%s4229_s22 + $0x98] sm:$0xff] %v2477_v48  ;;  %v2540_v19 = vadd.f32 %v2539_v25, %v2477_v48  ;;  %v2579_v20 = vmul.f32 %v2477_v48, %v2477_v48  ;;  %v2304_v26 = vadd.f32 %v2303_v13, %v2214_v14  ;;  %v1934_v42 = vpop.f32.mrf.mxu1 }
 0x291   : > { %v1935_v30 = vadd.f32 %v1934_v42, %v4165_v32 }
 0x292   : > { %v2610_v47 = vadd.f32 %v2609_v49, %v2579_v20  ;;  %v2393_v58 = vadd.f32 %v2392_v46, %v2304_v26 }
 0x294   : > { %v2442_v52 = vadd.f32 %v2393_v58, %v1933_v22  ;;  %v4477_v58 = vld [vmem:[#allocation5_spill] sm:$0xff] }
 0x296   : > { %v2478_v27 = vadd.f32 %v4222_v12, %v2442_v52 }
 0x297   : > { %v2216_v39 = vpop.f32.mrf.mxu2  ;;  %v2305_v40 = vpop.f32.mrf.mxu3 }
 0x298   : > { %v2397_v56 = vpop.f32.mrf.mxu0  ;;  %2510 = vst [vmem:[%s4229_s22 + $0xa0] sm:$0xff] %v2478_v27  ;;  %v2541_v55 = vadd.f32 %v2540_v19, %v2478_v27  ;;  %v2580_v15 = vmul.f32 %v2478_v27, %v2478_v27  ;;  %v2306_v21 = vadd.f32 %v2305_v40, %v2216_v39  ;;  %v1937_v37 = vpop.f32.mrf.mxu1 }
 0x299   : > { %v1938_v1 = vadd.f32 %v1937_v37, %v4169_v57 }
 0x29a   : > { %v2611_v36 = vadd.f32 %v2610_v47, %v2580_v15  ;;  %v2395_v29 = vadd.f32 %v2394_v28, %v2306_v21 }
 0x29c   : > { %v2443_v35 = vadd.f32 %v2395_v29, %v1935_v30 }
 0x29e   : > { %v2479_v45 = vadd.f32 %v4222_v12, %v2443_v35  ;;  %v4478_v35 = vld [vmem:[#allocation7_spill] sm:$0xff] }
 0x29f   : > { %v2219_v23 = vpop.f32.mrf.mxu2  ;;  %v2308_v5 = vpop.f32.mrf.mxu3 }
 0x2a0   : > { %v2399_v9 = vpop.f32.mrf.mxu0  ;;  %2511 = vst [vmem:[%s4229_s22 + $0xa8] sm:$0xff] %v2479_v45  ;;  %v2542_v44 = vadd.f32 %v2541_v55, %v2479_v45  ;;  %v2581_v63 = vmul.f32 %v2479_v45, %v2479_v45  ;;  %v2309_v60 = vadd.f32 %v2308_v5, %v2219_v23  ;;  %v1939_v24 = vpop.f32.mrf.mxu1 }
 0x2a1   : > { %v1940_v53 = vadd.f32 %v1939_v24, %v4175_v51 }
 0x2a2   : > { %v2612_v17 = vadd.f32 %v2611_v36, %v2581_v63  ;;  %v2398_v61 = vadd.f32 %v2397_v56, %v2309_v60 }
 0x2a4   : > { %v2444_v16 = vadd.f32 %v2398_v61, %v1938_v1 }
 0x2a6   : > { %v2480_v32 = vadd.f32 %v4222_v12, %v2444_v16 }
 0x2a7   : > { %v2221_v6 = vpop.f32.mrf.mxu2  ;;  %v2310_v11 = vpop.f32.mrf.mxu3 }
 0x2a8   : > { %v2402_v8 = vpop.f32.mrf.mxu0  ;;  %2512 = vst [vmem:[%s4229_s22 + $0xb0] sm:$0xff] %v2480_v32  ;;  %v2543_v10 = vadd.f32 %v2542_v44, %v2480_v32  ;;  %v2582_v50 = vmul.f32 %v2480_v32, %v2480_v32  ;;  %v2311_v54 = vadd.f32 %v2310_v11, %v2221_v6  ;;  %v1942_v33 = vpop.f32.mrf.mxu1 }
 0x2a9   : > { %v1943_v34 = vadd.f32 %v1942_v33, %v4476_v2 }
 0x2aa   : > { %v2613_v18 = vadd.f32 %v2612_v17, %v2582_v50  ;;  %v2400_v7 = vadd.f32 %v2399_v9, %v2311_v54 }
 0x2ac   : > { %v2445_v3 = vadd.f32 %v2400_v7, %v1940_v53 }
 0x2ae   : > { %v2481_v57 = vadd.f32 %v4222_v12, %v2445_v3 }
 0x2af   : > { %v2224_v38 = vpop.f32.mrf.mxu2  ;;  %v2313_v46 = vpop.f32.mrf.mxu3 }
 0x2b0   : > { %v2404_v25 = vpop.f32.mrf.mxu0  ;;  %2513 = vst [vmem:[%s4229_s22 + $0xb8] sm:$0xff] %v2481_v57  ;;  %v2544_v62 = vadd.f32 %v2543_v10, %v2481_v57  ;;  %v2583_v41 = vmul.f32 %v2481_v57, %v2481_v57  ;;  %v2314_v43 = vadd.f32 %v2313_v46, %v2224_v38  ;;  %v1944_v49 = vpop.f32.mrf.mxu1 }
 0x2b1   : > { %v1945_v52 = vadd.f32 %v1944_v49, %v4477_v58 }
 0x2b2   : > { %v2614_v59 = vadd.f32 %v2613_v18, %v2583_v41  ;;  %v2403_v48 = vadd.f32 %v2402_v8, %v2314_v43 }
 0x2b4   : > { %v2446_v14 = vadd.f32 %v2403_v48, %v1943_v34 }
 0x2b6   : > { %v2482_v51 = vadd.f32 %v4222_v12, %v2446_v14 }
 0x2b7   : > { %v2226_v13 = vpop.f32.mrf.mxu2  ;;  %v2315_v28 = vpop.f32.mrf.mxu3 }
 0x2b8   : > { %v2407_v19 = vpop.f32.mrf.mxu0  ;;  %2514 = vst [vmem:[%s4229_s22 + $0xc0] sm:$0xff] %v2482_v51  ;;  %v2545_v20 = vadd.f32 %v2544_v62, %v2482_v51  ;;  %v2584_v26 = vmul.f32 %v2482_v51, %v2482_v51  ;;  %v2316_v42 = vadd.f32 %v2315_v28, %v2226_v13  ;;  %v1947_v47 = vpop.f32.mrf.mxu1 }
 0x2b9   : > { %v1948_v45 = vadd.f32 %v1947_v47, %v4478_v35  ;;  %v4479_v47 = vld [vmem:[#allocation19_spill] sm:$0xff] }
 0x2ba   : > { %v2615_v22 = vadd.f32 %v2614_v59, %v2584_v26  ;;  %v2405_v27 = vadd.f32 %v2404_v25, %v2316_v42 }
 0x2bc   : > { %v2447_v39 = vadd.f32 %v2405_v27, %v1945_v52 }
 0x2be   : > { %v2483_v40 = vadd.f32 %v4222_v12, %v2447_v39 }
 0x2bf   : > { %v2229_v56 = vpop.f32.mrf.mxu2  ;;  %v2318_v55 = vpop.f32.mrf.mxu3 }
 0x2c0   : > { %2515 = vst [vmem:[%s4229_s22 + $0xc8] sm:$0xff] %v2483_v40  ;;  %v2546_v15 = vadd.f32 %v2545_v20, %v2483_v40  ;;  %v2585_v21 = vmul.f32 %v2483_v40, %v2483_v40  ;;  %v2319_v37 = vadd.f32 %v2318_v55, %v2229_v56  ;;  %v1949_v36 = vpop.f32.mrf.mxu1  ;;  %v2409_v30 = vpop.f32.mrf.mxu0 }
 0x2c1   : > { %v1950_v16 = vadd.f32 %v1949_v36, %v4195_v0  ;;  %v4480_v36 = vld [vmem:[#allocation21_spill] sm:$0xff] }
 0x2c2   : > { %v2616_v29 = vadd.f32 %v2615_v22, %v2585_v21  ;;  %v2408_v23 = vadd.f32 %v2407_v19, %v2319_v37 }
 0x2c4   : > { %v2448_v5 = vadd.f32 %v2408_v23, %v1948_v45 }
 0x2c6   : > { %v2484_v9 = vadd.f32 %v4222_v12, %v2448_v5 }
 0x2c7   : > { %v2231_v44 = vpop.f32.mrf.mxu2  ;;  %v2320_v63 = vpop.f32.mrf.mxu3 }
 0x2c8   : > { %2516 = vst [vmem:[%s4229_s22 + $0xd0] sm:$0xff] %v2484_v9  ;;  %v2547_v60 = vadd.f32 %v2546_v15, %v2484_v9  ;;  %v2586_v24 = vmul.f32 %v2484_v9, %v2484_v9  ;;  %v2321_v17 = vadd.f32 %v2320_v63, %v2231_v44  ;;  %v1952_v1 = vpop.f32.mrf.mxu1  ;;  %v2412_v6 = vpop.f32.mrf.mxu0 }
 0x2c9   : > { %v1953_v7 = vadd.f32 %v1952_v1, %v4199_v31 }
 0x2ca   : > { %v2617_v61 = vadd.f32 %v2616_v29, %v2586_v24  ;;  %v2410_v32 = vadd.f32 %v2409_v30, %v2321_v17 }
 0x2cc   : > { %v2449_v11 = vadd.f32 %v2410_v32, %v1950_v16 }
 0x2ce   : > { %v2485_v8 = vadd.f32 %v4222_v12, %v2449_v11 }
 0x2cf   : > { %v2234_v10 = vpop.f32.mrf.mxu2  ;;  %v2323_v50 = vpop.f32.mrf.mxu3 }
 0x2d0   : > { %2517 = vst [vmem:[%s4229_s22 + $0xd8] sm:$0xff] %v2485_v8  ;;  %v2548_v54 = vadd.f32 %v2547_v60, %v2485_v8  ;;  %v2587_v33 = vmul.f32 %v2485_v8, %v2485_v8  ;;  %v2324_v18 = vadd.f32 %v2323_v50, %v2234_v10  ;;  %v1954_v57 = vpop.f32.mrf.mxu1  ;;  %v2414_v46 = vpop.f32.mrf.mxu0 }
 0x2d1   : > { %v1955_v2 = vadd.f32 %v1954_v57, %v4205_v4 }
 0x2d2   : > { %v2618_v53 = vadd.f32 %v2617_v61, %v2587_v33  ;;  %v2413_v3 = vadd.f32 %v2412_v6, %v2324_v18 }
 0x2d4   : > { %v2450_v38 = vadd.f32 %v2413_v3, %v1953_v7 }
 0x2d6   : > { %v2486_v0 = vadd.f32 %v4222_v12, %v2450_v38 }
 0x2d7   : > { %v2236_v25 = vpop.f32.mrf.mxu2  ;;  %v2325_v62 = vpop.f32.mrf.mxu3 }
 0x2d8   : > { %2518 = vst [vmem:[%s4229_s22 + $0xe0] sm:$0xff] %v2486_v0  ;;  %v2549_v41 = vadd.f32 %v2548_v54, %v2486_v0  ;;  %v2588_v43 = vmul.f32 %v2486_v0, %v2486_v0  ;;  %v2326_v49 = vadd.f32 %v2325_v62, %v2236_v25  ;;  %v1957_v14 = vpop.f32.mrf.mxu1  ;;  %v2417_v13 = vpop.f32.mrf.mxu0 }
 0x2d9   : > { %v1958_v22 = vadd.f32 %v1957_v14, %v4479_v47 }
 0x2da   : > { %v2619_v59 = vadd.f32 %v2618_v53, %v2588_v43  ;;  %v2415_v34 = vadd.f32 %v2414_v46, %v2326_v49 }
 0x2dc   : > { %v2451_v48 = vadd.f32 %v2415_v34, %v1955_v2 }
 0x2de   : > { %v2487_v31 = vadd.f32 %v4222_v12, %v2451_v48 }
 0x2df   : > { %v2239_v51 = vpop.f32.mrf.mxu2  ;;  %v2328_v28 = vpop.f32.mrf.mxu3 }
 0x2e0   : > { %2519 = vst [vmem:[%s4229_s22 + $0xe8] sm:$0xff] %v2487_v31  ;;  %v2550_v19 = vadd.f32 %v2549_v41, %v2487_v31  ;;  %v2589_v20 = vmul.f32 %v2487_v31, %v2487_v31  ;;  %v2329_v26 = vadd.f32 %v2328_v28, %v2239_v51  ;;  %v1959_v39 = vpop.f32.mrf.mxu1  ;;  %v2419_v21 = vpop.f32.mrf.mxu0 }
 0x2e1   : > { %v1960_v30 = vadd.f32 %v1959_v39, %v4480_v36 }
 0x2e2   : > { %v2620_v42 = vadd.f32 %v2619_v59, %v2589_v20  ;;  %v2418_v58 = vadd.f32 %v2417_v13, %v2329_v26 }
 0x2e4   : > { %v2452_v52 = vadd.f32 %v2418_v58, %v1958_v22 }
 0x2e6   : > { %v2488_v4 = vadd.f32 %v4222_v12, %v2452_v52 }
 0x2e7   : > { %v2241_v27 = vpop.f32.mrf.mxu2  ;;  %v2330_v40 = vpop.f32.mrf.mxu3 }
 0x2e8   : > { %2520 = vst [vmem:[%s4229_s22 + $0xf0] sm:$0xff] %v2488_v4  ;;  %v2551_v56 = vadd.f32 %v2550_v19, %v2488_v4  ;;  %v2590_v55 = vmul.f32 %v2488_v4, %v2488_v4  ;;  %v2331_v15 = vadd.f32 %v2330_v40, %v2241_v27 }
 0x2ea   : > { %v2621_v37 = vadd.f32 %v2620_v42, %v2590_v55  ;;  %v2420_v29 = vadd.f32 %v2419_v21, %v2331_v15 }
 0x2ec   : > { %v2453_v35 = vadd.f32 %v2420_v29, %v1960_v30 }
 0x2ee   : > { %v2489_v45 = vadd.f32 %v4222_v12, %v2453_v35 }
 0x2f0   : > { %2521 = vst [vmem:[%s4229_s22 + $0xf8] sm:$0xff] %v2489_v45  ;;  %v2552_v23 = vadd.f32 %v2551_v56, %v2489_v45  ;;  %v2591_v5 = vmul.f32 %v2489_v45, %v2489_v45 }
 0x2f2   : > { %v2553_v9 = vrot.slane %v2552_v23, 4  ;;  %v2622_v44 = vadd.f32 %v2621_v37, %v2591_v5 }
 0x2f4   : > { %v2554_v63 = vadd.f32 %v2553_v9, %v2552_v23  ;;  %v2623_v60 = vrot.slane %v2622_v44, 4 }
 0x2f6   : > { %v2555_v24 = vrot.slane %v2554_v63, 2  ;;  %v2624_v17 = vadd.f32 %v2623_v60, %v2622_v44 }
 0x2f8   : > { %v2556_v1 = vadd.f32 %v2555_v24, %v2554_v63  ;;  %v2625_v61 = vrot.slane %v2624_v17, 2 }
 0x2fa   : > { %v2557_v16 = vrot.slane %v2556_v1, 1  ;;  %v2626_v32 = vadd.f32 %v2625_v61, %v2624_v17 }
 0x2fc   : > { %v2558_v6 = vadd.f32 %v2557_v16, %v2556_v1  ;;  %v2627_v12 = vrot.slane %v2626_v32, 1 }
 0x2fe   : > { %2559 = vst [vmem:[%s292_s26] sm:$0x1] %v2558_v6  ;;  %v2628_v11 = vadd.f32 %v2627_v12, %v2626_v32 }
 0x300   : > { %2629 = vst [vmem:[%s295_s29] sm:$0x1] %v2628_v11 }
 0x301 PF: > { %s18_s24 = sadd.s32 1, %s3246_s24  }
 0x302   : > { %p15_p4 = scmp.ge.s32.totalorder %s18_s24, 4  }
 0x304   :  { %17 = sbr.rel (!%p15_p4) target bundleno = 1 (0x1), region = 96 }

</bundles_post_ra>
